<compile_context>
chip_gen: v7x
topology: tpu7x:2x2x1
jax: 0.10.0
libtpu: 0.0.40
codegen_flags: <defaults>
</compile_context>

<pallas_src>
import jax
import jax.numpy as jnp
from jax.experimental import pallas as pl
from jax.experimental.pallas import tpu as pltpu


# ----------------------------- model constants --------------------------------
# Conv1d(1,3,k=39,s=19,p=19) -> Conv1d(3,9,k=39,s=19,p=19) -> Conv1d(9,27,k=64)
# -> squeeze -> Linear(27,27) -> PReLU -> Linear(27,10) -> Softmax(dim=-1)
C1OUT, K1, S1, PAD1 = 3, 39, 19, 19
C2OUT, K2, S2, PAD2 = 9, 39, 19, 19
C3OUT, K3 = 27, 64
HID, NCLS = 27, 10
NLANE = 128                      # lane-dense output width for the conv1 kernel


def _round_up(n, m):
    return ((n + m - 1) // m) * m


# ------------------------- Pallas kernels ------------------------------------

def conv1_matmul_kernel(p_ref, w_ref, b_ref, o_ref):
    # (rows, 39) bf16 @ (39, 128) bf16  -> f32 accumulate, + bias (only first 3
    # lanes are real channels; the rest are zero weights/bias).
    o_ref[...] = (
        jnp.dot(p_ref[...], w_ref[...], preferred_element_type=jnp.float32)
        + b_ref[...]
    )


def fused_tail_kernel(p2_ref, w23_ref, b23_ref, l1w_ref, l1b_ref, a_ref,
                      l2w_ref, l2b_ref, o_ref):
    # conv2∘conv3 (exact composed linear map) -> Linear -> PReLU -> Linear -> Softmax
    # All intermediates stay in VMEM / vregs; nothing is lane-padded, so no masks.
    y3 = (jnp.dot(p2_ref[...], w23_ref[...], preferred_element_type=jnp.float32)
          + b23_ref[...])                                          # (B, 27)
    h = (jnp.dot(y3, l1w_ref[...], preferred_element_type=jnp.float32)
         + l1b_ref[...])                                           # (B, 27)
    alpha = a_ref[0]                                               # PReLU slope (SMEM)
    h = jnp.where(h > 0.0, h, alpha * h)
    logits = (jnp.dot(h, l2w_ref[...], preferred_element_type=jnp.float32)
              + l2b_ref[...])                                      # (B, 10)
    m = jnp.max(logits, axis=-1, keepdims=True)
    e = jnp.exp(logits - m)
    o_ref[...] = e / jnp.sum(e, axis=-1, keepdims=True)


# ------------------------- Pallas wrappers -----------------------------------

def conv1_pallas(patches, w_mat, bias, *, row_block):
    """patches:(M,39) bf16 @ w_mat:(39,128) bf16 + bias:(1,128) -> (M,128) f32.

    Grid over rows (one block per batch) so a v7x chip's two TensorCores split
    the only non-trivial matmul; on v5e/v6e the grid just pipelines.
    """
    M, K = patches.shape
    N = w_mat.shape[1]
    cost = pl.CostEstimate(
        flops=2 * M * K * N,
        transcendentals=0,
        bytes_accessed=patches.size * 2 + w_mat.size * 2 + bias.size * 4 + M * N * 4,
    )
    return pl.pallas_call(
        conv1_matmul_kernel,
        out_shape=jax.ShapeDtypeStruct((M, N), jnp.float32),
        grid=(M // row_block,),
        in_specs=[
            pl.BlockSpec((row_block, K), lambda i: (i, 0)),   # K stays unpadded
            pl.BlockSpec((K, N), lambda i: (0, 0)),
            pl.BlockSpec((1, N), lambda i: (0, 0)),
        ],
        out_specs=pl.BlockSpec((row_block, N), lambda i: (i, 0)),
        compiler_params=pltpu.CompilerParams(dimension_semantics=("parallel",)),
        cost_estimate=cost,
    )(patches, w_mat, bias)


def fused_tail_pallas(p2, w23, b23, l1w, l1b, alpha, l2w, l2b):
    """Single grid-less pallas_call for conv2+conv3 (composed) + classifier head."""
    B = p2.shape[0]
    vmem = pl.BlockSpec(memory_space=pltpu.MemorySpace.VMEM)
    smem = pl.BlockSpec(memory_space=pltpu.MemorySpace.SMEM)
    cost = pl.CostEstimate(
        flops=2 * B * (p2.shape[1] * w23.shape[1]
                       + l1w.shape[0] * l1w.shape[1]
                       + l2w.shape[0] * l2w.shape[1]),
        transcendentals=B * NCLS,
        bytes_accessed=4 * (p2.size + w23.size + b23.size + l1w.size + l1b.size
                            + l2w.size + l2b.size + B * NCLS),
    )
    return pl.pallas_call(
        fused_tail_kernel,
        out_shape=jax.ShapeDtypeStruct((B, NCLS), jnp.float32),
        in_specs=[vmem, vmem, vmem, vmem, vmem, smem, vmem, vmem],
        out_specs=vmem,
        cost_estimate=cost,
    )(p2, w23, b23, l1w, l1b, alpha, l2w, l2b)


# ---------------------------- model ------------------------------------------

def init_params(key):
    ks = jax.random.split(key, 10)

    def u(k, shape, fan_in):
        bound = 1.0 / jnp.sqrt(fan_in)
        return jax.random.uniform(k, shape, jnp.float32, -bound, bound)

    return {
        # Conv1d(1, 3, k=39, s=19, p=19)
        "c1_w": u(ks[0], (3, 1, 39), 1 * 39), "c1_b": u(ks[1], (3,), 1 * 39),
        # Conv1d(3, 9, k=39, s=19, p=19)
        "c2_w": u(ks[2], (9, 3, 39), 3 * 39), "c2_b": u(ks[3], (9,), 3 * 39),
        # Conv1d(9, 27, k=64)
        "c3_w": u(ks[4], (27, 9, 64), 9 * 64), "c3_b": u(ks[5], (27,), 9 * 64),
        # Linear(27, 27)   (torch stores (out, in))
        "l1_w": u(ks[6], (27, 27), 27), "l1_b": u(ks[7], (27,), 27),
        # PReLU() default init
        "prelu_a": jnp.full((1,), 0.25, jnp.float32),
        # Linear(27, 10)
        "l2_w": u(ks[8], (10, 27), 27), "l2_b": u(ks[9], (10,), 27),
    }


@jax.jit
def dummy_model_forward(x, params):
    B, _, L = x.shape

    # ---- conv1: im2col (XLA glue) + Pallas matmul+bias, channels-last output --
    l1out = (L + 2 * PAD1 - K1) // S1 + 1                       # 1198
    xpad = jnp.pad(x[:, 0, :], ((0, 0), (PAD1, PAD1)))          # (B, L+38)
    idx1 = S1 * jnp.arange(l1out)[:, None] + jnp.arange(K1)[None, :]
    patches1 = xpad[:, idx1]                                    # (B, 1198, 39)
    rb = _round_up(l1out, 8)                                    # 1200 rows / batch
    patches1 = jnp.pad(patches1, ((0, 0), (0, rb - l1out), (0, 0)))
    patches1 = patches1.reshape(B * rb, K1).astype(jnp.bfloat16)

    w1mat = jnp.transpose(params["c1_w"][:, 0, :])              # (39, 3)
    w1mat = jnp.pad(w1mat, ((0, 0), (0, NLANE - C1OUT))).astype(jnp.bfloat16)
    b1row = jnp.pad(params["c1_b"], (0, NLANE - C1OUT)).reshape(1, NLANE)
    b1row = b1row.astype(jnp.float32)

    y1 = conv1_pallas(patches1, w1mat, b1row, row_block=rb)     # (B*1200, 128) f32
    y1 = y1.reshape(B, rb, NLANE)[:, :l1out, :C1OUT]            # (B, 1198, 3) chan-last

    # ---- conv2 im2col on the tiny channels-last activation (XLA glue) ---------
    l2out = (l1out + 2 * PAD2 - K2) // S2 + 1                   # 64
    y1pad = jnp.pad(y1, ((0, 0), (PAD2, PAD2), (0, 0)))         # (B, 1236, 3)
    idx2 = S2 * jnp.arange(l2out)[:, None] + jnp.arange(K2)[None, :]
    # (B, 64, 39, 3) flattened row-major -> column index j = k*117 + kk*3 + c1
    p2 = y1pad[:, idx2, :].reshape(B, l2out * K2 * C1OUT)       # (B, 7488)

    # ---- exact conv2∘conv3 composed weight (no nonlinearity between convs) ----
    # W23[(k,kk,c1), c3] = sum_c2 w2[c2,c1,kk] * w3[c3,c2,k]
    w23 = jnp.einsum("qat,oqn->ntao", params["c2_w"], params["c3_w"])
    w23 = w23.reshape(l2out * K2 * C1OUT, C3OUT).astype(jnp.float32)
    b23 = params["c3_b"] + jnp.einsum("q,oqn->o", params["c2_b"], params["c3_w"])
    b23 = b23.reshape(1, C3OUT).astype(jnp.float32)

    # ---- fused conv2+conv3 + Linear -> PReLU -> Linear -> Softmax -------------
    out = fused_tail_pallas(
        p2, w23, b23,
        params["l1_w"].T, params["l1_b"].reshape(1, HID),
        params["prelu_a"],
        params["l2_w"].T, params["l2_b"].reshape(1, NCLS),
    )                                                           # (B, 10)
    return out


# ---------------------------- pure-JAX reference -------------------------------

@jax.jit
def _reference_forward(x, params):
    def conv1d_ref(h, w, b, stride, padding):
        out = jax.lax.conv_general_dilated(
            h, w, window_strides=(stride,), padding=[(padding, padding)],
            dimension_numbers=("NCH", "OIH", "NCH"))
        return out + b[None, :, None]

    h = conv1d_ref(x, params["c1_w"], params["c1_b"], S1, PAD1)
    h = conv1d_ref(h, params["c2_w"], params["c2_b"], S2, PAD2)
    h = conv1d_ref(h, params["c3_w"], params["c3_b"], 1, 0)
    h = jnp.squeeze(h, axis=-1)
    h = h @ params["l1_w"].T + params["l1_b"]
    a = params["prelu_a"][0]
    h = jnp.where(h > 0, h, a * h)
    logits = h @ params["l2_w"].T + params["l2_b"]
    return jax.nn.softmax(logits, axis=-1)


# ---------------------------- main --------------------------------------------

if __name__ == "__main__":
    key = jax.random.PRNGKey(0)
    k_param, k_x = jax.random.split(key)
    params = init_params(k_param)

    # Smallest batch; input length 22744 is dictated by the module structure
    # (conv3 has k=64 / no padding, so conv2's output length must be exactly 64).
    x = jax.random.normal(k_x, (2, 1, 22744), dtype=jnp.float32)

    out = jax.block_until_ready(dummy_model_forward(x, params))

    assert out.shape == (2, 10), out.shape
    row_sums = jnp.sum(out, axis=-1)
    assert bool(jnp.all(jnp.abs(row_sums - 1.0) < 1e-5)), row_sums
    assert bool(jnp.all(out >= 0.0))

    ref = jax.block_until_ready(_reference_forward(x, params))
    max_err = float(jnp.max(jnp.abs(out - ref)))
    # bf16 conv1 inputs (f32 accumulation) -> loose but bug-catching tolerance.
    assert max_err < 5e-2, f"max |out - ref| = {max_err}"

    print("KERNEL_OK")
</pallas_src>

<mosaic_0001>
module attributes {stable_mosaic.version = 11 : i64} {
  func.func @conv1_matmul_kernel(%arg0: i32, %arg1: memref<1200x39xbf16, #tpu.memory_space<vmem>>, %arg2: memref<39x128xbf16, #tpu.memory_space<vmem>>, %arg3: memref<1x128xf32, #tpu.memory_space<vmem>>, %arg4: memref<1200x128xf32, #tpu.memory_space<vmem>>) attributes {dimension_semantics = [#tpu.dimension_semantics<parallel>], iteration_bounds = array<i64: 2>, scalar_prefetch = 0 : i64, scratch_operands = 0 : i64, tpu.core_type = #tpu.core_type<tc>, window_params = [{transform_indices = @transform_0, window_bounds = array<i64: 1200, 39>}, {pipeline_mode = #tpu.pipeline_mode<synchronous>, transform_indices = @transform_1, window_bounds = array<i64: 39, 128>}, {pipeline_mode = #tpu.pipeline_mode<synchronous>, transform_indices = @transform_2, window_bounds = array<i64: 1, 128>}, {transform_indices = @transform_3, window_bounds = array<i64: 1200, 128>}]} {
    %c0 = arith.constant 0 : index
    %c0_0 = arith.constant 0 : index
    %0 = vector.load %arg1[%c0, %c0_0] : memref<1200x39xbf16, #tpu.memory_space<vmem>>, vector<1200x39xbf16>
    %c0_1 = arith.constant 0 : index
    %c0_2 = arith.constant 0 : index
    %1 = vector.load %arg2[%c0_1, %c0_2] : memref<39x128xbf16, #tpu.memory_space<vmem>>, vector<39x128xbf16>
    %cst = arith.constant dense<0.000000e+00> : vector<1200x128xf32>
    %2 = tpu.matmul %0, %1, %cst {dimension_numbers = #tpu.dot_dimension_numbers<[1], [0], [0], [1], [0, 0, 1, 1], [], []>} : vector<1200x39xbf16>, vector<39x128xbf16>, vector<1200x128xf32> -> vector<1200x128xf32>
    %c0_3 = arith.constant 0 : index
    %c0_4 = arith.constant 0 : index
    %3 = vector.load %arg3[%c0_3, %c0_4] : memref<1x128xf32, #tpu.memory_space<vmem>>, vector<1x128xf32>
    %4 = vector.broadcast %3 : vector<1x128xf32> to vector<1200x128xf32>
    %5 = arith.addf %2, %4 : vector<1200x128xf32>
    %c0_5 = arith.constant 0 : index
    %c0_6 = arith.constant 0 : index
    %6 = vector.load %arg4[%c0_5, %c0_6] : memref<1200x128xf32, #tpu.memory_space<vmem>>, vector<1200x128xf32>
    tpu.vector_store %arg4[%c0_5, %c0_6], %5 {strides = array<i32>} : memref<1200x128xf32, #tpu.memory_space<vmem>>, vector<1200x128xf32>,
    return
  }
  func.func @transform_0(%arg0: i32) -> (i32, i32) {
    %c0_i32 = arith.constant 0 : i32
    %c0_i32_0 = arith.constant 0 : i32
    return %arg0, %c0_i32 : i32, i32
  }
  func.func @transform_1(%arg0: i32) -> (i32, i32) {
    %c0_i32 = arith.constant 0 : i32
    %c0_i32_0 = arith.constant 0 : i32
    %c0_i32_1 = arith.constant 0 : i32
    return %c0_i32, %c0_i32_0 : i32, i32
  }
  func.func @transform_2(%arg0: i32) -> (i32, i32) {
    %c0_i32 = arith.constant 0 : i32
    %c0_i32_0 = arith.constant 0 : i32
    %c0_i32_1 = arith.constant 0 : i32
    return %c0_i32, %c0_i32_0 : i32, i32
  }
  func.func @transform_3(%arg0: i32) -> (i32, i32) {
    %c0_i32 = arith.constant 0 : i32
    %c0_i32_0 = arith.constant 0 : i32
    return %arg0, %c0_i32 : i32, i32
  }
}

module attributes {stable_mosaic.version = 11 : i64} {
  func.func @fused_tail_kernel(%arg0: memref<2x7488xf32, #tpu.memory_space<vmem>>, %arg1: memref<7488x27xf32, #tpu.memory_space<vmem>>, %arg2: memref<1x27xf32, #tpu.memory_space<vmem>>, %arg3: memref<27x27xf32, #tpu.memory_space<vmem>>, %arg4: memref<1x27xf32, #tpu.memory_space<vmem>>, %arg5: memref<1xf32, #tpu.memory_space<smem>>, %arg6: memref<27x10xf32, #tpu.memory_space<vmem>>, %arg7: memref<1x10xf32, #tpu.memory_space<vmem>>, %arg8: memref<2x10xf32, #tpu.memory_space<vmem>>) attributes {dimension_semantics = [], scalar_prefetch = 0 : i64, scratch_operands = 0 : i64, tpu.core_type = #tpu.core_type<tc>} {
    %c0 = arith.constant 0 : index
    %c0_0 = arith.constant 0 : index
    %0 = vector.load %arg0[%c0, %c0_0] : memref<2x7488xf32, #tpu.memory_space<vmem>>, vector<2x7488xf32>
    %c0_1 = arith.constant 0 : index
    %c0_2 = arith.constant 0 : index
    %1 = vector.load %arg1[%c0_1, %c0_2] : memref<7488x27xf32, #tpu.memory_space<vmem>>, vector<7488x27xf32>
    %cst = arith.constant dense<0.000000e+00> : vector<2x27xf32>
    %2 = tpu.matmul %0, %1, %cst {dimension_numbers = #tpu.dot_dimension_numbers<[1], [0], [0], [1], [0, 0, 1, 1], [], []>} : vector<2x7488xf32>, vector<7488x27xf32>, vector<2x27xf32> -> vector<2x27xf32>
    %c0_3 = arith.constant 0 : index
    %c0_4 = arith.constant 0 : index
    %3 = vector.load %arg2[%c0_3, %c0_4] : memref<1x27xf32, #tpu.memory_space<vmem>>, vector<1x27xf32>
    %4 = vector.broadcast %3 : vector<1x27xf32> to vector<2x27xf32>
    %5 = arith.addf %2, %4 : vector<2x27xf32>
    %c0_5 = arith.constant 0 : index
    %c0_6 = arith.constant 0 : index
    %6 = vector.load %arg3[%c0_5, %c0_6] : memref<27x27xf32, #tpu.memory_space<vmem>>, vector<27x27xf32>
    %cst_7 = arith.constant dense<0.000000e+00> : vector<2x27xf32>
    %7 = tpu.matmul %5, %6, %cst_7 {dimension_numbers = #tpu.dot_dimension_numbers<[1], [0], [0], [1], [0, 0, 1, 1], [], []>} : vector<2x27xf32>, vector<27x27xf32>, vector<2x27xf32> -> vector<2x27xf32>
    %c0_8 = arith.constant 0 : index
    %c0_9 = arith.constant 0 : index
    %8 = vector.load %arg4[%c0_8, %c0_9] : memref<1x27xf32, #tpu.memory_space<vmem>>, vector<1x27xf32>
    %9 = vector.broadcast %8 : vector<1x27xf32> to vector<2x27xf32>
    %10 = arith.addf %7, %9 : vector<2x27xf32>
    %c0_10 = arith.constant 0 : index
    %11 = memref.load %arg5[%c0_10] : memref<1xf32, #tpu.memory_space<smem>>
    %cst_11 = arith.constant 0.000000e+00 : f32
    %12 = vector.broadcast %cst_11 : f32 to vector<2x27xf32>
    %13 = arith.cmpf ogt, %10, %12 : vector<2x27xf32>
    %14 = vector.broadcast %11 : f32 to vector<2x27xf32>
    %15 = arith.mulf %14, %10 : vector<2x27xf32>
    %16 = arith.select %13, %10, %15 : vector<2x27xi1>, vector<2x27xf32>
    %c0_12 = arith.constant 0 : index
    %c0_13 = arith.constant 0 : index
    %17 = vector.load %arg6[%c0_12, %c0_13] : memref<27x10xf32, #tpu.memory_space<vmem>>, vector<27x10xf32>
    %cst_14 = arith.constant dense<0.000000e+00> : vector<2x10xf32>
    %18 = tpu.matmul %16, %17, %cst_14 {dimension_numbers = #tpu.dot_dimension_numbers<[1], [0], [0], [1], [0, 0, 1, 1], [], []>} : vector<2x27xf32>, vector<27x10xf32>, vector<2x10xf32> -> vector<2x10xf32>
    %c0_15 = arith.constant 0 : index
    %c0_16 = arith.constant 0 : index
    %19 = vector.load %arg7[%c0_15, %c0_16] : memref<1x10xf32, #tpu.memory_space<vmem>>, vector<1x10xf32>
    %20 = vector.broadcast %19 : vector<1x10xf32> to vector<2x10xf32>
    %21 = arith.addf %18, %20 : vector<2x10xf32>
    %cst_17 = arith.constant dense<0xFF800000> : vector<2xf32>
    %22 = vector.multi_reduction <maximumf>, %21, %cst_17 [1] : vector<2x10xf32> to vector<2xf32>
    %23 = vector.shape_cast %22 : vector<2xf32> to vector<2x1xf32>
    %24 = vector.broadcast %23 : vector<2x1xf32> to vector<2x10xf32>
    %25 = arith.subf %21, %24 : vector<2x10xf32>
    %26 = math.exp %25 : vector<2x10xf32>
    %cst_18 = arith.constant dense<0.000000e+00> : vector<2xf32>
    %27 = vector.multi_reduction <add>, %26, %cst_18 [1] : vector<2x10xf32> to vector<2xf32>
    %28 = vector.shape_cast %27 : vector<2xf32> to vector<2x1xf32>
    %29 = vector.broadcast %28 : vector<2x1xf32> to vector<2x10xf32>
    %30 = arith.divf %26, %29 : vector<2x10xf32>
    %c0_19 = arith.constant 0 : index
    %c0_20 = arith.constant 0 : index
    %31 = vector.load %arg8[%c0_19, %c0_20] : memref<2x10xf32, #tpu.memory_space<vmem>>, vector<2x10xf32>
    tpu.vector_store %arg8[%c0_19, %c0_20], %30 {strides = array<i32>} : memref<2x10xf32, #tpu.memory_space<vmem>>, vector<2x10xf32>,
    return
  }
}

</mosaic_0001>

<bundles_post_ra>
// kernel: dummy_model_forward.2
= control target key start
LH: loop header
LB: loop body
LE: loop exit
PB: predicated region body
PF: predicated region fallthrough
CT: control target
= control target key end

     0   :  { %s2473_s12 = smov 0   ;;  %s3123_s0 = inlined_call_operand.vmem [shape: bf16[2400,39], index: 0, kind: input, shape index: {}]   ;;  %s3124_s1 = inlined_call_operand.vmem [shape: bf16[39,128], index: 1, kind: input, shape index: {}]   ;;  %s3125_s2 = inlined_call_operand.vmem [shape: f32[1,128], index: 2, kind: input, shape index: {}]   ;;  %s3126_s3 = inlined_call_operand.vmem [shape: f32[2400,128], index: 3, kind: output, shape index: {}]  }
   0x1 LB: > { %s1799_s13 = sadd.s32 4294967295, %s2448_s12   ;;  %p1803_p0 = scmp.ge.s32.totalorder %s2448_s12, 1  ;;  %s2448_s12 = sphi %s2473_s12, %s13_s12  }
   0x2   : > { %p138_p1 = scmp.lt.s32.totalorder %s2448_s12, 3 }
   0x4   : > { %p139_p2 = pnand %p1803_p0, %p138_p1 }
   0x5   : > { %v2363_v0 = vld [vmem:[%s3124_s1] sm:$0xff] (!%p139_p2)   ;;  %v2450_v1 = vmov (!%p139_p2), 0.0   ;;  %v2364_v2 = vld [vmem:[%s3124_s1 + $0x8] sm:$0xff] (!%p139_p2)   ;;  %vm953_vm0 = vcmask (!%p139_p2), 1042432   ;;  %v2365_v3 = vld [vmem:[%s3124_s1 + $0x10] ss:$0 sps:$4 sm:$0xff] (!%p139_p2)  }
   0x6   : > { %142 = sbr.rel (%p139_p2) target bundleno = 531 (0x213), region = 32  ;;  %2040 = vmatprep.subr.bf16.mxu0 (!%p139_p2), %v2450_v1  ;;  %2346 = vmatprep.subr.bf16.mxu1 (!%p139_p2), %v2450_v1  ;;  %vm954_vm1 = vcmask (!%p139_p2), 1043456   ;;  %v2451_v4 = vmov (!%p139_p2), 65535   ;;  %vm2452_vm2 = vmmov (!%p139_p2), 0   ;;  %vm727_vm3 = vcmask (!%p139_p2), 318464  }
   0x7   : > { %2041 = vmatpush3.bf16.msra.mxu0 (!%p139_p2), %v2363_v0  ;;  %2349 = vmatpush3.bf16.msra.mxu1 (!%p139_p2), %v2363_v0  ;;  %v955_v5 = vsel (!%p139_p2), %vm953_vm0, 4294967295, %v2451_v4  ;;  %s162_s20 = smul.u32 (!%p139_p2), 150, %s1799_s13  ;;  %v2723_v62 = vld [vmem:[%s3125_s2] ss:$0 sm:$0xff] (!%p139_p2) }
   0x8   : > { %2042 = vmatprep.subr.bf16.mxu0 (!%p139_p2), %v2450_v1  ;;  %2347 = vmatprep.subr.bf16.mxu1 (!%p139_p2), %v2450_v1  ;;  %v956_v6 = vsel (!%p139_p2), %vm954_vm1, %v955_v5, 0 }
   0x9   : > { %2046 = vmatprep.mubr.msk.bf16.mxu0 (!%p139_p2), %vm2452_vm2, %v2450_v1  ;;  %2198 = vmatprep.mubr.msk.bf16.mxu1 (!%p139_p2), %vm2452_vm2, %v2450_v1  ;;  %p163_p3 = scmp.lt.s32.totalorder (!%p139_p2), %s162_s20, 299  ;;  %v958_v7 = vand.u32 (!%p139_p2), %v2365_v3, %v956_v6 }
   0xb   : > { %2043 = vmatpush3.bf16.msra.mxu0 (!%p139_p2), %v2364_v2  ;;  %2350 = vmatpush3.bf16.msra.mxu1 (!%p139_p2), %v2364_v2 }
   0xc   : > { %2044 = vmatprep.subr.bf16.mxu0 (!%p139_p2), %v2450_v1  ;;  %2348 = vmatprep.subr.bf16.mxu1 (!%p139_p2), %v2450_v1 }
   0xd   : > { %s3128_s20 = smov (!%p163_p3, %s162_s20), 299 }
   0xe   : > { %s1804_s21 = sshll.u32 %s3128_s20, 2  ;;  %s1805_s25 = sshll.u32 %s3128_s20, 3 }
   0xf   : > { %2045 = vmatpush3.bf16.msra.mxu0 %v958_v7  ;;  %s2506_s24 = scalar_lea.vmem %s3123_s0, %s1804_s21  ;;  %2351 = vmatpush3.bf16.msra.mxu1 %v958_v7  ;;  %s2733_s30 = scalar_lea.vmem %s3126_s3, %s1805_s25 }
  0x10   : > { %v2366_v8 = vld [vmem:[%s2506_s24] sm:$0xff]   ;;  %v2367_v9 = vld [vmem:[%s2506_s24 + $0x130] sm:$0xff]   ;;  %v2368_v10 = vld [vmem:[%s2506_s24 + $0x8] sm:$0xff]  }
  0x11   : > { %v2369_v11 = vld [vmem:[%s2506_s24 + $0x138] sm:$0xff]   ;;  %v2370_v12 = vld [vmem:[%s2506_s24 + $0x10] sm:$0xff]   ;;  %v2371_v13 = vld [vmem:[%s2506_s24 + $0x140] sm:$0xff]  }
  0x12   : > { %2047 = vmatmul.mubr.msk.bf16.vlgmr.msra.gmra.mrb[0].mxu0 %vm727_vm3, %v2366_v8  ;;  %2199 = vmatmul.mubr.msk.bf16.vlgmr.msra.gmra.mrb[0].mxu1 %vm727_vm3, %v2367_v9  ;;  %v2372_v14 = vld [vmem:[%s2506_s24 + $0x18] sm:$0xff]   ;;  %v2373_v15 = vld [vmem:[%s2506_s24 + $0x148] sm:$0xff]   ;;  %v2374_v16 = vld [vmem:[%s2506_s24 + $0x20] sm:$0xff]  }
  0x13   : > { %2050 = vmatprep.mubr.msk.bf16.mxu0 %vm2452_vm2, %v2450_v1  ;;  %2202 = vmatprep.mubr.msk.bf16.mxu1 %vm2452_vm2, %v2450_v1  ;;  %v2375_v17 = vld [vmem:[%s2506_s24 + $0x150] sm:$0xff]   ;;  %v2376_v18 = vld [vmem:[%s2506_s24 + $0x28] sm:$0xff]   ;;  %v2377_v19 = vld [vmem:[%s2506_s24 + $0x158] sm:$0xff]  }
  0x14   : > { %v2378_v20 = vld [vmem:[%s2506_s24 + $0x30] sm:$0xff]   ;;  %v2379_v21 = vld [vmem:[%s2506_s24 + $0x160] sm:$0xff]   ;;  %v2380_v22 = vld [vmem:[%s2506_s24 + $0x38] sm:$0xff]  }
  0x15   : > { %v2381_v23 = vld [vmem:[%s2506_s24 + $0x168] sm:$0xff]   ;;  %v2382_v24 = vld [vmem:[%s2506_s24 + $0x40] sm:$0xff]   ;;  %v2383_v25 = vld [vmem:[%s2506_s24 + $0x170] sm:$0xff]  }
  0x16   : > { %v2384_v26 = vld [vmem:[%s2506_s24 + $0x48] sm:$0xff]   ;;  %v2385_v27 = vld [vmem:[%s2506_s24 + $0x178] sm:$0xff]   ;;  %v2386_v28 = vld [vmem:[%s2506_s24 + $0x50] sm:$0xff]  }
  0x17   : > { %v2387_v29 = vld [vmem:[%s2506_s24 + $0x180] sm:$0xff]   ;;  %v2388_v30 = vld [vmem:[%s2506_s24 + $0x58] sm:$0xff]   ;;  %v2389_v31 = vld [vmem:[%s2506_s24 + $0x188] sm:$0xff]  }
  0x18   : > { %v2390_v32 = vld [vmem:[%s2506_s24 + $0x60] sm:$0xff]   ;;  %v2391_v33 = vld [vmem:[%s2506_s24 + $0x190] sm:$0xff]   ;;  %v2392_v34 = vld [vmem:[%s2506_s24 + $0x68] sm:$0xff]  }
  0x19   : > { %v2393_v35 = vld [vmem:[%s2506_s24 + $0x198] sm:$0xff]   ;;  %v2394_v36 = vld [vmem:[%s2506_s24 + $0x70] sm:$0xff]   ;;  %v2395_v37 = vld [vmem:[%s2506_s24 + $0x1a0] sm:$0xff]  }
  0x1a   : > { %2051 = vmatmul.mubr.msk.bf16.gmra.mrb[4].mxu0 %vm727_vm3, %v2368_v10  ;;  %2203 = vmatmul.mubr.msk.bf16.gmra.mrb[4].mxu1 %vm727_vm3, %v2369_v11  ;;  %v2396_v38 = vld [vmem:[%s2506_s24 + $0x78] sm:$0xff]   ;;  %v2397_v39 = vld [vmem:[%s2506_s24 + $0x1a8] sm:$0xff]   ;;  %v2398_v40 = vld [vmem:[%s2506_s24 + $0x80] sm:$0xff]  }
  0x1b   : > { %2054 = vmatprep.mubr.msk.bf16.mxu0 %vm2452_vm2, %v2450_v1  ;;  %2206 = vmatprep.mubr.msk.bf16.mxu1 %vm2452_vm2, %v2450_v1  ;;  %v2399_v41 = vld [vmem:[%s2506_s24 + $0x1b0] sm:$0xff]   ;;  %v2400_v42 = vld [vmem:[%s2506_s24 + $0x88] sm:$0xff]   ;;  %v2401_v43 = vld [vmem:[%s2506_s24 + $0x1b8] sm:$0xff]  }
  0x1c   : > { %v2402_v44 = vld [vmem:[%s2506_s24 + $0x90] sm:$0xff]   ;;  %v2403_v45 = vld [vmem:[%s2506_s24 + $0x1c0] sm:$0xff]   ;;  %v2404_v46 = vld [vmem:[%s2506_s24 + $0x98] sm:$0xff]  }
  0x1d   : > { %v2405_v47 = vld [vmem:[%s2506_s24 + $0x1c8] sm:$0xff]   ;;  %v2406_v48 = vld [vmem:[%s2506_s24 + $0xa0] sm:$0xff]   ;;  %v2407_v49 = vld [vmem:[%s2506_s24 + $0x1d0] sm:$0xff]  }
  0x1e   : > { %v2408_v50 = vld [vmem:[%s2506_s24 + $0xa8] sm:$0xff]   ;;  %v2409_v51 = vld [vmem:[%s2506_s24 + $0x1d8] sm:$0xff]   ;;  %v2410_v52 = vld [vmem:[%s2506_s24 + $0xb0] sm:$0xff]  }
  0x1f   : > { %v2411_v53 = vld [vmem:[%s2506_s24 + $0x1e0] sm:$0xff]   ;;  %v2412_v54 = vld [vmem:[%s2506_s24 + $0xb8] sm:$0xff]   ;;  %v2413_v55 = vld [vmem:[%s2506_s24 + $0x1e8] sm:$0xff]  }
  0x20   : > { %v2414_v56 = vld [vmem:[%s2506_s24 + $0xc0] sm:$0xff]   ;;  %v2415_v57 = vld [vmem:[%s2506_s24 + $0x1f0] sm:$0xff]   ;;  %v2416_v58 = vld [vmem:[%s2506_s24 + $0xc8] sm:$0xff]  }
  0x21   : > { %v2417_v59 = vld [vmem:[%s2506_s24 + $0x1f8] sm:$0xff]   ;;  %v2418_v60 = vld [vmem:[%s2506_s24 + $0xd0] sm:$0xff]   ;;  %v2419_v61 = vld [vmem:[%s2506_s24 + $0x200] sm:$0xff]  }
  0x22   : > { %2055 = vmatmul.mubr.msk.bf16.gmra.mrb[8].mxu0 %vm727_vm3, %v2370_v12  ;;  %2207 = vmatmul.mubr.msk.bf16.gmra.mrb[8].mxu1 %vm727_vm3, %v2371_v13  ;;  %v2420_v3 = vld [vmem:[%s2506_s24 + $0xd8] sm:$0xff]   ;;  %v2421_v8 = vld [vmem:[%s2506_s24 + $0x208] sm:$0xff]  }
  0x23   : > { %2058 = vmatprep.mubr.msk.bf16.mxu0 %vm2452_vm2, %v2450_v1  ;;  %2210 = vmatprep.mubr.msk.bf16.mxu1 %vm2452_vm2, %v2450_v1 }
  0x2a   : > { %2059 = vmatmul.mubr.msk.bf16.gmra.mrb[12].mxu0 %vm727_vm3, %v2372_v14  ;;  %2211 = vmatmul.mubr.msk.bf16.gmra.mrb[12].mxu1 %vm727_vm3, %v2373_v15 }
  0x2b   : > { %2062 = vmatprep.mubr.msk.bf16.mxu0 %vm2452_vm2, %v2450_v1  ;;  %2214 = vmatprep.mubr.msk.bf16.mxu1 %vm2452_vm2, %v2450_v1 }
  0x32   : > { %2063 = vmatmul.mubr.msk.bf16.gmra.mrb[16].mxu0 %vm727_vm3, %v2374_v16  ;;  %2215 = vmatmul.mubr.msk.bf16.gmra.mrb[16].mxu1 %vm727_vm3, %v2375_v17  ;;  %v2422_v17 = vld [vmem:[%s2506_s24 + $0xe0] sm:$0xff]  }
  0x33   : > { %2066 = vmatprep.mubr.msk.bf16.mxu0 %vm2452_vm2, %v2450_v1  ;;  %2218 = vmatprep.mubr.msk.bf16.mxu1 %vm2452_vm2, %v2450_v1 }
  0x3a   : > { %2067 = vmatmul.mubr.msk.bf16.gmra.mrb[20].mxu0 %vm727_vm3, %v2376_v18  ;;  %2219 = vmatmul.mubr.msk.bf16.gmra.mrb[20].mxu1 %vm727_vm3, %v2377_v19 }
  0x3b   : > { %2070 = vmatprep.mubr.msk.bf16.mxu0 %vm2452_vm2, %v2450_v1  ;;  %2222 = vmatprep.mubr.msk.bf16.mxu1 %vm2452_vm2, %v2450_v1 }
  0x42   : > { %2071 = vmatmul.mubr.msk.bf16.gmra.mrb[24].mxu0 %vm727_vm3, %v2378_v20  ;;  %2223 = vmatmul.mubr.msk.bf16.gmra.mrb[24].mxu1 %vm727_vm3, %v2379_v21 }
  0x43   : > { %2074 = vmatprep.mubr.msk.bf16.mxu0 %vm2452_vm2, %v2450_v1  ;;  %2226 = vmatprep.mubr.msk.bf16.mxu1 %vm2452_vm2, %v2450_v1 }
  0x4a   : > { %2075 = vmatmul.mubr.msk.bf16.gmra.mrb[28].mxu0 %vm727_vm3, %v2380_v22  ;;  %2227 = vmatmul.mubr.msk.bf16.gmra.mrb[28].mxu1 %vm727_vm3, %v2381_v23  ;;  %v2423_v22 = vld [vmem:[%s2506_s24 + $0x210] sm:$0xff]  }
  0x4b   : > { %2078 = vmatprep.mubr.msk.bf16.mxu0 %vm2452_vm2, %v2450_v1  ;;  %2230 = vmatprep.mubr.msk.bf16.mxu1 %vm2452_vm2, %v2450_v1 }
  0x52   : > { %2079 = vmatmul.mubr.msk.bf16.gmra.mrb[32].mxu0 %vm727_vm3, %v2382_v24  ;;  %2231 = vmatmul.mubr.msk.bf16.gmra.mrb[32].mxu1 %vm727_vm3, %v2383_v25 }
  0x53   : > { %2082 = vmatprep.mubr.msk.bf16.mxu0 %vm2452_vm2, %v2450_v1  ;;  %2234 = vmatprep.mubr.msk.bf16.mxu1 %vm2452_vm2, %v2450_v1 }
  0x5a   : > { %2083 = vmatmul.mubr.msk.bf16.gmra.mrb[36].mxu0 %vm727_vm3, %v2384_v26  ;;  %2235 = vmatmul.mubr.msk.bf16.gmra.mrb[36].mxu1 %vm727_vm3, %v2385_v27 }
  0x5b   : > { %2086 = vmatprep.mubr.msk.bf16.mxu0 %vm2452_vm2, %v2450_v1  ;;  %2238 = vmatprep.mubr.msk.bf16.mxu1 %vm2452_vm2, %v2450_v1 }
  0x62   : > { %2087 = vmatmul.mubr.msk.bf16.gmra.mrb[40].mxu0 %vm727_vm3, %v2386_v28  ;;  %2239 = vmatmul.mubr.msk.bf16.gmra.mrb[40].mxu1 %vm727_vm3, %v2387_v29 }
  0x63   : > { %2090 = vmatprep.mubr.msk.bf16.mxu0 %vm2452_vm2, %v2450_v1  ;;  %2242 = vmatprep.mubr.msk.bf16.mxu1 %vm2452_vm2, %v2450_v1 }
  0x6a   : > { %2091 = vmatmul.mubr.msk.bf16.gmra.mrb[44].mxu0 %vm727_vm3, %v2388_v30  ;;  %2243 = vmatmul.mubr.msk.bf16.gmra.mrb[44].mxu1 %vm727_vm3, %v2389_v31  ;;  %v2424_v31 = vld [vmem:[%s2506_s24 + $0xe8] sm:$0xff]  }
  0x6b   : > { %2094 = vmatprep.mubr.msk.bf16.mxu0 %vm2452_vm2, %v2450_v1  ;;  %2246 = vmatprep.mubr.msk.bf16.mxu1 %vm2452_vm2, %v2450_v1 }
  0x72   : > { %2095 = vmatmul.mubr.msk.bf16.gmra.mrb[48].mxu0 %vm727_vm3, %v2390_v32  ;;  %2247 = vmatmul.mubr.msk.bf16.gmra.mrb[48].mxu1 %vm727_vm3, %v2391_v33 }
  0x73   : > { %2098 = vmatprep.mubr.msk.bf16.mxu0 %vm2452_vm2, %v2450_v1  ;;  %2250 = vmatprep.mubr.msk.bf16.mxu1 %vm2452_vm2, %v2450_v1 }
  0x7a   : > { %2099 = vmatmul.mubr.msk.bf16.gmra.mrb[52].mxu0 %vm727_vm3, %v2392_v34  ;;  %2251 = vmatmul.mubr.msk.bf16.gmra.mrb[52].mxu1 %vm727_vm3, %v2393_v35 }
  0x7b   : > { %2102 = vmatprep.mubr.msk.bf16.mxu0 %vm2452_vm2, %v2450_v1  ;;  %2254 = vmatprep.mubr.msk.bf16.mxu1 %vm2452_vm2, %v2450_v1 }
  0x82   : > { %2103 = vmatmul.mubr.msk.bf16.gmra.mrb[56].mxu0 %vm727_vm3, %v2394_v36  ;;  %2255 = vmatmul.mubr.msk.bf16.gmra.mrb[56].mxu1 %vm727_vm3, %v2395_v37  ;;  %v2425_v36 = vld [vmem:[%s2506_s24 + $0x218] sm:$0xff]  }
  0x83   : > { %2106 = vmatprep.mubr.msk.bf16.mxu0 %vm2452_vm2, %v2450_v1  ;;  %2258 = vmatprep.mubr.msk.bf16.mxu1 %vm2452_vm2, %v2450_v1 }
  0x8a   : > { %2107 = vmatmul.mubr.msk.bf16.gmra.mrb[60].mxu0 %vm727_vm3, %v2396_v38  ;;  %2259 = vmatmul.mubr.msk.bf16.gmra.mrb[60].mxu1 %vm727_vm3, %v2397_v39 }
  0x8b   : > { %2110 = vmatprep.mubr.msk.bf16.mxu0 %vm2452_vm2, %v2450_v1  ;;  %2262 = vmatprep.mubr.msk.bf16.mxu1 %vm2452_vm2, %v2450_v1 }
  0x92   : > { %2111 = vmatmul.mubr.msk.bf16.gmra.mrb[64].mxu0 %vm727_vm3, %v2398_v40  ;;  %2263 = vmatmul.mubr.msk.bf16.gmra.mrb[64].mxu1 %vm727_vm3, %v2399_v41 }
  0x93   : > { %2114 = vmatprep.mubr.msk.bf16.mxu0 %vm2452_vm2, %v2450_v1  ;;  %2266 = vmatprep.mubr.msk.bf16.mxu1 %vm2452_vm2, %v2450_v1 }
  0x9a   : > { %2115 = vmatmul.mubr.msk.bf16.gmra.mrb[68].mxu0 %vm727_vm3, %v2400_v42  ;;  %2267 = vmatmul.mubr.msk.bf16.gmra.mrb[68].mxu1 %vm727_vm3, %v2401_v43 }
  0x9b   : > { %2118 = vmatprep.mubr.msk.bf16.mxu0 %vm2452_vm2, %v2450_v1  ;;  %2270 = vmatprep.mubr.msk.bf16.mxu1 %vm2452_vm2, %v2450_v1 }
  0xa2   : > { %2119 = vmatmul.mubr.msk.bf16.gmra.mrb[72].mxu0 %vm727_vm3, %v2402_v44  ;;  %2271 = vmatmul.mubr.msk.bf16.gmra.mrb[72].mxu1 %vm727_vm3, %v2403_v45  ;;  %v2426_v45 = vld [vmem:[%s2506_s24 + $0xf0] sm:$0xff]  }
  0xa3   : > { %2122 = vmatprep.mubr.msk.bf16.mxu0 %vm2452_vm2, %v2450_v1  ;;  %2274 = vmatprep.mubr.msk.bf16.mxu1 %vm2452_vm2, %v2450_v1 }
  0xaa   : > { %2123 = vmatmul.mubr.msk.bf16.gmra.mrb[76].mxu0 %vm727_vm3, %v2404_v46  ;;  %2275 = vmatmul.mubr.msk.bf16.gmra.mrb[76].mxu1 %vm727_vm3, %v2405_v47 }
  0xab   : > { %2126 = vmatprep.mubr.msk.bf16.mxu0 %vm2452_vm2, %v2450_v1  ;;  %2278 = vmatprep.mubr.msk.bf16.mxu1 %vm2452_vm2, %v2450_v1 }
  0xb2   : > { %2127 = vmatmul.mubr.msk.bf16.gmra.mrb[80].mxu0 %vm727_vm3, %v2406_v48  ;;  %2279 = vmatmul.mubr.msk.bf16.gmra.mrb[80].mxu1 %vm727_vm3, %v2407_v49 }
  0xb3   : > { %2130 = vmatprep.mubr.msk.bf16.mxu0 %vm2452_vm2, %v2450_v1  ;;  %2282 = vmatprep.mubr.msk.bf16.mxu1 %vm2452_vm2, %v2450_v1 }
  0xba   : > { %2131 = vmatmul.mubr.msk.bf16.gmra.mrb[84].mxu0 %vm727_vm3, %v2408_v50  ;;  %2283 = vmatmul.mubr.msk.bf16.gmra.mrb[84].mxu1 %vm727_vm3, %v2409_v51  ;;  %v2427_v50 = vld [vmem:[%s2506_s24 + $0x220] sm:$0xff]  }
  0xbb   : > { %2134 = vmatprep.mubr.msk.bf16.mxu0 %vm2452_vm2, %v2450_v1  ;;  %2286 = vmatprep.mubr.msk.bf16.mxu1 %vm2452_vm2, %v2450_v1 }
  0xc2   : > { %2135 = vmatmul.mubr.msk.bf16.gmra.mrb[88].mxu0 %vm727_vm3, %v2410_v52  ;;  %2287 = vmatmul.mubr.msk.bf16.gmra.mrb[88].mxu1 %vm727_vm3, %v2411_v53 }
  0xc3   : > { %2138 = vmatprep.mubr.msk.bf16.mxu0 %vm2452_vm2, %v2450_v1  ;;  %2290 = vmatprep.mubr.msk.bf16.mxu1 %vm2452_vm2, %v2450_v1 }
  0xca   : > { %2139 = vmatmul.mubr.msk.bf16.gmra.mrb[92].mxu0 %vm727_vm3, %v2412_v54  ;;  %2291 = vmatmul.mubr.msk.bf16.gmra.mrb[92].mxu1 %vm727_vm3, %v2413_v55 }
  0xcb   : > { %2142 = vmatprep.mubr.msk.bf16.mxu0 %vm2452_vm2, %v2450_v1  ;;  %2294 = vmatprep.mubr.msk.bf16.mxu1 %vm2452_vm2, %v2450_v1 }
  0xd2   : > { %2143 = vmatmul.mubr.msk.bf16.gmra.mrb[96].mxu0 %vm727_vm3, %v2414_v56  ;;  %2295 = vmatmul.mubr.msk.bf16.gmra.mrb[96].mxu1 %vm727_vm3, %v2415_v57 }
  0xd3   : > { %2146 = vmatprep.mubr.msk.bf16.mxu0 %vm2452_vm2, %v2450_v1  ;;  %2298 = vmatprep.mubr.msk.bf16.mxu1 %vm2452_vm2, %v2450_v1 }
  0xda   : > { %2147 = vmatmul.mubr.msk.bf16.gmra.mrb[100].mxu0 %vm727_vm3, %v2416_v58  ;;  %2299 = vmatmul.mubr.msk.bf16.gmra.mrb[100].mxu1 %vm727_vm3, %v2417_v59  ;;  %v2428_v59 = vld [vmem:[%s2506_s24 + $0xf8] sm:$0xff]  }
  0xdb   : > { %2150 = vmatprep.mubr.msk.bf16.mxu0 %vm2452_vm2, %v2450_v1  ;;  %2302 = vmatprep.mubr.msk.bf16.mxu1 %vm2452_vm2, %v2450_v1 }
  0xe2   : > { %2151 = vmatmul.mubr.msk.bf16.gmra.mrb[104].mxu0 %vm727_vm3, %v2418_v60  ;;  %2303 = vmatmul.mubr.msk.bf16.gmra.mrb[104].mxu1 %vm727_vm3, %v2419_v61 }
  0xe3   : > { %2154 = vmatprep.mubr.msk.bf16.mxu0 %vm2452_vm2, %v2450_v1  ;;  %2306 = vmatprep.mubr.msk.bf16.mxu1 %vm2452_vm2, %v2450_v1 }
  0xe5   : > { %v994_v63 = vpop.f32.mrb[0].mxu0  ;;  %v1298_v4 = vpop.f32.mrb[0].mxu1 }
  0xe6   : > { %v995_v0 = vadd.f32 %v2723_v62, %v994_v63  ;;  %v2048_v2 = vpop.f32.mrb[1].mxu0  ;;  %v1299_v6 = vadd.f32 %v2723_v62, %v1298_v4  ;;  %v2200_v7 = vpop.f32.mrb[1].mxu1 }
  0xe7   : > { %v997_v5 = vpop.f32.mrb[2].mxu0  ;;  %v1301_v11 = vpop.f32.mrb[2].mxu1  ;;  %v2429_v2 = vld [vmem:[%s2506_s24 + $0x228] sm:$0xff]  }
  0xe8   : > { %1593 = vst [vmem:[%s2733_s30] sm:$0xff] %v995_v0  ;;  %v998_v9 = vadd.f32 %v2723_v62, %v997_v5  ;;  %v2049_v10 = vpop.f32.mrb[3].mxu0  ;;  %1669 = vst [vmem:[%s2733_s30 + $0x260] sm:$0xff] %v1299_v6  ;;  %v1302_v12 = vadd.f32 %v2723_v62, %v1301_v11  ;;  %v2201_v13 = vpop.f32.mrb[3].mxu1  ;;  %v2430_v11 = vld [vmem:[%s2506_s24 + $0x100] sm:$0xff]  }
  0xea   : > { %1594 = vst [vmem:[%s2733_s30 + $0x8] sm:$0xff] %v998_v9  ;;  %2155 = vmatmul.mubr.msk.bf16.gmra.mrb[108].mxu0 %vm727_vm3, %v2420_v3  ;;  %1670 = vst [vmem:[%s2733_s30 + $0x268] sm:$0xff] %v1302_v12  ;;  %2307 = vmatmul.mubr.msk.bf16.gmra.mrb[108].mxu1 %vm727_vm3, %v2421_v8 }
  0xeb   : > { %2158 = vmatprep.mubr.msk.bf16.mxu0 %vm2452_vm2, %v2450_v1  ;;  %2310 = vmatprep.mubr.msk.bf16.mxu1 %vm2452_vm2, %v2450_v1 }
  0xed   : > { %v1002_v14 = vpop.f32.mrb[4].mxu0  ;;  %v1306_v18 = vpop.f32.mrb[4].mxu1 }
  0xee   : > { %v1003_v15 = vadd.f32 %v2723_v62, %v1002_v14  ;;  %v2052_v16 = vpop.f32.mrb[5].mxu0  ;;  %v1307_v20 = vadd.f32 %v2723_v62, %v1306_v18  ;;  %v2204_v21 = vpop.f32.mrb[5].mxu1 }
  0xef   : > { %v1005_v19 = vpop.f32.mrb[6].mxu0  ;;  %v1309_v25 = vpop.f32.mrb[6].mxu1  ;;  %v2431_v16 = vld [vmem:[%s2506_s24 + $0x230] sm:$0xff]  }
  0xf0   : > { %1595 = vst [vmem:[%s2733_s30 + $0x10] sm:$0xff] %v1003_v15  ;;  %v1006_v23 = vadd.f32 %v2723_v62, %v1005_v19  ;;  %v2053_v24 = vpop.f32.mrb[7].mxu0  ;;  %1671 = vst [vmem:[%s2733_s30 + $0x270] sm:$0xff] %v1307_v20  ;;  %v1310_v26 = vadd.f32 %v2723_v62, %v1309_v25  ;;  %v2205_v27 = vpop.f32.mrb[7].mxu1  ;;  %v2432_v25 = vld [vmem:[%s2506_s24 + $0x108] sm:$0xff]  }
  0xf2   : > { %1596 = vst [vmem:[%s2733_s30 + $0x18] sm:$0xff] %v1006_v23  ;;  %2159 = vmatmul.mubr.msk.bf16.gmra.mrb[112].mxu0 %vm727_vm3, %v2422_v17  ;;  %1672 = vst [vmem:[%s2733_s30 + $0x278] sm:$0xff] %v1310_v26  ;;  %2311 = vmatmul.mubr.msk.bf16.gmra.mrb[112].mxu1 %vm727_vm3, %v2423_v22 }
  0xf3   : > { %2162 = vmatprep.mubr.msk.bf16.mxu0 %vm2452_vm2, %v2450_v1  ;;  %2314 = vmatprep.mubr.msk.bf16.mxu1 %vm2452_vm2, %v2450_v1 }
  0xf5   : > { %v1010_v28 = vpop.f32.mrb[8].mxu0  ;;  %v1314_v32 = vpop.f32.mrb[8].mxu1 }
  0xf6   : > { %v1011_v29 = vadd.f32 %v2723_v62, %v1010_v28  ;;  %v2056_v30 = vpop.f32.mrb[9].mxu0  ;;  %v1315_v34 = vadd.f32 %v2723_v62, %v1314_v32  ;;  %v2208_v35 = vpop.f32.mrb[9].mxu1 }
  0xf7   : > { %v1013_v33 = vpop.f32.mrb[10].mxu0  ;;  %v1317_v39 = vpop.f32.mrb[10].mxu1  ;;  %v2433_v30 = vld [vmem:[%s2506_s24 + $0x238] sm:$0xff]  }
  0xf8   : > { %1597 = vst [vmem:[%s2733_s30 + $0x20] sm:$0xff] %v1011_v29  ;;  %v1014_v37 = vadd.f32 %v2723_v62, %v1013_v33  ;;  %v2057_v38 = vpop.f32.mrb[11].mxu0  ;;  %1673 = vst [vmem:[%s2733_s30 + $0x280] sm:$0xff] %v1315_v34  ;;  %v1318_v40 = vadd.f32 %v2723_v62, %v1317_v39  ;;  %v2209_v41 = vpop.f32.mrb[11].mxu1  ;;  %v2434_v39 = vld [vmem:[%s2506_s24 + $0x110] sm:$0xff]  }
  0xfa   : > { %1598 = vst [vmem:[%s2733_s30 + $0x28] sm:$0xff] %v1014_v37  ;;  %2163 = vmatmul.mubr.msk.bf16.gmra.mrb[116].mxu0 %vm727_vm3, %v2424_v31  ;;  %1674 = vst [vmem:[%s2733_s30 + $0x288] sm:$0xff] %v1318_v40  ;;  %2315 = vmatmul.mubr.msk.bf16.gmra.mrb[116].mxu1 %vm727_vm3, %v2425_v36 }
  0xfb   : > { %2166 = vmatprep.mubr.msk.bf16.mxu0 %vm2452_vm2, %v2450_v1  ;;  %2318 = vmatprep.mubr.msk.bf16.mxu1 %vm2452_vm2, %v2450_v1 }
  0xfd   : > { %v1018_v42 = vpop.f32.mrb[12].mxu0  ;;  %v1322_v46 = vpop.f32.mrb[12].mxu1 }
  0xfe   : > { %v1019_v43 = vadd.f32 %v2723_v62, %v1018_v42  ;;  %v2060_v44 = vpop.f32.mrb[13].mxu0  ;;  %v1323_v48 = vadd.f32 %v2723_v62, %v1322_v46  ;;  %v2212_v49 = vpop.f32.mrb[13].mxu1 }
  0xff   : > { %v1021_v47 = vpop.f32.mrb[14].mxu0  ;;  %v1325_v53 = vpop.f32.mrb[14].mxu1  ;;  %v2435_v44 = vld [vmem:[%s2506_s24 + $0x240] sm:$0xff]  }
 0x100   : > { %1599 = vst [vmem:[%s2733_s30 + $0x30] sm:$0xff] %v1019_v43  ;;  %v1022_v51 = vadd.f32 %v2723_v62, %v1021_v47  ;;  %v2061_v52 = vpop.f32.mrb[15].mxu0  ;;  %1675 = vst [vmem:[%s2733_s30 + $0x290] sm:$0xff] %v1323_v48  ;;  %v1326_v54 = vadd.f32 %v2723_v62, %v1325_v53  ;;  %v2213_v55 = vpop.f32.mrb[15].mxu1  ;;  %v2436_v53 = vld [vmem:[%s2506_s24 + $0x118] sm:$0xff]  }
 0x102   : > { %1600 = vst [vmem:[%s2733_s30 + $0x38] sm:$0xff] %v1022_v51  ;;  %2167 = vmatmul.mubr.msk.bf16.gmra.mrb[120].mxu0 %vm727_vm3, %v2426_v45  ;;  %1676 = vst [vmem:[%s2733_s30 + $0x298] sm:$0xff] %v1326_v54  ;;  %2319 = vmatmul.mubr.msk.bf16.gmra.mrb[120].mxu1 %vm727_vm3, %v2427_v50 }
 0x103   : > { %2170 = vmatprep.mubr.msk.bf16.mxu0 %vm2452_vm2, %v2450_v1  ;;  %2322 = vmatprep.mubr.msk.bf16.mxu1 %vm2452_vm2, %v2450_v1 }
 0x105   : > { %v1026_v56 = vpop.f32.mrb[16].mxu0  ;;  %v1330_v60 = vpop.f32.mrb[16].mxu1 }
 0x106   : > { %v1027_v57 = vadd.f32 %v2723_v62, %v1026_v56  ;;  %v2064_v58 = vpop.f32.mrb[17].mxu0  ;;  %v1331_v63 = vadd.f32 %v2723_v62, %v1330_v60  ;;  %v2216_v0 = vpop.f32.mrb[17].mxu1 }
 0x107   : > { %v1029_v61 = vpop.f32.mrb[18].mxu0  ;;  %v1333_v5 = vpop.f32.mrb[18].mxu1  ;;  %v2437_v58 = vld [vmem:[%s2506_s24 + $0x248] sm:$0xff]  }
 0x108   : > { %1601 = vst [vmem:[%s2733_s30 + $0x40] sm:$0xff] %v1027_v57  ;;  %v1030_v3 = vadd.f32 %v2723_v62, %v1029_v61  ;;  %v2065_v4 = vpop.f32.mrb[19].mxu0  ;;  %1677 = vst [vmem:[%s2733_s30 + $0x2a0] sm:$0xff] %v1331_v63  ;;  %v1334_v6 = vadd.f32 %v2723_v62, %v1333_v5  ;;  %v2217_v7 = vpop.f32.mrb[19].mxu1  ;;  %v2438_v5 = vld [vmem:[%s2506_s24 + $0x120] sm:$0xff]  }
 0x10a   : > { %1602 = vst [vmem:[%s2733_s30 + $0x48] sm:$0xff] %v1030_v3  ;;  %2171 = vmatmul.mubr.msk.bf16.gmra.mrb[124].mxu0 %vm727_vm3, %v2428_v59  ;;  %1678 = vst [vmem:[%s2733_s30 + $0x2a8] sm:$0xff] %v1334_v6  ;;  %2323 = vmatmul.mubr.msk.bf16.gmra.mrb[124].mxu1 %vm727_vm3, %v2429_v2 }
 0x10b   : > { %2174 = vmatprep.mubr.msk.bf16.mxu0 %vm2452_vm2, %v2450_v1  ;;  %2326 = vmatprep.mubr.msk.bf16.mxu1 %vm2452_vm2, %v2450_v1 }
 0x10d   : > { %v1034_v8 = vpop.f32.mrb[20].mxu0  ;;  %v1338_v12 = vpop.f32.mrb[20].mxu1 }
 0x10e   : > { %v1035_v9 = vadd.f32 %v2723_v62, %v1034_v8  ;;  %v2068_v10 = vpop.f32.mrb[21].mxu0  ;;  %v1339_v14 = vadd.f32 %v2723_v62, %v1338_v12  ;;  %v2220_v15 = vpop.f32.mrb[21].mxu1 }
 0x10f   : > { %v1037_v13 = vpop.f32.mrb[22].mxu0  ;;  %v1341_v19 = vpop.f32.mrb[22].mxu1  ;;  %v2439_v10 = vld [vmem:[%s2506_s24 + $0x250] sm:$0xff]  }
 0x110   : > { %1603 = vst [vmem:[%s2733_s30 + $0x50] sm:$0xff] %v1035_v9  ;;  %v1038_v17 = vadd.f32 %v2723_v62, %v1037_v13  ;;  %v2069_v18 = vpop.f32.mrb[23].mxu0  ;;  %1679 = vst [vmem:[%s2733_s30 + $0x2b0] sm:$0xff] %v1339_v14  ;;  %v1342_v20 = vadd.f32 %v2723_v62, %v1341_v19  ;;  %v2221_v21 = vpop.f32.mrb[23].mxu1  ;;  %v2440_v19 = vld [vmem:[%s2506_s24 + $0x128] sm:$0xff]  }
 0x112   : > { %1604 = vst [vmem:[%s2733_s30 + $0x58] sm:$0xff] %v1038_v17  ;;  %2175 = vmatmul.mubr.msk.bf16.gmra.mrb[128].mxu0 %vm727_vm3, %v2430_v11  ;;  %1680 = vst [vmem:[%s2733_s30 + $0x2b8] sm:$0xff] %v1342_v20  ;;  %2327 = vmatmul.mubr.msk.bf16.gmra.mrb[128].mxu1 %vm727_vm3, %v2431_v16 }
 0x113   : > { %2178 = vmatprep.mubr.msk.bf16.mxu0 %vm2452_vm2, %v2450_v1  ;;  %2330 = vmatprep.mubr.msk.bf16.mxu1 %vm2452_vm2, %v2450_v1 }
 0x115   : > { %v1042_v22 = vpop.f32.mrb[24].mxu0  ;;  %v1346_v26 = vpop.f32.mrb[24].mxu1 }
 0x116   : > { %v1043_v23 = vadd.f32 %v2723_v62, %v1042_v22  ;;  %v2072_v24 = vpop.f32.mrb[25].mxu0  ;;  %v1347_v28 = vadd.f32 %v2723_v62, %v1346_v26  ;;  %v2224_v29 = vpop.f32.mrb[25].mxu1 }
 0x117   : > { %v1045_v27 = vpop.f32.mrb[26].mxu0  ;;  %v1349_v33 = vpop.f32.mrb[26].mxu1 }
 0x118   : > { %1605 = vst [vmem:[%s2733_s30 + $0x60] sm:$0xff] %v1043_v23  ;;  %v1046_v31 = vadd.f32 %v2723_v62, %v1045_v27  ;;  %v2073_v32 = vpop.f32.mrb[27].mxu0  ;;  %1681 = vst [vmem:[%s2733_s30 + $0x2c0] sm:$0xff] %v1347_v28  ;;  %v1350_v34 = vadd.f32 %v2723_v62, %v1349_v33  ;;  %v2225_v35 = vpop.f32.mrb[27].mxu1 }
 0x11a   : > { %1606 = vst [vmem:[%s2733_s30 + $0x68] sm:$0xff] %v1046_v31  ;;  %2179 = vmatmul.mubr.msk.bf16.gmra.mrb[132].mxu0 %vm727_vm3, %v2432_v25  ;;  %1682 = vst [vmem:[%s2733_s30 + $0x2c8] sm:$0xff] %v1350_v34  ;;  %2331 = vmatmul.mubr.msk.bf16.gmra.mrb[132].mxu1 %vm727_vm3, %v2433_v30 }
 0x11b   : > { %2182 = vmatprep.mubr.msk.bf16.mxu0 %vm2452_vm2, %v2450_v1  ;;  %2334 = vmatprep.mubr.msk.bf16.mxu1 %vm2452_vm2, %v2450_v1 }
 0x11d   : > { %v1050_v36 = vpop.f32.mrb[28].mxu0  ;;  %v1354_v40 = vpop.f32.mrb[28].mxu1 }
 0x11e   : > { %v1051_v37 = vadd.f32 %v2723_v62, %v1050_v36  ;;  %v2076_v38 = vpop.f32.mrb[29].mxu0  ;;  %v1355_v42 = vadd.f32 %v2723_v62, %v1354_v40  ;;  %v2228_v43 = vpop.f32.mrb[29].mxu1 }
 0x11f   : > { %v1053_v41 = vpop.f32.mrb[30].mxu0  ;;  %v1357_v47 = vpop.f32.mrb[30].mxu1 }
 0x120   : > { %1607 = vst [vmem:[%s2733_s30 + $0x70] sm:$0xff] %v1051_v37  ;;  %v1054_v45 = vadd.f32 %v2723_v62, %v1053_v41  ;;  %v2077_v46 = vpop.f32.mrb[31].mxu0  ;;  %1683 = vst [vmem:[%s2733_s30 + $0x2d0] sm:$0xff] %v1355_v42  ;;  %v1358_v48 = vadd.f32 %v2723_v62, %v1357_v47  ;;  %v2229_v49 = vpop.f32.mrb[31].mxu1 }
 0x122   : > { %1608 = vst [vmem:[%s2733_s30 + $0x78] sm:$0xff] %v1054_v45  ;;  %2183 = vmatmul.mubr.msk.bf16.gmra.mrb[136].mxu0 %vm727_vm3, %v2434_v39  ;;  %1684 = vst [vmem:[%s2733_s30 + $0x2d8] sm:$0xff] %v1358_v48  ;;  %2335 = vmatmul.mubr.msk.bf16.gmra.mrb[136].mxu1 %vm727_vm3, %v2435_v44 }
 0x123   : > { %2186 = vmatprep.mubr.msk.bf16.mxu0 %vm2452_vm2, %v2450_v1  ;;  %2338 = vmatprep.mubr.msk.bf16.mxu1 %vm2452_vm2, %v2450_v1 }
 0x125   : > { %v1058_v50 = vpop.f32.mrb[32].mxu0  ;;  %v1362_v54 = vpop.f32.mrb[32].mxu1 }
 0x126   : > { %v1059_v51 = vadd.f32 %v2723_v62, %v1058_v50  ;;  %v2080_v52 = vpop.f32.mrb[33].mxu0  ;;  %v1363_v56 = vadd.f32 %v2723_v62, %v1362_v54  ;;  %v2232_v57 = vpop.f32.mrb[33].mxu1 }
 0x127   : > { %v1061_v55 = vpop.f32.mrb[34].mxu0  ;;  %v1365_v61 = vpop.f32.mrb[34].mxu1 }
 0x128   : > { %1609 = vst [vmem:[%s2733_s30 + $0x80] sm:$0xff] %v1059_v51  ;;  %v1062_v59 = vadd.f32 %v2723_v62, %v1061_v55  ;;  %v2081_v60 = vpop.f32.mrb[35].mxu0  ;;  %1685 = vst [vmem:[%s2733_s30 + $0x2e0] sm:$0xff] %v1363_v56  ;;  %v1366_v63 = vadd.f32 %v2723_v62, %v1365_v61  ;;  %v2233_v0 = vpop.f32.mrb[35].mxu1 }
 0x12a   : > { %1610 = vst [vmem:[%s2733_s30 + $0x88] sm:$0xff] %v1062_v59  ;;  %2187 = vmatmul.mubr.msk.bf16.gmra.mrb[140].mxu0 %vm727_vm3, %v2436_v53  ;;  %1686 = vst [vmem:[%s2733_s30 + $0x2e8] sm:$0xff] %v1366_v63  ;;  %2339 = vmatmul.mubr.msk.bf16.gmra.mrb[140].mxu1 %vm727_vm3, %v2437_v58 }
 0x12b   : > { %2190 = vmatprep.mubr.msk.bf16.mxu0 %vm2452_vm2, %v2450_v1  ;;  %2342 = vmatprep.mubr.msk.bf16.mxu1 %vm2452_vm2, %v2450_v1 }
 0x12d   : > { %v1066_v2 = vpop.f32.mrb[36].mxu0  ;;  %v1370_v6 = vpop.f32.mrb[36].mxu1 }
 0x12e   : > { %v1067_v3 = vadd.f32 %v2723_v62, %v1066_v2  ;;  %v2084_v4 = vpop.f32.mrb[37].mxu0  ;;  %v1371_v8 = vadd.f32 %v2723_v62, %v1370_v6  ;;  %v2236_v9 = vpop.f32.mrb[37].mxu1 }
 0x12f   : > { %v1069_v7 = vpop.f32.mrb[38].mxu0  ;;  %v1373_v13 = vpop.f32.mrb[38].mxu1 }
 0x130   : > { %1611 = vst [vmem:[%s2733_s30 + $0x90] sm:$0xff] %v1067_v3  ;;  %v1070_v11 = vadd.f32 %v2723_v62, %v1069_v7  ;;  %v2085_v12 = vpop.f32.mrb[39].mxu0  ;;  %1687 = vst [vmem:[%s2733_s30 + $0x2f0] sm:$0xff] %v1371_v8  ;;  %v1374_v14 = vadd.f32 %v2723_v62, %v1373_v13  ;;  %v2237_v15 = vpop.f32.mrb[39].mxu1 }
 0x132   : > { %1612 = vst [vmem:[%s2733_s30 + $0x98] sm:$0xff] %v1070_v11  ;;  %2191 = vmatmul.mubr.msk.bf16.gmra.mrb[144].mxu0 %vm727_vm3, %v2438_v5  ;;  %1688 = vst [vmem:[%s2733_s30 + $0x2f8] sm:$0xff] %v1374_v14  ;;  %2343 = vmatmul.mubr.msk.bf16.gmra.mrb[144].mxu1 %vm727_vm3, %v2439_v10 }
 0x133   : > { %2194 = vmatprep.mubr.msk.bf16.mxu0 %vm2452_vm2, %v2450_v1 }
 0x135   : > { %v1074_v16 = vpop.f32.mrb[40].mxu0  ;;  %v1378_v20 = vpop.f32.mrb[40].mxu1 }
 0x136   : > { %v1075_v17 = vadd.f32 %v2723_v62, %v1074_v16  ;;  %v2088_v18 = vpop.f32.mrb[41].mxu0  ;;  %v1379_v22 = vadd.f32 %v2723_v62, %v1378_v20  ;;  %v2240_v23 = vpop.f32.mrb[41].mxu1 }
 0x137   : > { %v1077_v21 = vpop.f32.mrb[42].mxu0  ;;  %v1381_v26 = vpop.f32.mrb[42].mxu1 }
 0x138   : > { %1613 = vst [vmem:[%s2733_s30 + $0xa0] sm:$0xff] %v1075_v17  ;;  %v1078_v24 = vadd.f32 %v2723_v62, %v1077_v21  ;;  %v2089_v25 = vpop.f32.mrb[43].mxu0  ;;  %1689 = vst [vmem:[%s2733_s30 + $0x300] sm:$0xff] %v1379_v22  ;;  %v1382_v1 = vadd.f32 %v2723_v62, %v1381_v26  ;;  %v2241_v27 = vpop.f32.mrb[43].mxu1 }
 0x13a   : > { %1614 = vst [vmem:[%s2733_s30 + $0xa8] sm:$0xff] %v1078_v24  ;;  %2195 = vmatmul.mubr.msk.bf16.gmra.mrb[148].mxu0 %vm727_vm3, %v2440_v19  ;;  %1690 = vst [vmem:[%s2733_s30 + $0x308] sm:$0xff] %v1382_v1 }
 0x13d   : > { %v1082_v28 = vpop.f32.mrb[44].mxu0  ;;  %v1386_v31 = vpop.f32.mrb[44].mxu1 }
 0x13e   : > { %v1083_v29 = vadd.f32 %v2723_v62, %v1082_v28  ;;  %v2092_v30 = vpop.f32.mrb[45].mxu0  ;;  %v1387_v33 = vadd.f32 %v2723_v62, %v1386_v31  ;;  %v2244_v34 = vpop.f32.mrb[45].mxu1 }
 0x13f   : > { %v1085_v32 = vpop.f32.mrb[46].mxu0  ;;  %v1389_v37 = vpop.f32.mrb[46].mxu1 }
 0x140   : > { %1615 = vst [vmem:[%s2733_s30 + $0xb0] sm:$0xff] %v1083_v29  ;;  %v1086_v35 = vadd.f32 %v2723_v62, %v1085_v32  ;;  %v2093_v36 = vpop.f32.mrb[47].mxu0  ;;  %1691 = vst [vmem:[%s2733_s30 + $0x310] sm:$0xff] %v1387_v33  ;;  %v1390_v38 = vadd.f32 %v2723_v62, %v1389_v37  ;;  %v2245_v39 = vpop.f32.mrb[47].mxu1 }
 0x142   : > { %1616 = vst [vmem:[%s2733_s30 + $0xb8] sm:$0xff] %v1086_v35  ;;  %1692 = vst [vmem:[%s2733_s30 + $0x318] sm:$0xff] %v1390_v38 }
 0x145   : > { %v1090_v40 = vpop.f32.mrb[48].mxu0  ;;  %v1394_v43 = vpop.f32.mrb[48].mxu1 }
 0x146   : > { %v1091_v41 = vadd.f32 %v2723_v62, %v1090_v40  ;;  %v2096_v42 = vpop.f32.mrb[49].mxu0  ;;  %v1395_v45 = vadd.f32 %v2723_v62, %v1394_v43  ;;  %v2248_v46 = vpop.f32.mrb[49].mxu1 }
 0x147   : > { %v1093_v44 = vpop.f32.mrb[50].mxu0  ;;  %v1397_v49 = vpop.f32.mrb[50].mxu1 }
 0x148   : > { %1617 = vst [vmem:[%s2733_s30 + $0xc0] sm:$0xff] %v1091_v41  ;;  %v1094_v47 = vadd.f32 %v2723_v62, %v1093_v44  ;;  %v2097_v48 = vpop.f32.mrb[51].mxu0  ;;  %1693 = vst [vmem:[%s2733_s30 + $0x320] sm:$0xff] %v1395_v45  ;;  %v1398_v50 = vadd.f32 %v2723_v62, %v1397_v49  ;;  %v2249_v51 = vpop.f32.mrb[51].mxu1 }
 0x14a   : > { %1618 = vst [vmem:[%s2733_s30 + $0xc8] sm:$0xff] %v1094_v47  ;;  %1694 = vst [vmem:[%s2733_s30 + $0x328] sm:$0xff] %v1398_v50 }
 0x14d   : > { %v1098_v52 = vpop.f32.mrb[52].mxu0  ;;  %v1402_v55 = vpop.f32.mrb[52].mxu1 }
 0x14e   : > { %v1099_v53 = vadd.f32 %v2723_v62, %v1098_v52  ;;  %v2100_v54 = vpop.f32.mrb[53].mxu0  ;;  %v1403_v57 = vadd.f32 %v2723_v62, %v1402_v55  ;;  %v2252_v58 = vpop.f32.mrb[53].mxu1 }
 0x14f   : > { %v1101_v56 = vpop.f32.mrb[54].mxu0  ;;  %v1405_v61 = vpop.f32.mrb[54].mxu1 }
 0x150   : > { %1619 = vst [vmem:[%s2733_s30 + $0xd0] sm:$0xff] %v1099_v53  ;;  %v1102_v59 = vadd.f32 %v2723_v62, %v1101_v56  ;;  %v2101_v60 = vpop.f32.mrb[55].mxu0  ;;  %1695 = vst [vmem:[%s2733_s30 + $0x330] sm:$0xff] %v1403_v57  ;;  %v1406_v63 = vadd.f32 %v2723_v62, %v1405_v61  ;;  %v2253_v0 = vpop.f32.mrb[55].mxu1 }
 0x152   : > { %1620 = vst [vmem:[%s2733_s30 + $0xd8] sm:$0xff] %v1102_v59  ;;  %1696 = vst [vmem:[%s2733_s30 + $0x338] sm:$0xff] %v1406_v63 }
 0x155   : > { %v1106_v2 = vpop.f32.mrb[56].mxu0  ;;  %v1410_v5 = vpop.f32.mrb[56].mxu1 }
 0x156   : > { %v1107_v3 = vadd.f32 %v2723_v62, %v1106_v2  ;;  %v2104_v4 = vpop.f32.mrb[57].mxu0  ;;  %v1411_v7 = vadd.f32 %v2723_v62, %v1410_v5  ;;  %v2256_v8 = vpop.f32.mrb[57].mxu1 }
 0x157   : > { %v1109_v6 = vpop.f32.mrb[58].mxu0  ;;  %v1413_v11 = vpop.f32.mrb[58].mxu1 }
 0x158   : > { %1621 = vst [vmem:[%s2733_s30 + $0xe0] sm:$0xff] %v1107_v3  ;;  %v1110_v9 = vadd.f32 %v2723_v62, %v1109_v6  ;;  %v2105_v10 = vpop.f32.mrb[59].mxu0  ;;  %1697 = vst [vmem:[%s2733_s30 + $0x340] sm:$0xff] %v1411_v7  ;;  %v1414_v12 = vadd.f32 %v2723_v62, %v1413_v11  ;;  %v2257_v13 = vpop.f32.mrb[59].mxu1 }
 0x15a   : > { %1622 = vst [vmem:[%s2733_s30 + $0xe8] sm:$0xff] %v1110_v9  ;;  %1698 = vst [vmem:[%s2733_s30 + $0x348] sm:$0xff] %v1414_v12 }
 0x15d   : > { %v1114_v14 = vpop.f32.mrb[60].mxu0  ;;  %v1418_v17 = vpop.f32.mrb[60].mxu1 }
 0x15e   : > { %v1115_v15 = vadd.f32 %v2723_v62, %v1114_v14  ;;  %v2108_v16 = vpop.f32.mrb[61].mxu0  ;;  %v1419_v19 = vadd.f32 %v2723_v62, %v1418_v17  ;;  %v2260_v20 = vpop.f32.mrb[61].mxu1 }
 0x15f   : > { %v1117_v18 = vpop.f32.mrb[62].mxu0  ;;  %v1421_v23 = vpop.f32.mrb[62].mxu1 }
 0x160   : > { %1623 = vst [vmem:[%s2733_s30 + $0xf0] sm:$0xff] %v1115_v15  ;;  %v1118_v21 = vadd.f32 %v2723_v62, %v1117_v18  ;;  %v2109_v22 = vpop.f32.mrb[63].mxu0  ;;  %1699 = vst [vmem:[%s2733_s30 + $0x350] sm:$0xff] %v1419_v19  ;;  %v1422_v24 = vadd.f32 %v2723_v62, %v1421_v23  ;;  %v2261_v25 = vpop.f32.mrb[63].mxu1 }
 0x162   : > { %1624 = vst [vmem:[%s2733_s30 + $0xf8] sm:$0xff] %v1118_v21  ;;  %1700 = vst [vmem:[%s2733_s30 + $0x358] sm:$0xff] %v1422_v24 }
 0x165   : > { %v1122_v26 = vpop.f32.mrb[64].mxu0  ;;  %v1426_v28 = vpop.f32.mrb[64].mxu1 }
 0x166   : > { %v1123_v1 = vadd.f32 %v2723_v62, %v1122_v26  ;;  %v2112_v27 = vpop.f32.mrb[65].mxu0  ;;  %v1427_v30 = vadd.f32 %v2723_v62, %v1426_v28  ;;  %v2264_v31 = vpop.f32.mrb[65].mxu1 }
 0x167   : > { %v1125_v29 = vpop.f32.mrb[66].mxu0  ;;  %v1429_v34 = vpop.f32.mrb[66].mxu1 }
 0x168   : > { %1625 = vst [vmem:[%s2733_s30 + $0x100] sm:$0xff] %v1123_v1  ;;  %v1126_v32 = vadd.f32 %v2723_v62, %v1125_v29  ;;  %v2113_v33 = vpop.f32.mrb[67].mxu0  ;;  %1701 = vst [vmem:[%s2733_s30 + $0x360] sm:$0xff] %v1427_v30  ;;  %v1430_v35 = vadd.f32 %v2723_v62, %v1429_v34  ;;  %v2265_v36 = vpop.f32.mrb[67].mxu1 }
 0x16a   : > { %1626 = vst [vmem:[%s2733_s30 + $0x108] sm:$0xff] %v1126_v32  ;;  %1702 = vst [vmem:[%s2733_s30 + $0x368] sm:$0xff] %v1430_v35 }
 0x16d   : > { %v1130_v37 = vpop.f32.mrb[68].mxu0  ;;  %v1434_v40 = vpop.f32.mrb[68].mxu1 }
 0x16e   : > { %v1131_v38 = vadd.f32 %v2723_v62, %v1130_v37  ;;  %v2116_v39 = vpop.f32.mrb[69].mxu0  ;;  %v1435_v42 = vadd.f32 %v2723_v62, %v1434_v40  ;;  %v2268_v43 = vpop.f32.mrb[69].mxu1 }
 0x16f   : > { %v1133_v41 = vpop.f32.mrb[70].mxu0  ;;  %v1437_v46 = vpop.f32.mrb[70].mxu1 }
 0x170   : > { %1627 = vst [vmem:[%s2733_s30 + $0x110] sm:$0xff] %v1131_v38  ;;  %v1134_v44 = vadd.f32 %v2723_v62, %v1133_v41  ;;  %v2117_v45 = vpop.f32.mrb[71].mxu0  ;;  %1703 = vst [vmem:[%s2733_s30 + $0x370] sm:$0xff] %v1435_v42  ;;  %v1438_v47 = vadd.f32 %v2723_v62, %v1437_v46  ;;  %v2269_v48 = vpop.f32.mrb[71].mxu1 }
 0x172   : > { %1628 = vst [vmem:[%s2733_s30 + $0x118] sm:$0xff] %v1134_v44  ;;  %1704 = vst [vmem:[%s2733_s30 + $0x378] sm:$0xff] %v1438_v47 }
 0x175   : > { %v1138_v49 = vpop.f32.mrb[72].mxu0  ;;  %v1442_v52 = vpop.f32.mrb[72].mxu1 }
 0x176   : > { %v1139_v50 = vadd.f32 %v2723_v62, %v1138_v49  ;;  %v2120_v51 = vpop.f32.mrb[73].mxu0  ;;  %v1443_v54 = vadd.f32 %v2723_v62, %v1442_v52  ;;  %v2272_v55 = vpop.f32.mrb[73].mxu1 }
 0x177   : > { %v1141_v53 = vpop.f32.mrb[74].mxu0  ;;  %v1445_v58 = vpop.f32.mrb[74].mxu1 }
 0x178   : > { %1629 = vst [vmem:[%s2733_s30 + $0x120] sm:$0xff] %v1139_v50  ;;  %v1142_v56 = vadd.f32 %v2723_v62, %v1141_v53  ;;  %v2121_v57 = vpop.f32.mrb[75].mxu0  ;;  %1705 = vst [vmem:[%s2733_s30 + $0x380] sm:$0xff] %v1443_v54  ;;  %v1446_v59 = vadd.f32 %v2723_v62, %v1445_v58  ;;  %v2273_v60 = vpop.f32.mrb[75].mxu1 }
 0x17a   : > { %1630 = vst [vmem:[%s2733_s30 + $0x128] sm:$0xff] %v1142_v56  ;;  %1706 = vst [vmem:[%s2733_s30 + $0x388] sm:$0xff] %v1446_v59 }
 0x17d   : > { %v1146_v61 = vpop.f32.mrb[76].mxu0  ;;  %v1450_v2 = vpop.f32.mrb[76].mxu1 }
 0x17e   : > { %v1147_v63 = vadd.f32 %v2723_v62, %v1146_v61  ;;  %v2124_v0 = vpop.f32.mrb[77].mxu0  ;;  %v1451_v4 = vadd.f32 %v2723_v62, %v1450_v2  ;;  %v2276_v5 = vpop.f32.mrb[77].mxu1 }
 0x17f   : > { %v1149_v3 = vpop.f32.mrb[78].mxu0  ;;  %v1453_v8 = vpop.f32.mrb[78].mxu1 }
 0x180   : > { %1631 = vst [vmem:[%s2733_s30 + $0x130] sm:$0xff] %v1147_v63  ;;  %v1150_v6 = vadd.f32 %v2723_v62, %v1149_v3  ;;  %v2125_v7 = vpop.f32.mrb[79].mxu0  ;;  %1707 = vst [vmem:[%s2733_s30 + $0x390] sm:$0xff] %v1451_v4  ;;  %v1454_v9 = vadd.f32 %v2723_v62, %v1453_v8  ;;  %v2277_v10 = vpop.f32.mrb[79].mxu1 }
 0x182   : > { %1632 = vst [vmem:[%s2733_s30 + $0x138] sm:$0xff] %v1150_v6  ;;  %1708 = vst [vmem:[%s2733_s30 + $0x398] sm:$0xff] %v1454_v9 }
 0x185   : > { %v1154_v11 = vpop.f32.mrb[80].mxu0  ;;  %v1458_v14 = vpop.f32.mrb[80].mxu1 }
 0x186   : > { %v1155_v12 = vadd.f32 %v2723_v62, %v1154_v11  ;;  %v2128_v13 = vpop.f32.mrb[81].mxu0  ;;  %v1459_v16 = vadd.f32 %v2723_v62, %v1458_v14  ;;  %v2280_v17 = vpop.f32.mrb[81].mxu1 }
 0x187   : > { %v1157_v15 = vpop.f32.mrb[82].mxu0  ;;  %v1461_v20 = vpop.f32.mrb[82].mxu1 }
 0x188   : > { %1633 = vst [vmem:[%s2733_s30 + $0x140] sm:$0xff] %v1155_v12  ;;  %v1158_v18 = vadd.f32 %v2723_v62, %v1157_v15  ;;  %v2129_v19 = vpop.f32.mrb[83].mxu0  ;;  %1709 = vst [vmem:[%s2733_s30 + $0x3a0] sm:$0xff] %v1459_v16  ;;  %v1462_v21 = vadd.f32 %v2723_v62, %v1461_v20  ;;  %v2281_v22 = vpop.f32.mrb[83].mxu1 }
 0x18a   : > { %1634 = vst [vmem:[%s2733_s30 + $0x148] sm:$0xff] %v1158_v18  ;;  %1710 = vst [vmem:[%s2733_s30 + $0x3a8] sm:$0xff] %v1462_v21 }
 0x18d   : > { %v1162_v23 = vpop.f32.mrb[84].mxu0  ;;  %v1466_v26 = vpop.f32.mrb[84].mxu1 }
 0x18e   : > { %v1163_v24 = vadd.f32 %v2723_v62, %v1162_v23  ;;  %v2132_v25 = vpop.f32.mrb[85].mxu0  ;;  %v1467_v27 = vadd.f32 %v2723_v62, %v1466_v26  ;;  %v2284_v28 = vpop.f32.mrb[85].mxu1 }
 0x18f   : > { %v1165_v1 = vpop.f32.mrb[86].mxu0  ;;  %v1469_v31 = vpop.f32.mrb[86].mxu1 }
 0x190   : > { %1635 = vst [vmem:[%s2733_s30 + $0x150] sm:$0xff] %v1163_v24  ;;  %v1166_v29 = vadd.f32 %v2723_v62, %v1165_v1  ;;  %v2133_v30 = vpop.f32.mrb[87].mxu0  ;;  %1711 = vst [vmem:[%s2733_s30 + $0x3b0] sm:$0xff] %v1467_v27  ;;  %v1470_v32 = vadd.f32 %v2723_v62, %v1469_v31  ;;  %v2285_v33 = vpop.f32.mrb[87].mxu1 }
 0x192   : > { %1636 = vst [vmem:[%s2733_s30 + $0x158] sm:$0xff] %v1166_v29  ;;  %1712 = vst [vmem:[%s2733_s30 + $0x3b8] sm:$0xff] %v1470_v32 }
 0x195   : > { %v1170_v34 = vpop.f32.mrb[88].mxu0  ;;  %v1474_v37 = vpop.f32.mrb[88].mxu1 }
 0x196   : > { %v1171_v35 = vadd.f32 %v2723_v62, %v1170_v34  ;;  %v2136_v36 = vpop.f32.mrb[89].mxu0  ;;  %v1475_v39 = vadd.f32 %v2723_v62, %v1474_v37  ;;  %v2288_v40 = vpop.f32.mrb[89].mxu1 }
 0x197   : > { %v1173_v38 = vpop.f32.mrb[90].mxu0  ;;  %v1477_v43 = vpop.f32.mrb[90].mxu1 }
 0x198   : > { %1637 = vst [vmem:[%s2733_s30 + $0x160] sm:$0xff] %v1171_v35  ;;  %v1174_v41 = vadd.f32 %v2723_v62, %v1173_v38  ;;  %v2137_v42 = vpop.f32.mrb[91].mxu0  ;;  %1713 = vst [vmem:[%s2733_s30 + $0x3c0] sm:$0xff] %v1475_v39  ;;  %v1478_v44 = vadd.f32 %v2723_v62, %v1477_v43  ;;  %v2289_v45 = vpop.f32.mrb[91].mxu1 }
 0x19a   : > { %1638 = vst [vmem:[%s2733_s30 + $0x168] sm:$0xff] %v1174_v41  ;;  %1714 = vst [vmem:[%s2733_s30 + $0x3c8] sm:$0xff] %v1478_v44  ;;  %v3042_v44 = vld [vmem:[%s3125_s2] ss:$0 sm:$0xff] }
 0x19d   : > { %v1178_v46 = vpop.f32.mrb[92].mxu0  ;;  %v1482_v49 = vpop.f32.mrb[92].mxu1 }
 0x19e   : > { %v1179_v47 = vadd.f32 %v2723_v62, %v1178_v46  ;;  %v2140_v48 = vpop.f32.mrb[93].mxu0  ;;  %v1483_v51 = vadd.f32 %v2723_v62, %v1482_v49  ;;  %v2292_v52 = vpop.f32.mrb[93].mxu1 }
 0x19f   : > { %v1181_v50 = vpop.f32.mrb[94].mxu0  ;;  %v1485_v55 = vpop.f32.mrb[94].mxu1 }
 0x1a0   : > { %1639 = vst [vmem:[%s2733_s30 + $0x170] sm:$0xff] %v1179_v47  ;;  %v1182_v53 = vadd.f32 %v2723_v62, %v1181_v50  ;;  %v2141_v54 = vpop.f32.mrb[95].mxu0  ;;  %1715 = vst [vmem:[%s2733_s30 + $0x3d0] sm:$0xff] %v1483_v51  ;;  %v1486_v56 = vadd.f32 %v2723_v62, %v1485_v55  ;;  %v2293_v57 = vpop.f32.mrb[95].mxu1 }
 0x1a2   : > { %1640 = vst [vmem:[%s2733_s30 + $0x178] sm:$0xff] %v1182_v53  ;;  %1716 = vst [vmem:[%s2733_s30 + $0x3d8] sm:$0xff] %v1486_v56 }
 0x1a5   : > { %v1186_v58 = vpop.f32.mrb[96].mxu0  ;;  %v1490_v61 = vpop.f32.mrb[96].mxu1 }
 0x1a6   : > { %v1187_v59 = vadd.f32 %v2723_v62, %v1186_v58  ;;  %v2144_v60 = vpop.f32.mrb[97].mxu0  ;;  %v1491_v0 = vadd.f32 %v2723_v62, %v1490_v61  ;;  %v2296_v2 = vpop.f32.mrb[97].mxu1 }
 0x1a7   : > { %v1189_v63 = vpop.f32.mrb[98].mxu0  ;;  %v1493_v5 = vpop.f32.mrb[98].mxu1 }
 0x1a8   : > { %1641 = vst [vmem:[%s2733_s30 + $0x180] sm:$0xff] %v1187_v59  ;;  %v1190_v3 = vadd.f32 %v2723_v62, %v1189_v63  ;;  %v2145_v4 = vpop.f32.mrb[99].mxu0  ;;  %1717 = vst [vmem:[%s2733_s30 + $0x3e0] sm:$0xff] %v1491_v0  ;;  %v1494_v6 = vadd.f32 %v2723_v62, %v1493_v5  ;;  %v2297_v7 = vpop.f32.mrb[99].mxu1 }
 0x1aa   : > { %1642 = vst [vmem:[%s2733_s30 + $0x188] sm:$0xff] %v1190_v3  ;;  %1718 = vst [vmem:[%s2733_s30 + $0x3e8] sm:$0xff] %v1494_v6 }
 0x1ad   : > { %v1194_v8 = vpop.f32.mrb[100].mxu0  ;;  %v1498_v11 = vpop.f32.mrb[100].mxu1 }
 0x1ae   : > { %v1195_v9 = vadd.f32 %v2723_v62, %v1194_v8  ;;  %v2148_v10 = vpop.f32.mrb[101].mxu0  ;;  %v1499_v13 = vadd.f32 %v2723_v62, %v1498_v11  ;;  %v2300_v14 = vpop.f32.mrb[101].mxu1 }
 0x1af   : > { %v1197_v12 = vpop.f32.mrb[102].mxu0  ;;  %v1501_v17 = vpop.f32.mrb[102].mxu1 }
 0x1b0   : > { %1643 = vst [vmem:[%s2733_s30 + $0x190] sm:$0xff] %v1195_v9  ;;  %v1198_v15 = vadd.f32 %v2723_v62, %v1197_v12  ;;  %v2149_v16 = vpop.f32.mrb[103].mxu0  ;;  %1719 = vst [vmem:[%s2733_s30 + $0x3f0] sm:$0xff] %v1499_v13  ;;  %v1502_v18 = vadd.f32 %v2723_v62, %v1501_v17  ;;  %v2301_v19 = vpop.f32.mrb[103].mxu1 }
 0x1b2   : > { %1644 = vst [vmem:[%s2733_s30 + $0x198] sm:$0xff] %v1198_v15  ;;  %1720 = vst [vmem:[%s2733_s30 + $0x3f8] sm:$0xff] %v1502_v18 }
 0x1b5   : > { %v1202_v20 = vpop.f32.mrb[104].mxu0  ;;  %v1506_v23 = vpop.f32.mrb[104].mxu1 }
 0x1b6   : > { %v1203_v21 = vadd.f32 %v2723_v62, %v1202_v20  ;;  %v2152_v22 = vpop.f32.mrb[105].mxu0  ;;  %v1507_v25 = vadd.f32 %v2723_v62, %v1506_v23  ;;  %v2304_v26 = vpop.f32.mrb[105].mxu1 }
 0x1b7   : > { %v1205_v24 = vpop.f32.mrb[106].mxu0  ;;  %v1509_v28 = vpop.f32.mrb[106].mxu1 }
 0x1b8   : > { %1645 = vst [vmem:[%s2733_s30 + $0x1a0] sm:$0xff] %v1203_v21  ;;  %v1206_v1 = vadd.f32 %v2723_v62, %v1205_v24  ;;  %v2153_v27 = vpop.f32.mrb[107].mxu0  ;;  %1721 = vst [vmem:[%s2733_s30 + $0x400] sm:$0xff] %v1507_v25  ;;  %v1510_v29 = vadd.f32 %v2723_v62, %v1509_v28  ;;  %v2305_v30 = vpop.f32.mrb[107].mxu1 }
 0x1ba   : > { %1646 = vst [vmem:[%s2733_s30 + $0x1a8] sm:$0xff] %v1206_v1  ;;  %1722 = vst [vmem:[%s2733_s30 + $0x408] sm:$0xff] %v1510_v29 }
 0x1bd   : > { %v1210_v31 = vpop.f32.mrb[108].mxu0  ;;  %v1514_v34 = vpop.f32.mrb[108].mxu1 }
 0x1be   : > { %v1211_v32 = vadd.f32 %v2723_v62, %v1210_v31  ;;  %v2156_v33 = vpop.f32.mrb[109].mxu0  ;;  %v1515_v36 = vadd.f32 %v2723_v62, %v1514_v34  ;;  %v2308_v37 = vpop.f32.mrb[109].mxu1 }
 0x1bf   : > { %v1213_v35 = vpop.f32.mrb[110].mxu0  ;;  %v1517_v40 = vpop.f32.mrb[110].mxu1 }
 0x1c0   : > { %1647 = vst [vmem:[%s2733_s30 + $0x1b0] sm:$0xff] %v1211_v32  ;;  %v1214_v38 = vadd.f32 %v2723_v62, %v1213_v35  ;;  %v2157_v39 = vpop.f32.mrb[111].mxu0  ;;  %1723 = vst [vmem:[%s2733_s30 + $0x410] sm:$0xff] %v1515_v36  ;;  %v1518_v41 = vadd.f32 %v2723_v62, %v1517_v40  ;;  %v2309_v42 = vpop.f32.mrb[111].mxu1 }
 0x1c2   : > { %1648 = vst [vmem:[%s2733_s30 + $0x1b8] sm:$0xff] %v1214_v38  ;;  %1724 = vst [vmem:[%s2733_s30 + $0x418] sm:$0xff] %v1518_v41 }
 0x1c5   : > { %v1218_v43 = vpop.f32.mrb[112].mxu0  ;;  %v1522_v47 = vpop.f32.mrb[112].mxu1 }
 0x1c6   : > { %v1219_v45 = vadd.f32 %v3042_v44, %v1218_v43  ;;  %v2160_v46 = vpop.f32.mrb[113].mxu0  ;;  %v1523_v49 = vadd.f32 %v3042_v44, %v1522_v47  ;;  %v2312_v62 = vpop.f32.mrb[113].mxu1 }
 0x1c7   : > { %v1221_v48 = vpop.f32.mrb[114].mxu0  ;;  %v1525_v52 = vpop.f32.mrb[114].mxu1 }
 0x1c8   : > { %1649 = vst [vmem:[%s2733_s30 + $0x1c0] sm:$0xff] %v1219_v45  ;;  %v1222_v50 = vadd.f32 %v3042_v44, %v1221_v48  ;;  %v2161_v51 = vpop.f32.mrb[115].mxu0  ;;  %1725 = vst [vmem:[%s2733_s30 + $0x420] sm:$0xff] %v1523_v49  ;;  %v1526_v53 = vadd.f32 %v3042_v44, %v1525_v52  ;;  %v2313_v54 = vpop.f32.mrb[115].mxu1 }
 0x1ca   : > { %1650 = vst [vmem:[%s2733_s30 + $0x1c8] sm:$0xff] %v1222_v50  ;;  %1726 = vst [vmem:[%s2733_s30 + $0x428] sm:$0xff] %v1526_v53 }
 0x1cd   : > { %v1226_v55 = vpop.f32.mrb[116].mxu0  ;;  %v1530_v58 = vpop.f32.mrb[116].mxu1 }
 0x1ce   : > { %v1227_v56 = vadd.f32 %v3042_v44, %v1226_v55  ;;  %v2164_v57 = vpop.f32.mrb[117].mxu0  ;;  %v1531_v60 = vadd.f32 %v3042_v44, %v1530_v58  ;;  %v2316_v61 = vpop.f32.mrb[117].mxu1 }
 0x1cf   : > { %v1229_v59 = vpop.f32.mrb[118].mxu0  ;;  %v1533_v2 = vpop.f32.mrb[118].mxu1 }
 0x1d0   : > { %1651 = vst [vmem:[%s2733_s30 + $0x1d0] sm:$0xff] %v1227_v56  ;;  %v1230_v63 = vadd.f32 %v3042_v44, %v1229_v59  ;;  %v2165_v0 = vpop.f32.mrb[119].mxu0  ;;  %1727 = vst [vmem:[%s2733_s30 + $0x430] sm:$0xff] %v1531_v60  ;;  %v1534_v3 = vadd.f32 %v3042_v44, %v1533_v2  ;;  %v2317_v4 = vpop.f32.mrb[119].mxu1 }
 0x1d2   : > { %1652 = vst [vmem:[%s2733_s30 + $0x1d8] sm:$0xff] %v1230_v63  ;;  %1728 = vst [vmem:[%s2733_s30 + $0x438] sm:$0xff] %v1534_v3 }
 0x1d5   : > { %v1234_v5 = vpop.f32.mrb[120].mxu0  ;;  %v1538_v8 = vpop.f32.mrb[120].mxu1 }
 0x1d6   : > { %v1235_v6 = vadd.f32 %v3042_v44, %v1234_v5  ;;  %v2168_v7 = vpop.f32.mrb[121].mxu0  ;;  %v1539_v10 = vadd.f32 %v3042_v44, %v1538_v8  ;;  %v2320_v11 = vpop.f32.mrb[121].mxu1 }
 0x1d7   : > { %v1237_v9 = vpop.f32.mrb[122].mxu0  ;;  %v1541_v14 = vpop.f32.mrb[122].mxu1 }
 0x1d8   : > { %1653 = vst [vmem:[%s2733_s30 + $0x1e0] sm:$0xff] %v1235_v6  ;;  %v1238_v12 = vadd.f32 %v3042_v44, %v1237_v9  ;;  %v2169_v13 = vpop.f32.mrb[123].mxu0  ;;  %1729 = vst [vmem:[%s2733_s30 + $0x440] sm:$0xff] %v1539_v10  ;;  %v1542_v15 = vadd.f32 %v3042_v44, %v1541_v14  ;;  %v2321_v16 = vpop.f32.mrb[123].mxu1 }
 0x1da   : > { %1654 = vst [vmem:[%s2733_s30 + $0x1e8] sm:$0xff] %v1238_v12  ;;  %1730 = vst [vmem:[%s2733_s30 + $0x448] sm:$0xff] %v1542_v15 }
 0x1dd   : > { %v1242_v17 = vpop.f32.mrb[124].mxu0  ;;  %v1546_v20 = vpop.f32.mrb[124].mxu1 }
 0x1de   : > { %v1243_v18 = vadd.f32 %v3042_v44, %v1242_v17  ;;  %v2172_v19 = vpop.f32.mrb[125].mxu0  ;;  %v1547_v22 = vadd.f32 %v3042_v44, %v1546_v20  ;;  %v2324_v23 = vpop.f32.mrb[125].mxu1 }
 0x1df   : > { %v1245_v21 = vpop.f32.mrb[126].mxu0  ;;  %v1549_v26 = vpop.f32.mrb[126].mxu1 }
 0x1e0   : > { %1655 = vst [vmem:[%s2733_s30 + $0x1f0] sm:$0xff] %v1243_v18  ;;  %v1246_v24 = vadd.f32 %v3042_v44, %v1245_v21  ;;  %v2173_v25 = vpop.f32.mrb[127].mxu0  ;;  %1731 = vst [vmem:[%s2733_s30 + $0x450] sm:$0xff] %v1547_v22  ;;  %v1550_v1 = vadd.f32 %v3042_v44, %v1549_v26  ;;  %v2325_v27 = vpop.f32.mrb[127].mxu1 }
 0x1e2   : > { %1656 = vst [vmem:[%s2733_s30 + $0x1f8] sm:$0xff] %v1246_v24  ;;  %1732 = vst [vmem:[%s2733_s30 + $0x458] sm:$0xff] %v1550_v1 }
 0x1e5   : > { %v1250_v28 = vpop.f32.mrb[128].mxu0  ;;  %v1554_v31 = vpop.f32.mrb[128].mxu1 }
 0x1e6   : > { %v1251_v29 = vadd.f32 %v3042_v44, %v1250_v28  ;;  %v2176_v30 = vpop.f32.mrb[129].mxu0  ;;  %v1555_v33 = vadd.f32 %v3042_v44, %v1554_v31  ;;  %v2328_v34 = vpop.f32.mrb[129].mxu1 }
 0x1e7   : > { %v1253_v32 = vpop.f32.mrb[130].mxu0  ;;  %v1557_v37 = vpop.f32.mrb[130].mxu1 }
 0x1e8   : > { %1657 = vst [vmem:[%s2733_s30 + $0x200] sm:$0xff] %v1251_v29  ;;  %v1254_v35 = vadd.f32 %v3042_v44, %v1253_v32  ;;  %v2177_v36 = vpop.f32.mrb[131].mxu0  ;;  %1733 = vst [vmem:[%s2733_s30 + $0x460] sm:$0xff] %v1555_v33  ;;  %v1558_v38 = vadd.f32 %v3042_v44, %v1557_v37  ;;  %v2329_v39 = vpop.f32.mrb[131].mxu1 }
 0x1ea   : > { %1658 = vst [vmem:[%s2733_s30 + $0x208] sm:$0xff] %v1254_v35  ;;  %1734 = vst [vmem:[%s2733_s30 + $0x468] sm:$0xff] %v1558_v38 }
 0x1ed   : > { %v1258_v40 = vpop.f32.mrb[132].mxu0  ;;  %v1562_v43 = vpop.f32.mrb[132].mxu1 }
 0x1ee   : > { %v1259_v41 = vadd.f32 %v3042_v44, %v1258_v40  ;;  %v2180_v42 = vpop.f32.mrb[133].mxu0  ;;  %v1563_v46 = vadd.f32 %v3042_v44, %v1562_v43  ;;  %v2332_v47 = vpop.f32.mrb[133].mxu1 }
 0x1ef   : > { %v1261_v45 = vpop.f32.mrb[134].mxu0  ;;  %v1565_v62 = vpop.f32.mrb[134].mxu1 }
 0x1f0   : > { %1659 = vst [vmem:[%s2733_s30 + $0x210] sm:$0xff] %v1259_v41  ;;  %v1262_v48 = vadd.f32 %v3042_v44, %v1261_v45  ;;  %v2181_v49 = vpop.f32.mrb[135].mxu0  ;;  %1735 = vst [vmem:[%s2733_s30 + $0x470] sm:$0xff] %v1563_v46  ;;  %v1566_v50 = vadd.f32 %v3042_v44, %v1565_v62  ;;  %v2333_v51 = vpop.f32.mrb[135].mxu1 }
 0x1f2   : > { %1660 = vst [vmem:[%s2733_s30 + $0x218] sm:$0xff] %v1262_v48  ;;  %1736 = vst [vmem:[%s2733_s30 + $0x478] sm:$0xff] %v1566_v50 }
 0x1f5   : > { %v1266_v52 = vpop.f32.mrb[136].mxu0  ;;  %v1570_v55 = vpop.f32.mrb[136].mxu1 }
 0x1f6   : > { %v1267_v53 = vadd.f32 %v3042_v44, %v1266_v52  ;;  %v2184_v54 = vpop.f32.mrb[137].mxu0  ;;  %v1571_v57 = vadd.f32 %v3042_v44, %v1570_v55  ;;  %v2336_v58 = vpop.f32.mrb[137].mxu1 }
 0x1f7   : > { %v1269_v56 = vpop.f32.mrb[138].mxu0  ;;  %v1573_v61 = vpop.f32.mrb[138].mxu1 }
 0x1f8   : > { %1661 = vst [vmem:[%s2733_s30 + $0x220] sm:$0xff] %v1267_v53  ;;  %v1270_v59 = vadd.f32 %v3042_v44, %v1269_v56  ;;  %v2185_v60 = vpop.f32.mrb[139].mxu0  ;;  %1737 = vst [vmem:[%s2733_s30 + $0x480] sm:$0xff] %v1571_v57  ;;  %v1574_v63 = vadd.f32 %v3042_v44, %v1573_v61  ;;  %v2337_v0 = vpop.f32.mrb[139].mxu1 }
 0x1fa   : > { %1662 = vst [vmem:[%s2733_s30 + $0x228] sm:$0xff] %v1270_v59  ;;  %1738 = vst [vmem:[%s2733_s30 + $0x488] sm:$0xff] %v1574_v63 }
 0x1fd   : > { %v1274_v2 = vpop.f32.mrb[140].mxu0  ;;  %v1578_v5 = vpop.f32.mrb[140].mxu1 }
 0x1fe   : > { %v1275_v3 = vadd.f32 %v3042_v44, %v1274_v2  ;;  %v2188_v4 = vpop.f32.mrb[141].mxu0  ;;  %v1579_v7 = vadd.f32 %v3042_v44, %v1578_v5  ;;  %v2340_v8 = vpop.f32.mrb[141].mxu1 }
 0x1ff   : > { %v1277_v6 = vpop.f32.mrb[142].mxu0  ;;  %v1581_v11 = vpop.f32.mrb[142].mxu1 }
 0x200   : > { %1663 = vst [vmem:[%s2733_s30 + $0x230] sm:$0xff] %v1275_v3  ;;  %v1278_v9 = vadd.f32 %v3042_v44, %v1277_v6  ;;  %v2189_v10 = vpop.f32.mrb[143].mxu0  ;;  %1739 = vst [vmem:[%s2733_s30 + $0x490] sm:$0xff] %v1579_v7  ;;  %v1582_v12 = vadd.f32 %v3042_v44, %v1581_v11  ;;  %v2341_v13 = vpop.f32.mrb[143].mxu1 }
 0x202   : > { %1664 = vst [vmem:[%s2733_s30 + $0x238] sm:$0xff] %v1278_v9  ;;  %1740 = vst [vmem:[%s2733_s30 + $0x498] sm:$0xff] %v1582_v12 }
 0x205   : > { %v1282_v14 = vpop.f32.mrb[144].mxu0  ;;  %v1586_v17 = vpop.f32.mrb[144].mxu1 }
 0x206   : > { %v1283_v15 = vadd.f32 %v3042_v44, %v1282_v14  ;;  %v2192_v16 = vpop.f32.mrb[145].mxu0  ;;  %v1587_v19 = vadd.f32 %v3042_v44, %v1586_v17  ;;  %v2344_v20 = vpop.f32.mrb[145].mxu1 }
 0x207   : > { %v1285_v18 = vpop.f32.mrb[146].mxu0  ;;  %v1589_v23 = vpop.f32.mrb[146].mxu1 }
 0x208   : > { %1665 = vst [vmem:[%s2733_s30 + $0x240] sm:$0xff] %v1283_v15  ;;  %v1286_v21 = vadd.f32 %v3042_v44, %v1285_v18  ;;  %v2193_v22 = vpop.f32.mrb[147].mxu0  ;;  %1741 = vst [vmem:[%s2733_s30 + $0x4a0] sm:$0xff] %v1587_v19  ;;  %v1590_v24 = vadd.f32 %v3042_v44, %v1589_v23  ;;  %v2345_v25 = vpop.f32.mrb[147].mxu1 }
 0x20a   : > { %1666 = vst [vmem:[%s2733_s30 + $0x248] sm:$0xff] %v1286_v21  ;;  %1742 = vst [vmem:[%s2733_s30 + $0x4a8] sm:$0xff] %v1590_v24 }
 0x20d   : > { %v1290_v26 = vpop.f32.mrb[148].mxu0 }
 0x20e   : > { %v1291_v1 = vadd.f32 %v3042_v44, %v1290_v26  ;;  %v2196_v27 = vpop.f32.mrb[149].mxu0 }
 0x20f   : > { %v1293_v28 = vpop.f32.mrb[150].mxu0 }
 0x210   : > { %1667 = vst [vmem:[%s2733_s30 + $0x250] sm:$0xff] %v1291_v1  ;;  %v1294_v29 = vadd.f32 %v3042_v44, %v1293_v28  ;;  %v2197_v30 = vpop.f32.mrb[151].mxu0 }
 0x212   : > { %1668 = vst [vmem:[%s2733_s30 + $0x258] sm:$0xff] %v1294_v29 }
 0x213 PF: > { %s13_s12 = sadd.s32 1, %s2448_s12  }
 0x214   : > { %p10_p4 = scmp.ge.s32.totalorder %s13_s12, 4  }
 0x216   :  { %12 = sbr.rel (!%p10_p4) target bundleno = 1 (0x1), region = 62 }

// kernel: dummy_model_forward.3
= control target key start
LH: loop header
LB: loop body
LE: loop exit
PB: predicated region body
PF: predicated region fallthrough
CT: control target
= control target key end

     0   :  { %v5713_v43 = vmov 1983009808   ;;  %v1008_v45 = vlaneseq  ;;  %s8885_s0 = inlined_call_operand.vmem [shape: f32[2,7488], index: 0, kind: input, shape index: {}]   ;;  %s8886_s1 = inlined_call_operand.vmem [shape: f32[7488,27], index: 1, kind: input, shape index: {}]   ;;  %s8887_s2 = inlined_call_operand.vmem [shape: f32[1,27], index: 2, kind: input, shape index: {}]   ;;  %s8888_s3 = inlined_call_operand.vmem [shape: f32[27,27], index: 3, kind: input, shape index: {}]   ;;  %s8889_s4 = inlined_call_operand.vmem [shape: f32[1,27], index: 4, kind: input, shape index: {}]   ;;  %s8890_s5 = inlined_call_operand.<no memory space> [shape: f32[1], index: 5, kind: input, shape index: {}]   ;;  %s8891_s6 = inlined_call_operand.vmem [shape: f32[27,10], index: 6, kind: input, shape index: {}]   ;;  %s8892_s7 = inlined_call_operand.vmem [shape: f32[1,10], index: 7, kind: input, shape index: {}]   ;;  %s8893_s8 = inlined_call_operand.hbm [shape: f32[2,10], index: 8, kind: output, shape index: {}]  }
   0x1   :  { %v62_v0 = vld [vmem:[%s8886_s1 + $0x80] sm:$0xff]  ;;  %v63_v1 = vld [vmem:[%s8886_s1 + $0x88] sm:$0xff]  ;;  %v64_v11 = vld [vmem:[%s8886_s1 + $0x90] sm:$0xff]  ;;  %v1006_v44 = vunpack.c.l.s4 %v5713_v43 }
   0x2   :  { %v46_v2 = vld [vmem:[%s8886_s1] sm:$0xff]  ;;  %v4710_v3 = vpack.c.bf16 %v63_v1, %v62_v0  ;;  %v47_v4 = vld [vmem:[%s8886_s1 + $0x8] sm:$0xff]  ;;  %v65_v13 = vld [vmem:[%s8886_s1 + $0x98] sm:$0xff]  ;;  %v1009_v60 = vshrl.u32 %v1008_v45, 7 }
   0x3   :  { %v94_v5 = vld [vmem:[%s8886_s1 + $0x180] sm:$0xff]  ;;  %v95_v6 = vld [vmem:[%s8886_s1 + $0x188] sm:$0xff]  ;;  %v4712_v7 = vpack.c.bf16 %v47_v4, %v46_v2  ;;  %v48_v14 = vld [vmem:[%s8886_s1 + $0x10] sm:$0xff]  ;;  %v4714_v16 = vpack.c.bf16 %v65_v13, %v64_v11  ;;  %v1007_v59 = vunpack.c.0.s8 %v1006_v44 }
   0x4   :  { %v4742_v8 = vpack.c.bf16 %v95_v6, %v94_v5  ;;  %v78_v9 = vld [vmem:[%s8886_s1 + $0x100] sm:$0xff]  ;;  %v79_v10 = vld [vmem:[%s8886_s1 + $0x108] sm:$0xff]  ;;  %4711 = vmatprep.subr.bf16.mxu0 %v4710_v3  ;;  %v49_v15 = vld [vmem:[%s8886_s1 + $0x18] sm:$0xff] }
   0x5   :  { %v4744_v12 = vpack.c.bf16 %v79_v10, %v78_v9  ;;  %4713 = vmatpush3.bf16.msra.mxu0 %v4712_v7  ;;  %v4716_v17 = vpack.c.bf16 %v49_v15, %v48_v14  ;;  %v96_v18 = vld [vmem:[%s8886_s1 + $0x190] sm:$0xff]  ;;  %v97_v19 = vld [vmem:[%s8886_s1 + $0x198] sm:$0xff]  ;;  %v66_v23 = vld [vmem:[%s8886_s1 + $0xa0] sm:$0xff]  ;;  %v5908_v10 = vsub.s32 %v1007_v59, %v1009_v60 }
   0x6   :  { %4743 = vmatprep.subr.bf16.mxu1 %v4742_v8  ;;  %v80_v20 = vld [vmem:[%s8886_s1 + $0x110] sm:$0xff]  ;;  %v4746_v21 = vpack.c.bf16 %v97_v19, %v96_v18  ;;  %v81_v22 = vld [vmem:[%s8886_s1 + $0x118] sm:$0xff]  ;;  %v67_v24 = vld [vmem:[%s8886_s1 + $0xa8] sm:$0xff]  ;;  %4715 = vmatprep.subr.bf16.mxu0 %v4714_v16 }
   0x7   :  { %4745 = vmatpush3.bf16.msra.mxu1 %v4744_v12  ;;  %v4748_v25 = vpack.c.bf16 %v81_v22, %v80_v20  ;;  %v4718_v26 = vpack.c.bf16 %v67_v24, %v66_v23  ;;  %v50_v27 = vld [vmem:[%s8886_s1 + $0x20] sm:$0xff]  ;;  %v51_v28 = vld [vmem:[%s8886_s1 + $0x28] sm:$0xff]  ;;  %v68_v35 = vld [vmem:[%s8886_s1 + $0xb0] sm:$0xff] }
   0x8   :  { %v98_v29 = vld [vmem:[%s8886_s1 + $0x1a0] sm:$0xff]  ;;  %4747 = vmatprep.subr.bf16.mxu1 %v4746_v21  ;;  %v99_v30 = vld [vmem:[%s8886_s1 + $0x1a8] sm:$0xff]  ;;  %v4720_v33 = vpack.c.bf16 %v51_v28, %v50_v27  ;;  %v69_v36 = vld [vmem:[%s8886_s1 + $0xb8] sm:$0xff] }
   0x9   :  { %v82_v31 = vld [vmem:[%s8886_s1 + $0x120] sm:$0xff]  ;;  %v83_v32 = vld [vmem:[%s8886_s1 + $0x128] sm:$0xff]  ;;  %4717 = vmatpush3.bf16.msra.mxu0 %v4716_v17  ;;  %v4750_v34 = vpack.c.bf16 %v99_v30, %v98_v29  ;;  %v52_v37 = vld [vmem:[%s8886_s1 + $0x30] sm:$0xff]  ;;  %v4722_v39 = vpack.c.bf16 %v69_v36, %v68_v35 }
   0xa   :  { %4719 = vmatprep.subr.bf16.mxu0 %v4718_v26  ;;  %v4752_v38 = vpack.c.bf16 %v83_v32, %v82_v31  ;;  %v53_v40 = vld [vmem:[%s8886_s1 + $0x38] sm:$0xff]  ;;  %v100_v41 = vld [vmem:[%s8886_s1 + $0x1b0] sm:$0xff]  ;;  %v70_v49 = vld [vmem:[%s8886_s1 + $0xc0] sm:$0xff] }
   0xb   :  { %4749 = vmatpush3.bf16.msra.mxu1 %v4748_v25  ;;  %v101_v42 = vld [vmem:[%s8886_s1 + $0x1b8] sm:$0xff]  ;;  %v84_v47 = vld [vmem:[%s8886_s1 + $0x130] sm:$0xff]  ;;  %v71_v50 = vld [vmem:[%s8886_s1 + $0xc8] sm:$0xff]  ;;  %v4724_v51 = vpack.c.bf16 %v53_v40, %v52_v37 }
   0xc   :  { %4751 = vmatprep.subr.bf16.mxu1 %v4750_v34  ;;  %v4754_v46 = vpack.c.bf16 %v101_v42, %v100_v41  ;;  %v85_v48 = vld [vmem:[%s8886_s1 + $0x138] sm:$0xff]  ;;  %v102_v52 = vld [vmem:[%s8886_s1 + $0x1c0] sm:$0xff]  ;;  %v103_v53 = vld [vmem:[%s8886_s1 + $0x1c8] sm:$0xff]  ;;  %v4726_v55 = vpack.c.bf16 %v71_v50, %v70_v49 }
   0xd   :  { %4721 = vmatpush3.bf16.msra.mxu0 %v4720_v33  ;;  %v4756_v54 = vpack.c.bf16 %v85_v48, %v84_v47  ;;  %v54_v56 = vld [vmem:[%s8886_s1 + $0x40] sm:$0xff]  ;;  %v55_v57 = vld [vmem:[%s8886_s1 + $0x48] sm:$0xff]  ;;  %v4758_v61 = vpack.c.bf16 %v103_v53, %v102_v52  ;;  %v72_v63 = vld [vmem:[%s8886_s1 + $0xd0] sm:$0xff] }
   0xe   :  { %4723 = vmatprep.subr.bf16.mxu0 %v4722_v39  ;;  %v86_v58 = vld [vmem:[%s8886_s1 + $0x140] sm:$0xff]  ;;  %v87_v62 = vld [vmem:[%s8886_s1 + $0x148] sm:$0xff]  ;;  %v73_v0 = vld [vmem:[%s8886_s1 + $0xd8] sm:$0xff]  ;;  %v4728_v3 = vpack.c.bf16 %v55_v57, %v54_v56 }
   0xf   :  { %4753 = vmatpush3.bf16.msra.mxu1 %v4752_v38  ;;  %v104_v1 = vld [vmem:[%s8886_s1 + $0x1d0] sm:$0xff]  ;;  %v105_v2 = vld [vmem:[%s8886_s1 + $0x1d8] sm:$0xff]  ;;  %v4760_v5 = vpack.c.bf16 %v87_v62, %v86_v58  ;;  %v4730_v6 = vpack.c.bf16 %v73_v0, %v72_v63  ;;  %v74_v12 = vld [vmem:[%s8886_s1 + $0xe0] sm:$0xff] }
  0x10   :  { %4755 = vmatprep.subr.bf16.mxu1 %v4754_v46  ;;  %v56_v4 = vld [vmem:[%s8886_s1 + $0x50] sm:$0xff]  ;;  %v57_v7 = vld [vmem:[%s8886_s1 + $0x58] sm:$0xff]  ;;  %v4762_v11 = vpack.c.bf16 %v105_v2, %v104_v1  ;;  %v75_v13 = vld [vmem:[%s8886_s1 + $0xe8] sm:$0xff] }
  0x11   :  { %4725 = vmatpush3.bf16.msra.mxu0 %v4724_v51  ;;  %v88_v8 = vld [vmem:[%s8886_s1 + $0x150] sm:$0xff]  ;;  %v89_v9 = vld [vmem:[%s8886_s1 + $0x158] sm:$0xff]  ;;  %v106_v14 = vld [vmem:[%s8886_s1 + $0x1e0] sm:$0xff]  ;;  %v4732_v16 = vpack.c.bf16 %v57_v7, %v56_v4  ;;  %v4734_v19 = vpack.c.bf16 %v75_v13, %v74_v12 }
  0x12   :  { %4727 = vmatprep.subr.bf16.mxu0 %v4726_v55  ;;  %v107_v15 = vld [vmem:[%s8886_s1 + $0x1e8] sm:$0xff]  ;;  %v4764_v17 = vpack.c.bf16 %v89_v9, %v88_v8  ;;  %v31_v18 = vld [vmem:[%s8885_s0] sm:$0xff]  ;;  %v76_v27 = vld [vmem:[%s8886_s1 + $0xf0] sm:$0xff] }
  0x13   :  { %4757 = vmatpush3.bf16.msra.mxu1 %v4756_v54  ;;  %v58_v20 = vld [vmem:[%s8886_s1 + $0x60] sm:$0xff]  ;;  %v59_v21 = vld [vmem:[%s8886_s1 + $0x68] sm:$0xff]  ;;  %v1011_v23 = vrot.slane %v31_v18, %v5908_v10  ;;  %v1004_v24 = vcombine.high %v31_v18, %v31_v18  ;;  %v4766_v25 = vpack.c.bf16 %v107_v15, %v106_v14  ;;  %v77_v28 = vld [vmem:[%s8886_s1 + $0xf8] sm:$0xff] }
  0x14   :  { %4759 = vmatprep.subr.bf16.mxu1 %v4758_v61  ;;  %v90_v22 = vld [vmem:[%s8886_s1 + $0x160] sm:$0xff]  ;;  %v91_v26 = vld [vmem:[%s8886_s1 + $0x168] sm:$0xff]  ;;  %v108_v29 = vld [vmem:[%s8886_s1 + $0x1f0] sm:$0xff]  ;;  %v4736_v33 = vpack.c.bf16 %v59_v21, %v58_v20  ;;  %v4738_v35 = vpack.c.bf16 %v77_v28, %v76_v27 }
  0x15   :  { %4729 = vmatpush3.bf16.msra.mxu0 %v4728_v3  ;;  %v109_v30 = vld [vmem:[%s8886_s1 + $0x1f8] sm:$0xff]  ;;  %v1019_v31 = vcombine.high %v1011_v23, %v1011_v23  ;;  %v1018_v32 = vrot.slane %v1004_v24, %v5908_v10  ;;  %v4768_v34 = vpack.c.bf16 %v91_v26, %v90_v22  ;;  %v60_v36 = vld [vmem:[%s8886_s1 + $0x70] sm:$0xff]  ;;  %v126_v42 = vld [vmem:[%s8886_s1 + $0x280] sm:$0xff] }
  0x16   :  { %4731 = vmatprep.subr.bf16.mxu0 %v4730_v6  ;;  %v61_v37 = vld [vmem:[%s8886_s1 + $0x78] sm:$0xff]  ;;  %v92_v38 = vld [vmem:[%s8886_s1 + $0x170] sm:$0xff]  ;;  %v4770_v40 = vpack.c.bf16 %v109_v30, %v108_v29  ;;  %v127_v43 = vld [vmem:[%s8886_s1 + $0x288] sm:$0xff] }
  0x17   :  { %4761 = vmatpush3.bf16.msra.mxu1 %v4760_v5  ;;  %v1020_v39 = vcombine.high %v1018_v32, %v1018_v32  ;;  %1383 = vmatprep.mubr.f32.mxu0 %v1019_v31  ;;  %v93_v41 = vld [vmem:[%s8886_s1 + $0x178] sm:$0xff]  ;;  %v158_v44 = vld [vmem:[%s8886_s1 + $0x380] sm:$0xff]  ;;  %v159_v45 = vld [vmem:[%s8886_s1 + $0x388] sm:$0xff]  ;;  %v4740_v46 = vpack.c.bf16 %v61_v37, %v60_v36  ;;  %v4774_v48 = vpack.c.bf16 %v127_v43, %v126_v42 }
  0x18   :  { %4763 = vmatprep.subr.bf16.mxu1 %v4762_v11  ;;  %v4772_v47 = vpack.c.bf16 %v93_v41, %v92_v38  ;;  %v110_v49 = vld [vmem:[%s8886_s1 + $0x200] sm:$0xff]  ;;  %v111_v50 = vld [vmem:[%s8886_s1 + $0x208] sm:$0xff]  ;;  %v4806_v52 = vpack.c.bf16 %v159_v45, %v158_v44  ;;  %v128_v54 = vld [vmem:[%s8886_s1 + $0x290] sm:$0xff] }
  0x19   :  { %4733 = vmatpush3.bf16.msra.mxu0 %v4732_v16  ;;  %1453 = vmatprep.mubr.f32.mxu1 %v1020_v39  ;;  %v142_v51 = vld [vmem:[%s8886_s1 + $0x300] sm:$0xff]  ;;  %v143_v53 = vld [vmem:[%s8886_s1 + $0x308] sm:$0xff]  ;;  %v129_v55 = vld [vmem:[%s8886_s1 + $0x298] sm:$0xff]  ;;  %v4776_v58 = vpack.c.bf16 %v111_v50, %v110_v49 }
  0x1a   :  { %4735 = vmatprep.subr.bf16.mxu0 %v4734_v19  ;;  %v160_v56 = vld [vmem:[%s8886_s1 + $0x390] sm:$0xff]  ;;  %v161_v57 = vld [vmem:[%s8886_s1 + $0x398] sm:$0xff]  ;;  %v4808_v59 = vpack.c.bf16 %v143_v53, %v142_v51  ;;  %v4778_v60 = vpack.c.bf16 %v129_v55, %v128_v54  ;;  %v130_v2 = vld [vmem:[%s8886_s1 + $0x2a0] sm:$0xff] }
  0x1b   :  { %4765 = vmatpush3.bf16.msra.mxu1 %v4764_v17  ;;  %v112_v61 = vld [vmem:[%s8886_s1 + $0x210] sm:$0xff]  ;;  %v113_v62 = vld [vmem:[%s8886_s1 + $0x218] sm:$0xff]  ;;  %v4810_v0 = vpack.c.bf16 %v161_v57, %v160_v56  ;;  %v131_v3 = vld [vmem:[%s8886_s1 + $0x2a8] sm:$0xff] }
  0x1c   :  { %4767 = vmatprep.subr.bf16.mxu1 %v4766_v25  ;;  %v144_v63 = vld [vmem:[%s8886_s1 + $0x310] sm:$0xff]  ;;  %v145_v1 = vld [vmem:[%s8886_s1 + $0x318] sm:$0xff]  ;;  %v162_v4 = vld [vmem:[%s8886_s1 + $0x3a0] sm:$0xff]  ;;  %v4780_v6 = vpack.c.bf16 %v113_v62, %v112_v61  ;;  %v4782_v8 = vpack.c.bf16 %v131_v3, %v130_v2 }
  0x1d   :  { %4737 = vmatpush3.bf16.msra.mxu0 %v4736_v33  ;;  %v163_v5 = vld [vmem:[%s8886_s1 + $0x3a8] sm:$0xff]  ;;  %v4812_v7 = vpack.c.bf16 %v145_v1, %v144_v63  ;;  %v114_v9 = vld [vmem:[%s8886_s1 + $0x220] sm:$0xff]  ;;  %v132_v15 = vld [vmem:[%s8886_s1 + $0x2b0] sm:$0xff] }
  0x1e   :  { %4739 = vmatprep.subr.bf16.mxu0 %v4738_v35  ;;  %v115_v11 = vld [vmem:[%s8886_s1 + $0x228] sm:$0xff]  ;;  %v146_v12 = vld [vmem:[%s8886_s1 + $0x320] sm:$0xff]  ;;  %v4814_v13 = vpack.c.bf16 %v163_v5, %v162_v4  ;;  %v133_v16 = vld [vmem:[%s8886_s1 + $0x2b8] sm:$0xff] }
  0x1f   :  { %4769 = vmatpush3.bf16.msra.mxu1 %v4768_v34  ;;  %v147_v14 = vld [vmem:[%s8886_s1 + $0x328] sm:$0xff]  ;;  %v164_v17 = vld [vmem:[%s8886_s1 + $0x3b0] sm:$0xff]  ;;  %v165_v18 = vld [vmem:[%s8886_s1 + $0x3b8] sm:$0xff]  ;;  %v4784_v19 = vpack.c.bf16 %v115_v11, %v114_v9  ;;  %v4786_v22 = vpack.c.bf16 %v133_v16, %v132_v15 }
  0x20   :  { %4771 = vmatprep.subr.bf16.mxu1 %v4770_v40  ;;  %v116_v20 = vld [vmem:[%s8886_s1 + $0x230] sm:$0xff]  ;;  %v4816_v21 = vpack.c.bf16 %v147_v14, %v146_v12  ;;  %v149_v25 = vld [vmem:[%s8886_s1 + $0x338] sm:$0xff]  ;;  %v4818_v26 = vpack.c.bf16 %v165_v18, %v164_v17  ;;  %v134_v27 = vld [vmem:[%s8886_s1 + $0x2c0] sm:$0xff] }
  0x21   :  { %4741 = vmatpush3.bf16.msra.mxu0 %v4740_v46  ;;  %v148_v24 = vld [vmem:[%s8886_s1 + $0x330] sm:$0xff]  ;;  %v135_v28 = vld [vmem:[%s8886_s1 + $0x2c8] sm:$0xff]  ;;  %v166_v30 = vld [vmem:[%s8886_s1 + $0x3c0] sm:$0xff] }
  0x22   :  { %4775 = vmatprep.subr.bf16.mxu0 %v4774_v48  ;;  %v32_v29 = vld [vmem:[%s8885_s0 + $0x8] sm:$0xff]  ;;  %v4820_v35 = vpack.c.bf16 %v149_v25, %v148_v24  ;;  %v4790_v36 = vpack.c.bf16 %v135_v28, %v134_v27  ;;  %v118_v37 = vld [vmem:[%s8886_s1 + $0x240] sm:$0xff]  ;;  %v136_v44 = vld [vmem:[%s8886_s1 + $0x2d0] sm:$0xff] }
  0x23   :  { %4773 = vmatpush3.bf16.msra.mxu1 %v4772_v47  ;;  %v167_v31 = vld [vmem:[%s8886_s1 + $0x3c8] sm:$0xff]  ;;  %v1021_v33 = vcombine.high %v32_v29, %v32_v29  ;;  %v150_v39 = vld [vmem:[%s8886_s1 + $0x340] sm:$0xff]  ;;  %v137_v45 = vld [vmem:[%s8886_s1 + $0x2d8] sm:$0xff] }
  0x24   :  { %4807 = vmatprep.subr.bf16.mxu1 %v4806_v52  ;;  %1384 = vmatmul.mubr.f32.vlgmr.msra.gmra.mrb[0].mxu0 %v1011_v23  ;;  %v117_v23 = vld [vmem:[%s8886_s1 + $0x238] sm:$0xff]  ;;  %v119_v38 = vld [vmem:[%s8886_s1 + $0x248] sm:$0xff]  ;;  %v4822_v42 = vpack.c.bf16 %v167_v31, %v166_v30  ;;  %v168_v46 = vld [vmem:[%s8886_s1 + $0x3d0] sm:$0xff]  ;;  %v4794_v51 = vpack.c.bf16 %v137_v45, %v136_v44 }
  0x25   :  { %4777 = vmatpush3.bf16.msra.mxu0 %v4776_v58  ;;  %v4788_v34 = vpack.c.bf16 %v117_v23, %v116_v20  ;;  %v6089_v41 = vrot.slane %v1021_v33, %v5908_v10  ;;  %v151_v43 = vld [vmem:[%s8886_s1 + $0x348] sm:$0xff]  ;;  %v169_v47 = vld [vmem:[%s8886_s1 + $0x3d8] sm:$0xff]  ;;  %v4792_v49 = vpack.c.bf16 %v119_v38, %v118_v37  ;;  %v120_v52 = vld [vmem:[%s8886_s1 + $0x250] sm:$0xff] }
  0x26   :  { %1454 = vmatmul.mubr.f32.vlgmr.msra.gmra.mrb[0].mxu1 %v1018_v32  ;;  %4779 = vmatprep.subr.bf16.mxu0 %v4778_v60  ;;  %v6075_v32 = vrot.slane %v32_v29, %v5908_v10  ;;  %v4824_v50 = vpack.c.bf16 %v151_v43, %v150_v39  ;;  %v121_v53 = vld [vmem:[%s8886_s1 + $0x258] sm:$0xff]  ;;  %v152_v54 = vld [vmem:[%s8886_s1 + $0x350] sm:$0xff]  ;;  %v4826_v55 = vpack.c.bf16 %v169_v47, %v168_v46  ;;  %v138_v57 = vld [vmem:[%s8886_s1 + $0x2e0] sm:$0xff] }
  0x27   :  { %4809 = vmatpush3.bf16.msra.mxu1 %v4808_v59  ;;  %v1037_v48 = vcombine.high %v6089_v41, %v6089_v41  ;;  %v153_v56 = vld [vmem:[%s8886_s1 + $0x358] sm:$0xff]  ;;  %v139_v58 = vld [vmem:[%s8886_s1 + $0x2e8] sm:$0xff]  ;;  %v170_v59 = vld [vmem:[%s8886_s1 + $0x3e0] sm:$0xff]  ;;  %v4796_v61 = vpack.c.bf16 %v121_v53, %v120_v52 }
  0x28   :  { %4811 = vmatprep.subr.bf16.mxu1 %v4810_v0  ;;  %v1036_v40 = vcombine.high %v6075_v32, %v6075_v32  ;;  %v171_v60 = vld [vmem:[%s8886_s1 + $0x3e8] sm:$0xff]  ;;  %v4828_v62 = vpack.c.bf16 %v153_v56, %v152_v54  ;;  %v4798_v63 = vpack.c.bf16 %v139_v58, %v138_v57  ;;  %v122_v0 = vld [vmem:[%s8886_s1 + $0x260] sm:$0xff]  ;;  %v140_v5 = vld [vmem:[%s8886_s1 + $0x2f0] sm:$0xff] }
  0x29   :  { %4781 = vmatpush3.bf16.msra.mxu0 %v4780_v6  ;;  %1593 = vmatprep.mubr.f32.mxu1 %v1037_v48  ;;  %v123_v1 = vld [vmem:[%s8886_s1 + $0x268] sm:$0xff]  ;;  %v154_v2 = vld [vmem:[%s8886_s1 + $0x360] sm:$0xff]  ;;  %v4830_v3 = vpack.c.bf16 %v171_v60, %v170_v59  ;;  %v141_v6 = vld [vmem:[%s8886_s1 + $0x2f8] sm:$0xff] }
  0x2a   :  { %4783 = vmatprep.subr.bf16.mxu0 %v4782_v8  ;;  %1523 = vmatprep.mubr.f32.mxu0 %v1036_v40  ;;  %v155_v4 = vld [vmem:[%s8886_s1 + $0x368] sm:$0xff]  ;;  %v173_v8 = vld [vmem:[%s8886_s1 + $0x3f8] sm:$0xff]  ;;  %v4800_v9 = vpack.c.bf16 %v123_v1, %v122_v0  ;;  %v4802_v12 = vpack.c.bf16 %v141_v6, %v140_v5  ;;  %v156_v15 = vld [vmem:[%s8886_s1 + $0x370] sm:$0xff] }
  0x2b   :  { %4813 = vmatpush3.bf16.msra.mxu1 %v4812_v7  ;;  %v172_v7 = vld [vmem:[%s8886_s1 + $0x3f0] sm:$0xff]  ;;  %v4832_v11 = vpack.c.bf16 %v155_v4, %v154_v2  ;;  %v125_v14 = vld [vmem:[%s8886_s1 + $0x278] sm:$0xff]  ;;  %v190_v18 = vld [vmem:[%s8886_s1 + $0x480] sm:$0xff] }
  0x2c   :  { %4815 = vmatprep.subr.bf16.mxu1 %v4814_v13  ;;  %v124_v13 = vld [vmem:[%s8886_s1 + $0x270] sm:$0xff]  ;;  %v4834_v16 = vpack.c.bf16 %v173_v8, %v172_v7  ;;  %v157_v17 = vld [vmem:[%s8886_s1 + $0x378] sm:$0xff]  ;;  %v222_v20 = vld [vmem:[%s8886_s1 + $0x580] sm:$0xff] }
  0x2d   :  { %4785 = vmatpush3.bf16.msra.mxu0 %v4784_v19  ;;  %v191_v19 = vld [vmem:[%s8886_s1 + $0x488] sm:$0xff]  ;;  %v174_v23 = vld [vmem:[%s8886_s1 + $0x400] sm:$0xff]  ;;  %v4836_v24 = vpack.c.bf16 %v157_v17, %v156_v15  ;;  %v192_v30 = vld [vmem:[%s8886_s1 + $0x490] sm:$0xff] }
  0x2e   :  { %4787 = vmatprep.subr.bf16.mxu0 %v4786_v22  ;;  %v4804_v22 = vpack.c.bf16 %v125_v14, %v124_v13  ;;  %v4838_v25 = vpack.c.bf16 %v191_v19, %v190_v18  ;;  %v206_v27 = vld [vmem:[%s8886_s1 + $0x500] sm:$0xff]  ;;  %v207_v28 = vld [vmem:[%s8886_s1 + $0x508] sm:$0xff]  ;;  %v193_v31 = vld [vmem:[%s8886_s1 + $0x498] sm:$0xff] }
  0x2f   :  { %4817 = vmatpush3.bf16.msra.mxu1 %v4816_v21  ;;  %v223_v21 = vld [vmem:[%s8886_s1 + $0x588] sm:$0xff]  ;;  %v224_v33 = vld [vmem:[%s8886_s1 + $0x590] sm:$0xff]  ;;  %v4842_v38 = vpack.c.bf16 %v193_v31, %v192_v30  ;;  %v177_v40 = vld [vmem:[%s8886_s1 + $0x418] sm:$0xff] }
  0x30   :  { %4819 = vmatprep.subr.bf16.mxu1 %v4818_v26  ;;  %v175_v26 = vld [vmem:[%s8886_s1 + $0x408] sm:$0xff]  ;;  %v4870_v29 = vpack.c.bf16 %v223_v21, %v222_v20  ;;  %v33_v37 = vld [vmem:[%s8885_s0 + $0x10] sm:$0xff]  ;;  %v209_v46 = vld [vmem:[%s8886_s1 + $0x518] sm:$0xff] }
  0x31   :  { %4789 = vmatpush3.bf16.msra.mxu0 %v4788_v34  ;;  %v225_v34 = vld [vmem:[%s8886_s1 + $0x598] sm:$0xff]  ;;  %v176_v39 = vld [vmem:[%s8886_s1 + $0x410] sm:$0xff]  ;;  %v6217_v43 = vrot.slane %v33_v37, %v5908_v10  ;;  %v1038_v44 = vcombine.high %v33_v37, %v33_v37  ;;  %v194_v47 = vld [vmem:[%s8886_s1 + $0x4a0] sm:$0xff] }
  0x32   :  { %4791 = vmatprep.subr.bf16.mxu0 %v4790_v36  ;;  %v4872_v36 = vpack.c.bf16 %v207_v28, %v206_v27  ;;  %v4874_v45 = vpack.c.bf16 %v225_v34, %v224_v33  ;;  %v195_v48 = vld [vmem:[%s8886_s1 + $0x4a8] sm:$0xff]  ;;  %v4844_v53 = vpack.c.bf16 %v177_v40, %v176_v39  ;;  %v210_v57 = vld [vmem:[%s8886_s1 + $0x520] sm:$0xff]  ;;  %v196_v60 = vld [vmem:[%s8886_s1 + $0x4b0] sm:$0xff] }
  0x33   :  { %4821 = vmatpush3.bf16.msra.mxu1 %v4820_v35  ;;  %v4840_v35 = vpack.c.bf16 %v175_v26, %v174_v23  ;;  %v6238_v52 = vrot.slane %v1038_v44, %v5908_v10  ;;  %v4846_v54 = vpack.c.bf16 %v195_v48, %v194_v47  ;;  %v179_v56 = vld [vmem:[%s8886_s1 + $0x428] sm:$0xff]  ;;  %v181_v4 = vld [vmem:[%s8886_s1 + $0x438] sm:$0xff]  ;;  %v212_v5 = vld [vmem:[%s8886_s1 + $0x530] sm:$0xff] }
  0x34   :  { %4823 = vmatprep.subr.bf16.mxu1 %v4822_v42  ;;  %v208_v42 = vld [vmem:[%s8886_s1 + $0x510] sm:$0xff]  ;;  %v211_v59 = vld [vmem:[%s8886_s1 + $0x528] sm:$0xff]  ;;  %v213_v7 = vld [vmem:[%s8886_s1 + $0x538] sm:$0xff] }
  0x35   :  { %4793 = vmatpush3.bf16.msra.mxu0 %v4792_v49  ;;  %v226_v49 = vld [vmem:[%s8886_s1 + $0x5a0] sm:$0xff]  ;;  %v4880_v1 = vpack.c.bf16 %v211_v59, %v210_v57  ;;  %v4884_v14 = vpack.c.bf16 %v213_v7, %v212_v5  ;;  %v183_v17 = vld [vmem:[%s8886_s1 + $0x448] sm:$0xff]  ;;  %v200_v21 = vld [vmem:[%s8886_s1 + $0x4d0] sm:$0xff] }
  0x36   :  { %4795 = vmatprep.subr.bf16.mxu0 %v4794_v51  ;;  %v1053_v51 = vcombine.high %v6217_v43, %v6217_v43  ;;  %v198_v8 = vld [vmem:[%s8886_s1 + $0x4c0] sm:$0xff]  ;;  %v215_v20 = vld [vmem:[%s8886_s1 + $0x548] sm:$0xff]  ;;  %v232_v23 = vld [vmem:[%s8886_s1 + $0x5d0] sm:$0xff] }
  0x37   :  { %4825 = vmatpush3.bf16.msra.mxu1 %v4824_v50  ;;  %v227_v50 = vld [vmem:[%s8886_s1 + $0x5a8] sm:$0xff]  ;;  %v214_v18 = vld [vmem:[%s8886_s1 + $0x540] sm:$0xff]  ;;  %v184_v28 = vld [vmem:[%s8886_s1 + $0x450] sm:$0xff] }
  0x38   :  { %4827 = vmatprep.subr.bf16.mxu1 %v4826_v55  ;;  %v178_v55 = vld [vmem:[%s8886_s1 + $0x420] sm:$0xff]  ;;  %v4878_v58 = vpack.c.bf16 %v227_v50, %v226_v49  ;;  %v4888_v26 = vpack.c.bf16 %v215_v20, %v214_v18  ;;  %v216_v30 = vld [vmem:[%s8886_s1 + $0x550] sm:$0xff]  ;;  %v217_v33 = vld [vmem:[%s8886_s1 + $0x558] sm:$0xff] }
  0x39   :  { %4797 = vmatpush3.bf16.msra.mxu0 %v4796_v61  ;;  %v197_v61 = vld [vmem:[%s8886_s1 + $0x4b8] sm:$0xff]  ;;  %v4848_v0 = vpack.c.bf16 %v179_v56, %v178_v55  ;;  %v202_v34 = vld [vmem:[%s8886_s1 + $0x4e0] sm:$0xff]  ;;  %v235_v37 = vld [vmem:[%s8886_s1 + $0x5e8] sm:$0xff]  ;;  %v4892_v39 = vpack.c.bf16 %v217_v33, %v216_v30 }
  0x3a   :  { %4799 = vmatprep.subr.bf16.mxu0 %v4798_v63  ;;  %v229_v63 = vld [vmem:[%s8886_s1 + $0x5b8] sm:$0xff]  ;;  %v4850_v2 = vpack.c.bf16 %v197_v61, %v196_v60  ;;  %v187_v44 = vld [vmem:[%s8886_s1 + $0x468] sm:$0xff]  ;;  %v204_v48 = vld [vmem:[%s8886_s1 + $0x4f0] sm:$0xff] }
  0x3b   :  { %4829 = vmatpush3.bf16.msra.mxu1 %v4828_v62  ;;  %v228_v62 = vld [vmem:[%s8886_s1 + $0x5b0] sm:$0xff]  ;;  %v219_v47 = vld [vmem:[%s8886_s1 + $0x568] sm:$0xff]  ;;  %v205_v49 = vld [vmem:[%s8886_s1 + $0x4f8] sm:$0xff] }
  0x3c   :  { %4831 = vmatprep.subr.bf16.mxu1 %v4830_v3  ;;  %v180_v3 = vld [vmem:[%s8886_s1 + $0x430] sm:$0xff]  ;;  %v4882_v6 = vpack.c.bf16 %v229_v63, %v228_v62  ;;  %v4866_v55 = vpack.c.bf16 %v205_v49, %v204_v48  ;;  %v189_v57 = vld [vmem:[%s8886_s1 + $0x478] sm:$0xff]  ;;  %v254_v60 = vld [vmem:[%s8886_s1 + $0x680] sm:$0xff] }
  0x3d   :  { %4801 = vmatpush3.bf16.msra.mxu0 %v4800_v9  ;;  %v199_v9 = vld [vmem:[%s8886_s1 + $0x4c8] sm:$0xff]  ;;  %v4852_v13 = vpack.c.bf16 %v181_v4, %v180_v3  ;;  %v236_v50 = vld [vmem:[%s8886_s1 + $0x5f0] sm:$0xff]  ;;  %v221_v59 = vld [vmem:[%s8886_s1 + $0x578] sm:$0xff] }
  0x3e   :  { %4803 = vmatprep.subr.bf16.mxu0 %v4802_v12  ;;  %v231_v12 = vld [vmem:[%s8886_s1 + $0x5c8] sm:$0xff]  ;;  %v4854_v15 = vpack.c.bf16 %v199_v9, %v198_v8  ;;  %v188_v56 = vld [vmem:[%s8886_s1 + $0x470] sm:$0xff]  ;;  %v286_v62 = vld [vmem:[%s8886_s1 + $0x780] sm:$0xff] }
  0x3f   :  { %4833 = vmatpush3.bf16.msra.mxu1 %v4832_v11  ;;  %v230_v11 = vld [vmem:[%s8886_s1 + $0x5c0] sm:$0xff]  ;;  %v255_v61 = vld [vmem:[%s8886_s1 + $0x688] sm:$0xff]  ;;  %v256_v9 = vld [vmem:[%s8886_s1 + $0x690] sm:$0xff] }
  0x40   :  { %4835 = vmatprep.subr.bf16.mxu1 %v4834_v16  ;;  %v182_v16 = vld [vmem:[%s8886_s1 + $0x440] sm:$0xff]  ;;  %v4886_v19 = vpack.c.bf16 %v231_v12, %v230_v11  ;;  %v287_v63 = vld [vmem:[%s8886_s1 + $0x788] sm:$0xff]  ;;  %v4902_v3 = vpack.c.bf16 %v255_v61, %v254_v60  ;;  %v257_v11 = vld [vmem:[%s8886_s1 + $0x698] sm:$0xff] }
  0x41   :  { %4805 = vmatpush3.bf16.msra.mxu0 %v4804_v22  ;;  %v201_v22 = vld [vmem:[%s8886_s1 + $0x4d8] sm:$0xff]  ;;  %v238_v4 = vld [vmem:[%s8886_s1 + $0x600] sm:$0xff]  ;;  %v239_v5 = vld [vmem:[%s8886_s1 + $0x608] sm:$0xff]  ;;  %v4934_v7 = vpack.c.bf16 %v287_v63, %v286_v62  ;;  %v4906_v18 = vpack.c.bf16 %v257_v11, %v256_v9 }
  0x42   :  { %4839 = vmatprep.subr.bf16.mxu0 %v4838_v25  ;;  %v4856_v25 = vpack.c.bf16 %v183_v17, %v182_v16  ;;  %v4858_v27 = vpack.c.bf16 %v201_v22, %v200_v21  ;;  %v271_v8 = vld [vmem:[%s8886_s1 + $0x708] sm:$0xff]  ;;  %v4904_v16 = vpack.c.bf16 %v239_v5, %v238_v4  ;;  %v241_v20 = vld [vmem:[%s8886_s1 + $0x618] sm:$0xff]  ;;  %v272_v21 = vld [vmem:[%s8886_s1 + $0x710] sm:$0xff] }
  0x43   :  { %4837 = vmatpush3.bf16.msra.mxu1 %v4836_v24  ;;  %v233_v24 = vld [vmem:[%s8886_s1 + $0x5d8] sm:$0xff]  ;;  %v276_v48 = vld [vmem:[%s8886_s1 + $0x730] sm:$0xff]  ;;  %v279_v61 = vld [vmem:[%s8886_s1 + $0x748] sm:$0xff] }
  0x44   :  { %4871 = vmatprep.subr.bf16.mxu1 %v4870_v29  ;;  %1524 = vmatmul.mubr.f32.vlgmr.msra.gmra.mrb[2].mxu0 %v6075_v32  ;;  %v4876_v32 = vpack.c.bf16 %v209_v46, %v208_v42  ;;  %v185_v29 = vld [vmem:[%s8886_s1 + $0x458] sm:$0xff]  ;;  %v4890_v31 = vpack.c.bf16 %v233_v24, %v232_v23  ;;  %v186_v42 = vld [vmem:[%s8886_s1 + $0x460] sm:$0xff]  ;;  %v264_v62 = vld [vmem:[%s8886_s1 + $0x6d0] sm:$0xff] }
  0x45   :  { %4841 = vmatpush3.bf16.msra.mxu0 %v4840_v35  ;;  %1663 = vmatprep.mubr.f32.mxu0 %v1053_v51  ;;  %v203_v35 = vld [vmem:[%s8886_s1 + $0x4e8] sm:$0xff]  ;;  %v237_v51 = vld [vmem:[%s8886_s1 + $0x5f8] sm:$0xff]  ;;  %v258_v24 = vld [vmem:[%s8886_s1 + $0x6a0] sm:$0xff] }
  0x46   :  { %1594 = vmatmul.mubr.f32.vlgmr.msra.gmra.mrb[2].mxu1 %v6089_v41  ;;  %4843 = vmatprep.subr.bf16.mxu0 %v4842_v38  ;;  %v1054_v41 = vcombine.high %v6238_v52, %v6238_v52  ;;  %v4860_v38 = vpack.c.bf16 %v185_v29, %v184_v28  ;;  %v4862_v40 = vpack.c.bf16 %v203_v35, %v202_v34  ;;  %v273_v23 = vld [vmem:[%s8886_s1 + $0x718] sm:$0xff]  ;;  %v291_v28 = vld [vmem:[%s8886_s1 + $0x7a8] sm:$0xff]  ;;  %v274_v35 = vld [vmem:[%s8886_s1 + $0x720] sm:$0xff] }
  0x47   :  { %4873 = vmatpush3.bf16.msra.mxu1 %v4872_v36  ;;  %v234_v36 = vld [vmem:[%s8886_s1 + $0x5e0] sm:$0xff]  ;;  %v243_v34 = vld [vmem:[%s8886_s1 + $0x628] sm:$0xff]  ;;  %v265_v63 = vld [vmem:[%s8886_s1 + $0x6d8] sm:$0xff] }
  0x48   :  { %4875 = vmatprep.subr.bf16.mxu1 %v4874_v45  ;;  %1733 = vmatprep.mubr.f32.mxu1 %v1054_v41  ;;  %v218_v45 = vld [vmem:[%s8886_s1 + $0x560] sm:$0xff]  ;;  %v4894_v46 = vpack.c.bf16 %v235_v37, %v234_v36  ;;  %v220_v41 = vld [vmem:[%s8886_s1 + $0x570] sm:$0xff]  ;;  %v4922_v4 = vpack.c.bf16 %v265_v63, %v264_v62  ;;  %v281_v9 = vld [vmem:[%s8886_s1 + $0x758] sm:$0xff] }
  0x49   :  { %4845 = vmatpush3.bf16.msra.mxu0 %v4844_v53  ;;  %v4864_v53 = vpack.c.bf16 %v187_v44, %v186_v42  ;;  %v260_v37 = vld [vmem:[%s8886_s1 + $0x6b0] sm:$0xff]  ;;  %v266_v11 = vld [vmem:[%s8886_s1 + $0x6e0] sm:$0xff] }
  0x4a   :  { %4847 = vmatprep.subr.bf16.mxu0 %v4846_v54  ;;  %v4896_v54 = vpack.c.bf16 %v219_v47, %v218_v45  ;;  %v245_v47 = vld [vmem:[%s8886_s1 + $0x638] sm:$0xff]  ;;  %v248_v5 = vld [vmem:[%s8886_s1 + $0x650] sm:$0xff] }
  0x4b   :  { %4877 = vmatpush3.bf16.msra.mxu1 %v4876_v32  ;;  %v34_v32 = vld [vmem:[%s8885_s0 + $0x18] sm:$0xff]  ;;  %v336_v62 = vld [vmem:[%s8886_s1 + $0x910] sm:$0xff] }
  0x4c   :  { %4879 = vmatprep.subr.bf16.mxu1 %v4878_v58  ;;  %v4898_v58 = vpack.c.bf16 %v237_v51, %v236_v50  ;;  %v6409_v12 = vrot.slane %v34_v32, %v5908_v10  ;;  %v277_v50 = vld [vmem:[%s8886_s1 + $0x738] sm:$0xff]  ;;  %v262_v51 = vld [vmem:[%s8886_s1 + $0x6c0] sm:$0xff] }
  0x4d   :  { %4849 = vmatpush3.bf16.msra.mxu0 %v4848_v0  ;;  %v1055_v0 = vcombine.high %v34_v32, %v34_v32  ;;  %v294_v32 = vld [vmem:[%s8886_s1 + $0x7c0] sm:$0xff] }
  0x4e   :  { %4851 = vmatprep.subr.bf16.mxu0 %v4850_v2  ;;  %v4900_v2 = vpack.c.bf16 %v221_v59, %v220_v41  ;;  %v246_v41 = vld [vmem:[%s8886_s1 + $0x640] sm:$0xff] }
  0x4f   :  { %4881 = vmatpush3.bf16.msra.mxu1 %v4880_v1  ;;  %v4868_v1 = vpack.c.bf16 %v189_v57, %v188_v56  ;;  %v4948_v56 = vpack.c.bf16 %v277_v50, %v276_v48  ;;  %v278_v59 = vld [vmem:[%s8886_s1 + $0x740] sm:$0xff]  ;;  %v303_v48 = vld [vmem:[%s8886_s1 + $0x808] sm:$0xff] }
  0x50   :  { %4883 = vmatprep.subr.bf16.mxu1 %v4882_v6  ;;  %v270_v6 = vld [vmem:[%s8886_s1 + $0x700] sm:$0xff] }
  0x51   :  { %4853 = vmatpush3.bf16.msra.mxu0 %v4852_v13  ;;  %v288_v13 = vld [vmem:[%s8886_s1 + $0x790] sm:$0xff]  ;;  %v4936_v17 = vpack.c.bf16 %v271_v8, %v270_v6  ;;  %v249_v6 = vld [vmem:[%s8886_s1 + $0x658] sm:$0xff] }
  0x52   :  { %4855 = vmatprep.subr.bf16.mxu0 %v4854_v15  ;;  %v6418_v15 = vrot.slane %v1055_v0, %v5908_v10  ;;  %v296_v0 = vld [vmem:[%s8886_s1 + $0x7d0] sm:$0xff] }
  0x53   :  { %4885 = vmatpush3.bf16.msra.mxu1 %v4884_v14  ;;  %v289_v14 = vld [vmem:[%s8886_s1 + $0x798] sm:$0xff] }
  0x54   :  { %4887 = vmatprep.subr.bf16.mxu1 %v4886_v19  ;;  %v240_v19 = vld [vmem:[%s8886_s1 + $0x610] sm:$0xff]  ;;  %v4938_v22 = vpack.c.bf16 %v289_v14, %v288_v13  ;;  %v1071_v29 = vcombine.high %v6418_v15, %v6418_v15  ;;  %v267_v13 = vld [vmem:[%s8886_s1 + $0x6e8] sm:$0xff]  ;;  %v298_v14 = vld [vmem:[%s8886_s1 + $0x7e0] sm:$0xff] }
  0x55   :  { %4857 = vmatpush3.bf16.msra.mxu0 %v4856_v25  ;;  %v259_v25 = vld [vmem:[%s8886_s1 + $0x6a8] sm:$0xff]  ;;  %v4908_v30 = vpack.c.bf16 %v241_v20, %v240_v19  ;;  %v4926_v19 = vpack.c.bf16 %v267_v13, %v266_v11  ;;  %v250_v20 = vld [vmem:[%s8886_s1 + $0x660] sm:$0xff] }
  0x56   :  { %4859 = vmatprep.subr.bf16.mxu0 %v4858_v27  ;;  %v290_v27 = vld [vmem:[%s8886_s1 + $0x7a0] sm:$0xff]  ;;  %v4910_v33 = vpack.c.bf16 %v259_v25, %v258_v24  ;;  %v283_v24 = vld [vmem:[%s8886_s1 + $0x768] sm:$0xff]  ;;  %v268_v25 = vld [vmem:[%s8886_s1 + $0x6f0] sm:$0xff] }
  0x57   :  { %4889 = vmatpush3.bf16.msra.mxu1 %v4888_v26  ;;  %v1070_v26 = vcombine.high %v6409_v12, %v6409_v12  ;;  %v4942_v36 = vpack.c.bf16 %v291_v28, %v290_v27  ;;  %v300_v27 = vld [vmem:[%s8886_s1 + $0x7f0] sm:$0xff]  ;;  %v301_v28 = vld [vmem:[%s8886_s1 + $0x7f8] sm:$0xff]  ;;  %v307_v11 = vld [vmem:[%s8886_s1 + $0x828] sm:$0xff] }
  0x58   :  { %4891 = vmatprep.subr.bf16.mxu1 %v4890_v31  ;;  %v4940_v31 = vpack.c.bf16 %v273_v23, %v272_v21  ;;  %v251_v21 = vld [vmem:[%s8886_s1 + $0x668] sm:$0xff]  ;;  %v338_v13 = vld [vmem:[%s8886_s1 + $0x920] sm:$0xff] }
  0x59   :  { %4861 = vmatpush3.bf16.msra.mxu0 %v4860_v38  ;;  %v261_v38 = vld [vmem:[%s8886_s1 + $0x6b8] sm:$0xff] }
  0x5a   :  { %4863 = vmatprep.subr.bf16.mxu0 %v4862_v40  ;;  %v293_v40 = vld [vmem:[%s8886_s1 + $0x7b8] sm:$0xff]  ;;  %v4914_v45 = vpack.c.bf16 %v261_v38, %v260_v37  ;;  %v318_v37 = vld [vmem:[%s8886_s1 + $0x880] sm:$0xff]  ;;  %v319_v38 = vld [vmem:[%s8886_s1 + $0x888] sm:$0xff] }
  0x5b   :  { %4893 = vmatpush3.bf16.msra.mxu1 %v4892_v39  ;;  %v292_v39 = vld [vmem:[%s8886_s1 + $0x7b0] sm:$0xff] }
  0x5c   :  { %4895 = vmatprep.subr.bf16.mxu1 %v4894_v46  ;;  %v244_v46 = vld [vmem:[%s8886_s1 + $0x630] sm:$0xff]  ;;  %v4946_v49 = vpack.c.bf16 %v293_v40, %v292_v39  ;;  %v350_v39 = vld [vmem:[%s8886_s1 + $0x980] sm:$0xff]  ;;  %v351_v40 = vld [vmem:[%s8886_s1 + $0x988] sm:$0xff] }
  0x5d   :  { %4865 = vmatpush3.bf16.msra.mxu0 %v4864_v53  ;;  %v263_v53 = vld [vmem:[%s8886_s1 + $0x6c8] sm:$0xff]  ;;  %v4998_v50 = vpack.c.bf16 %v351_v40, %v350_v39  ;;  %v328_v39 = vld [vmem:[%s8886_s1 + $0x8d0] sm:$0xff]  ;;  %v329_v40 = vld [vmem:[%s8886_s1 + $0x8d8] sm:$0xff] }
  0x5e   :  { %4867 = vmatprep.subr.bf16.mxu0 %v4866_v55  ;;  %v4916_v55 = vpack.c.bf16 %v245_v47, %v244_v46  ;;  %v4918_v57 = vpack.c.bf16 %v263_v53, %v262_v51  ;;  %v4966_v46 = vpack.c.bf16 %v319_v38, %v318_v37  ;;  %v302_v47 = vld [vmem:[%s8886_s1 + $0x800] sm:$0xff]  ;;  %v335_v51 = vld [vmem:[%s8886_s1 + $0x908] sm:$0xff]  ;;  %v320_v53 = vld [vmem:[%s8886_s1 + $0x890] sm:$0xff] }
  0x5f   :  { %4897 = vmatpush3.bf16.msra.mxu1 %v4896_v54  ;;  %v295_v54 = vld [vmem:[%s8886_s1 + $0x7c8] sm:$0xff] }
  0x60   :  { %4899 = vmatprep.subr.bf16.mxu1 %v4898_v58  ;;  %v247_v58 = vld [vmem:[%s8886_s1 + $0x648] sm:$0xff]  ;;  %v4950_v60 = vpack.c.bf16 %v295_v54, %v294_v32  ;;  %v321_v32 = vld [vmem:[%s8886_s1 + $0x898] sm:$0xff] }
  0x61   :  { %4869 = vmatpush3.bf16.msra.mxu0 %v4868_v1  ;;  %v297_v1 = vld [vmem:[%s8886_s1 + $0x7d8] sm:$0xff]  ;;  %v343_v38 = vld [vmem:[%s8886_s1 + $0x948] sm:$0xff] }
  0x62   :  { %4903 = vmatprep.subr.bf16.mxu0 %v4902_v3  ;;  %v4952_v3 = vpack.c.bf16 %v279_v61, %v278_v59  ;;  %v4954_v8 = vpack.c.bf16 %v297_v1, %v296_v0  ;;  %v4970_v59 = vpack.c.bf16 %v321_v32, %v320_v53  ;;  %v305_v61 = vld [vmem:[%s8886_s1 + $0x818] sm:$0xff]  ;;  %v322_v1 = vld [vmem:[%s8886_s1 + $0x8a0] sm:$0xff] }
  0x63   :  { %4901 = vmatpush3.bf16.msra.mxu1 %v4900_v2  ;;  %v4920_v2 = vpack.c.bf16 %v247_v58, %v246_v41  ;;  %v4968_v41 = vpack.c.bf16 %v303_v48, %v302_v47  ;;  %v337_v0 = vld [vmem:[%s8886_s1 + $0x918] sm:$0xff]  ;;  %v4986_v47 = vpack.c.bf16 %v329_v40, %v328_v39  ;;  %v312_v48 = vld [vmem:[%s8886_s1 + $0x850] sm:$0xff]  ;;  %v330_v32 = vld [vmem:[%s8886_s1 + $0x8e0] sm:$0xff] }
  0x64   :  { %4935 = vmatprep.subr.bf16.mxu1 %v4934_v7  ;;  %1664 = vmatmul.mubr.f32.vlgmr.msra.gmra.mrb[4].mxu0 %v6217_v43  ;;  %v242_v43 = vld [vmem:[%s8886_s1 + $0x620] sm:$0xff]  ;;  %v280_v7 = vld [vmem:[%s8886_s1 + $0x750] sm:$0xff]  ;;  %v345_v53 = vld [vmem:[%s8886_s1 + $0x958] sm:$0xff] }
  0x65   :  { %4905 = vmatpush3.bf16.msra.mxu0 %v4904_v16  ;;  %1803 = vmatprep.mubr.f32.mxu0 %v1070_v26  ;;  %v4912_v42 = vpack.c.bf16 %v243_v34, %v242_v43  ;;  %v299_v16 = vld [vmem:[%s8886_s1 + $0x7e8] sm:$0xff]  ;;  %v269_v26 = vld [vmem:[%s8886_s1 + $0x6f8] sm:$0xff]  ;;  %v252_v43 = vld [vmem:[%s8886_s1 + $0x670] sm:$0xff] }
  0x66   :  { %1734 = vmatmul.mubr.f32.vlgmr.msra.gmra.mrb[4].mxu1 %v6238_v52  ;;  %4907 = vmatprep.subr.bf16.mxu0 %v4906_v18  ;;  %v275_v52 = vld [vmem:[%s8886_s1 + $0x728] sm:$0xff]  ;;  %v4956_v18 = vpack.c.bf16 %v281_v9, %v280_v7  ;;  %v4958_v23 = vpack.c.bf16 %v299_v16, %v298_v14  ;;  %v253_v34 = vld [vmem:[%s8886_s1 + $0x678] sm:$0xff]  ;;  %v324_v16 = vld [vmem:[%s8886_s1 + $0x8b0] sm:$0xff] }
  0x67   :  { %4937 = vmatpush3.bf16.msra.mxu1 %v4936_v17  ;;  %1873 = vmatprep.mubr.f32.mxu1 %v1071_v29  ;;  %v4944_v44 = vpack.c.bf16 %v275_v52, %v274_v35  ;;  %v4924_v17 = vpack.c.bf16 %v249_v6, %v248_v5  ;;  %v4928_v29 = vpack.c.bf16 %v251_v21, %v250_v20  ;;  %v284_v35 = vld [vmem:[%s8886_s1 + $0x770] sm:$0xff]  ;;  %v285_v52 = vld [vmem:[%s8886_s1 + $0x778] sm:$0xff]  ;;  %v355_v5 = vld [vmem:[%s8886_s1 + $0x9a8] sm:$0xff] }
  0x68   :  { %4939 = vmatprep.subr.bf16.mxu1 %v4938_v22  ;;  %v282_v22 = vld [vmem:[%s8886_s1 + $0x760] sm:$0xff]  ;;  %v400_v39 = vld [vmem:[%s8886_s1 + $0xb10] sm:$0xff] }
  0x69   :  { %4909 = vmatpush3.bf16.msra.mxu0 %v4908_v30  ;;  %v35_v30 = vld [vmem:[%s8885_s0 + $0x20] sm:$0xff] }
  0x6a   :  { %4911 = vmatprep.subr.bf16.mxu0 %v4910_v33  ;;  %v4930_v33 = vpack.c.bf16 %v269_v26, %v268_v25  ;;  %v6616_v54 = vrot.slane %v35_v30, %v5908_v10  ;;  %v340_v25 = vld [vmem:[%s8886_s1 + $0x930] sm:$0xff] }
  0x6b   :  { %4941 = vmatpush3.bf16.msra.mxu1 %v4940_v31  ;;  %v4960_v31 = vpack.c.bf16 %v283_v24, %v282_v22  ;;  %v309_v24 = vld [vmem:[%s8886_s1 + $0x838] sm:$0xff] }
  0x6c   :  { %4943 = vmatprep.subr.bf16.mxu1 %v4942_v36  ;;  %v4962_v36 = vpack.c.bf16 %v301_v28, %v300_v27  ;;  %v341_v27 = vld [vmem:[%s8886_s1 + $0x938] sm:$0xff]  ;;  %v326_v28 = vld [vmem:[%s8886_s1 + $0x8c0] sm:$0xff] }
  0x6d   :  { %4913 = vmatpush3.bf16.msra.mxu0 %v4912_v42  ;;  %v1072_v42 = vcombine.high %v35_v30, %v35_v30  ;;  %v358_v30 = vld [vmem:[%s8886_s1 + $0x9c0] sm:$0xff] }
  0x6e   :  { %4915 = vmatprep.subr.bf16.mxu0 %v4914_v45  ;;  %v4964_v45 = vpack.c.bf16 %v285_v52, %v284_v35  ;;  %v310_v35 = vld [vmem:[%s8886_s1 + $0x840] sm:$0xff] }
  0x6f   :  { %4945 = vmatpush3.bf16.msra.mxu1 %v4944_v44  ;;  %v4932_v44 = vpack.c.bf16 %v253_v34, %v252_v43  ;;  %v5012_v43 = vpack.c.bf16 %v341_v27, %v340_v25  ;;  %v342_v52 = vld [vmem:[%s8886_s1 + $0x940] sm:$0xff]  ;;  %v367_v25 = vld [vmem:[%s8886_s1 + $0xa08] sm:$0xff] }
  0x70   :  { %4947 = vmatprep.subr.bf16.mxu1 %v4946_v49  ;;  %v334_v49 = vld [vmem:[%s8886_s1 + $0x900] sm:$0xff] }
  0x71   :  { %4917 = vmatpush3.bf16.msra.mxu0 %v4916_v55  ;;  %v352_v55 = vld [vmem:[%s8886_s1 + $0x990] sm:$0xff]  ;;  %v5000_v58 = vpack.c.bf16 %v335_v51, %v334_v49  ;;  %v313_v49 = vld [vmem:[%s8886_s1 + $0x858] sm:$0xff] }
  0x72   :  { %4919 = vmatprep.subr.bf16.mxu0 %v4918_v57  ;;  %v6625_v57 = vrot.slane %v1072_v42, %v5908_v10  ;;  %v360_v42 = vld [vmem:[%s8886_s1 + $0x9d0] sm:$0xff] }
  0x73   :  { %4949 = vmatpush3.bf16.msra.mxu1 %v4948_v56  ;;  %v353_v56 = vld [vmem:[%s8886_s1 + $0x998] sm:$0xff] }
  0x74   :  { %4951 = vmatprep.subr.bf16.mxu1 %v4950_v60  ;;  %v304_v60 = vld [vmem:[%s8886_s1 + $0x810] sm:$0xff]  ;;  %v5002_v63 = vpack.c.bf16 %v353_v56, %v352_v55  ;;  %v1088_v6 = vcombine.high %v6625_v57, %v6625_v57  ;;  %v331_v55 = vld [vmem:[%s8886_s1 + $0x8e8] sm:$0xff]  ;;  %v362_v56 = vld [vmem:[%s8886_s1 + $0x9e0] sm:$0xff] }
  0x75   :  { %4921 = vmatpush3.bf16.msra.mxu0 %v4920_v2  ;;  %v323_v2 = vld [vmem:[%s8886_s1 + $0x8a8] sm:$0xff]  ;;  %v4972_v7 = vpack.c.bf16 %v305_v61, %v304_v60  ;;  %v4990_v60 = vpack.c.bf16 %v331_v55, %v330_v32  ;;  %v314_v61 = vld [vmem:[%s8886_s1 + $0x860] sm:$0xff] }
  0x76   :  { %4923 = vmatprep.subr.bf16.mxu0 %v4922_v4  ;;  %v354_v4 = vld [vmem:[%s8886_s1 + $0x9a0] sm:$0xff]  ;;  %v4974_v9 = vpack.c.bf16 %v323_v2, %v322_v1  ;;  %v347_v1 = vld [vmem:[%s8886_s1 + $0x968] sm:$0xff]  ;;  %v332_v2 = vld [vmem:[%s8886_s1 + $0x8f0] sm:$0xff] }
  0x77   :  { %4953 = vmatpush3.bf16.msra.mxu1 %v4952_v3  ;;  %v1087_v3 = vcombine.high %v6616_v54, %v6616_v54  ;;  %v5006_v14 = vpack.c.bf16 %v355_v5, %v354_v4  ;;  %v364_v4 = vld [vmem:[%s8886_s1 + $0x9f0] sm:$0xff]  ;;  %v365_v5 = vld [vmem:[%s8886_s1 + $0x9f8] sm:$0xff]  ;;  %v371_v32 = vld [vmem:[%s8886_s1 + $0xa28] sm:$0xff] }
  0x78   :  { %4955 = vmatprep.subr.bf16.mxu1 %v4954_v8  ;;  %v5004_v8 = vpack.c.bf16 %v337_v0, %v336_v62  ;;  %v315_v62 = vld [vmem:[%s8886_s1 + $0x868] sm:$0xff]  ;;  %v402_v55 = vld [vmem:[%s8886_s1 + $0xb20] sm:$0xff] }
  0x79   :  { %4925 = vmatpush3.bf16.msra.mxu0 %v4924_v17  ;;  %v325_v17 = vld [vmem:[%s8886_s1 + $0x8b8] sm:$0xff] }
  0x7a   :  { %4927 = vmatprep.subr.bf16.mxu0 %v4926_v19  ;;  %v357_v19 = vld [vmem:[%s8886_s1 + $0x9b8] sm:$0xff]  ;;  %v4978_v22 = vpack.c.bf16 %v325_v17, %v324_v16  ;;  %v382_v16 = vld [vmem:[%s8886_s1 + $0xa80] sm:$0xff]  ;;  %v383_v17 = vld [vmem:[%s8886_s1 + $0xa88] sm:$0xff] }
  0x7b   :  { %4957 = vmatpush3.bf16.msra.mxu1 %v4956_v18  ;;  %v356_v18 = vld [vmem:[%s8886_s1 + $0x9b0] sm:$0xff] }
  0x7c   :  { %4959 = vmatprep.subr.bf16.mxu1 %v4958_v23  ;;  %v308_v23 = vld [vmem:[%s8886_s1 + $0x830] sm:$0xff]  ;;  %v5010_v26 = vpack.c.bf16 %v357_v19, %v356_v18  ;;  %v414_v18 = vld [vmem:[%s8886_s1 + $0xb80] sm:$0xff]  ;;  %v415_v19 = vld [vmem:[%s8886_s1 + $0xb88] sm:$0xff] }
  0x7d   :  { %4929 = vmatpush3.bf16.msra.mxu0 %v4928_v29  ;;  %v327_v29 = vld [vmem:[%s8886_s1 + $0x8c8] sm:$0xff]  ;;  %v5062_v27 = vpack.c.bf16 %v415_v19, %v414_v18  ;;  %v392_v18 = vld [vmem:[%s8886_s1 + $0xad0] sm:$0xff]  ;;  %v393_v19 = vld [vmem:[%s8886_s1 + $0xad8] sm:$0xff] }
  0x7e   :  { %4931 = vmatprep.subr.bf16.mxu0 %v4930_v33  ;;  %v4980_v33 = vpack.c.bf16 %v309_v24, %v308_v23  ;;  %v4982_v34 = vpack.c.bf16 %v327_v29, %v326_v28  ;;  %v5030_v23 = vpack.c.bf16 %v383_v17, %v382_v16  ;;  %v366_v24 = vld [vmem:[%s8886_s1 + $0xa00] sm:$0xff]  ;;  %v399_v28 = vld [vmem:[%s8886_s1 + $0xb08] sm:$0xff]  ;;  %v384_v29 = vld [vmem:[%s8886_s1 + $0xa90] sm:$0xff] }
  0x7f   :  { %4961 = vmatpush3.bf16.msra.mxu1 %v4960_v31  ;;  %v359_v31 = vld [vmem:[%s8886_s1 + $0x9c8] sm:$0xff] }
  0x80   :  { %4963 = vmatprep.subr.bf16.mxu1 %v4962_v36  ;;  %v311_v36 = vld [vmem:[%s8886_s1 + $0x848] sm:$0xff]  ;;  %v5014_v37 = vpack.c.bf16 %v359_v31, %v358_v30  ;;  %v385_v30 = vld [vmem:[%s8886_s1 + $0xa98] sm:$0xff] }
  0x81   :  { %4933 = vmatpush3.bf16.msra.mxu0 %v4932_v44  ;;  %v361_v44 = vld [vmem:[%s8886_s1 + $0x9d8] sm:$0xff]  ;;  %v407_v17 = vld [vmem:[%s8886_s1 + $0xb48] sm:$0xff] }
  0x82   :  { %4967 = vmatprep.subr.bf16.mxu0 %v4966_v46  ;;  %v5016_v46 = vpack.c.bf16 %v343_v38, %v342_v52  ;;  %v5018_v51 = vpack.c.bf16 %v361_v44, %v360_v42  ;;  %v5034_v52 = vpack.c.bf16 %v385_v30, %v384_v29  ;;  %v369_v38 = vld [vmem:[%s8886_s1 + $0xa18] sm:$0xff]  ;;  %v386_v44 = vld [vmem:[%s8886_s1 + $0xaa0] sm:$0xff] }
  0x83   :  { %4965 = vmatpush3.bf16.msra.mxu1 %v4964_v45  ;;  %v4984_v45 = vpack.c.bf16 %v311_v36, %v310_v35  ;;  %v5032_v35 = vpack.c.bf16 %v367_v25, %v366_v24  ;;  %v401_v42 = vld [vmem:[%s8886_s1 + $0xb18] sm:$0xff]  ;;  %v5050_v24 = vpack.c.bf16 %v393_v19, %v392_v18  ;;  %v376_v25 = vld [vmem:[%s8886_s1 + $0xa50] sm:$0xff]  ;;  %v394_v30 = vld [vmem:[%s8886_s1 + $0xae0] sm:$0xff] }
  0x84   :  { %4999 = vmatprep.subr.bf16.mxu1 %v4998_v50  ;;  %1804 = vmatmul.mubr.f32.vlgmr.msra.gmra.mrb[6].mxu0 %v6409_v12  ;;  %v306_v12 = vld [vmem:[%s8886_s1 + $0x820] sm:$0xff]  ;;  %v344_v50 = vld [vmem:[%s8886_s1 + $0x950] sm:$0xff]  ;;  %v409_v29 = vld [vmem:[%s8886_s1 + $0xb58] sm:$0xff] }
  0x85   :  { %4969 = vmatpush3.bf16.msra.mxu0 %v4968_v41  ;;  %1943 = vmatprep.mubr.f32.mxu0 %v1087_v3  ;;  %v4976_v20 = vpack.c.bf16 %v307_v11, %v306_v12  ;;  %v363_v41 = vld [vmem:[%s8886_s1 + $0x9e8] sm:$0xff]  ;;  %v333_v3 = vld [vmem:[%s8886_s1 + $0x8f8] sm:$0xff]  ;;  %v316_v12 = vld [vmem:[%s8886_s1 + $0x870] sm:$0xff] }
  0x86   :  { %1874 = vmatmul.mubr.f32.vlgmr.msra.gmra.mrb[6].mxu1 %v6418_v15  ;;  %4971 = vmatprep.subr.bf16.mxu0 %v4970_v59  ;;  %v339_v15 = vld [vmem:[%s8886_s1 + $0x928] sm:$0xff]  ;;  %v5020_v59 = vpack.c.bf16 %v345_v53, %v344_v50  ;;  %v5022_v0 = vpack.c.bf16 %v363_v41, %v362_v56  ;;  %v317_v11 = vld [vmem:[%s8886_s1 + $0x878] sm:$0xff]  ;;  %v388_v41 = vld [vmem:[%s8886_s1 + $0xab0] sm:$0xff] }
  0x87   :  { %5001 = vmatpush3.bf16.msra.mxu1 %v5000_v58  ;;  %2013 = vmatprep.mubr.f32.mxu1 %v1088_v6  ;;  %v5008_v21 = vpack.c.bf16 %v339_v15, %v338_v13  ;;  %v4988_v58 = vpack.c.bf16 %v313_v49, %v312_v48  ;;  %v4992_v6 = vpack.c.bf16 %v315_v62, %v314_v61  ;;  %v348_v13 = vld [vmem:[%s8886_s1 + $0x970] sm:$0xff]  ;;  %v349_v15 = vld [vmem:[%s8886_s1 + $0x978] sm:$0xff]  ;;  %v419_v48 = vld [vmem:[%s8886_s1 + $0xba8] sm:$0xff] }
  0x88   :  { %5003 = vmatprep.subr.bf16.mxu1 %v5002_v63  ;;  %v346_v63 = vld [vmem:[%s8886_s1 + $0x960] sm:$0xff]  ;;  %v464_v18 = vld [vmem:[%s8886_s1 + $0xd10] sm:$0xff] }
  0x89   :  { %4973 = vmatpush3.bf16.msra.mxu0 %v4972_v7  ;;  %v36_v7 = vld [vmem:[%s8885_s0 + $0x28] sm:$0xff] }
  0x8a   :  { %4975 = vmatprep.subr.bf16.mxu0 %v4974_v9  ;;  %v4994_v9 = vpack.c.bf16 %v333_v3, %v332_v2  ;;  %v6823_v31 = vrot.slane %v36_v7, %v5908_v10  ;;  %v404_v2 = vld [vmem:[%s8886_s1 + $0xb30] sm:$0xff] }
  0x8b   :  { %5005 = vmatpush3.bf16.msra.mxu1 %v5004_v8  ;;  %v5024_v8 = vpack.c.bf16 %v347_v1, %v346_v63  ;;  %v373_v1 = vld [vmem:[%s8886_s1 + $0xa38] sm:$0xff] }
  0x8c   :  { %5007 = vmatprep.subr.bf16.mxu1 %v5006_v14  ;;  %v5026_v14 = vpack.c.bf16 %v365_v5, %v364_v4  ;;  %v405_v4 = vld [vmem:[%s8886_s1 + $0xb38] sm:$0xff]  ;;  %v390_v5 = vld [vmem:[%s8886_s1 + $0xac0] sm:$0xff] }
  0x8d   :  { %4977 = vmatpush3.bf16.msra.mxu0 %v4976_v20  ;;  %v1089_v20 = vcombine.high %v36_v7, %v36_v7  ;;  %v422_v7 = vld [vmem:[%s8886_s1 + $0xbc0] sm:$0xff] }
  0x8e   :  { %4979 = vmatprep.subr.bf16.mxu0 %v4978_v22  ;;  %v5028_v22 = vpack.c.bf16 %v349_v15, %v348_v13  ;;  %v374_v13 = vld [vmem:[%s8886_s1 + $0xa40] sm:$0xff] }
  0x8f   :  { %5009 = vmatpush3.bf16.msra.mxu1 %v5008_v21  ;;  %v4996_v21 = vpack.c.bf16 %v317_v11, %v316_v12  ;;  %v5076_v12 = vpack.c.bf16 %v405_v4, %v404_v2  ;;  %v406_v15 = vld [vmem:[%s8886_s1 + $0xb40] sm:$0xff]  ;;  %v431_v2 = vld [vmem:[%s8886_s1 + $0xc08] sm:$0xff] }
  0x90   :  { %5011 = vmatprep.subr.bf16.mxu1 %v5010_v26  ;;  %v398_v26 = vld [vmem:[%s8886_s1 + $0xb00] sm:$0xff] }
  0x91   :  { %4981 = vmatpush3.bf16.msra.mxu0 %v4980_v33  ;;  %v416_v33 = vld [vmem:[%s8886_s1 + $0xb90] sm:$0xff]  ;;  %v5064_v36 = vpack.c.bf16 %v399_v28, %v398_v26  ;;  %v377_v26 = vld [vmem:[%s8886_s1 + $0xa58] sm:$0xff] }
  0x92   :  { %4983 = vmatprep.subr.bf16.mxu0 %v4982_v34  ;;  %v6832_v34 = vrot.slane %v1089_v20, %v5908_v10  ;;  %v424_v20 = vld [vmem:[%s8886_s1 + $0xbd0] sm:$0xff] }
  0x93   :  { %5013 = vmatpush3.bf16.msra.mxu1 %v5012_v43  ;;  %v417_v43 = vld [vmem:[%s8886_s1 + $0xb98] sm:$0xff] }
  0x94   :  { %5015 = vmatprep.subr.bf16.mxu1 %v5014_v37  ;;  %v368_v37 = vld [vmem:[%s8886_s1 + $0xa10] sm:$0xff]  ;;  %v5066_v40 = vpack.c.bf16 %v417_v43, %v416_v33  ;;  %v1105_v49 = vcombine.high %v6832_v34, %v6832_v34  ;;  %v395_v33 = vld [vmem:[%s8886_s1 + $0xae8] sm:$0xff]  ;;  %v426_v43 = vld [vmem:[%s8886_s1 + $0xbe0] sm:$0xff] }
  0x95   :  { %4985 = vmatpush3.bf16.msra.mxu0 %v4984_v45  ;;  %v387_v45 = vld [vmem:[%s8886_s1 + $0xaa8] sm:$0xff]  ;;  %v5036_v50 = vpack.c.bf16 %v369_v38, %v368_v37  ;;  %v5054_v37 = vpack.c.bf16 %v395_v33, %v394_v30  ;;  %v378_v38 = vld [vmem:[%s8886_s1 + $0xa60] sm:$0xff] }
  0x96   :  { %4987 = vmatprep.subr.bf16.mxu0 %v4986_v47  ;;  %v418_v47 = vld [vmem:[%s8886_s1 + $0xba0] sm:$0xff]  ;;  %v5038_v53 = vpack.c.bf16 %v387_v45, %v386_v44  ;;  %v411_v44 = vld [vmem:[%s8886_s1 + $0xb68] sm:$0xff]  ;;  %v396_v45 = vld [vmem:[%s8886_s1 + $0xaf0] sm:$0xff] }
  0x97   :  { %5017 = vmatpush3.bf16.msra.mxu1 %v5016_v46  ;;  %v1104_v46 = vcombine.high %v6823_v31, %v6823_v31  ;;  %v5070_v56 = vpack.c.bf16 %v419_v48, %v418_v47  ;;  %v428_v47 = vld [vmem:[%s8886_s1 + $0xbf0] sm:$0xff]  ;;  %v429_v48 = vld [vmem:[%s8886_s1 + $0xbf8] sm:$0xff]  ;;  %v435_v30 = vld [vmem:[%s8886_s1 + $0xc28] sm:$0xff] }
  0x98   :  { %5019 = vmatprep.subr.bf16.mxu1 %v5018_v51  ;;  %v5068_v51 = vpack.c.bf16 %v401_v42, %v400_v39  ;;  %v379_v39 = vld [vmem:[%s8886_s1 + $0xa68] sm:$0xff]  ;;  %v466_v33 = vld [vmem:[%s8886_s1 + $0xd20] sm:$0xff] }
  0x99   :  { %4989 = vmatpush3.bf16.msra.mxu0 %v4988_v58  ;;  %v389_v58 = vld [vmem:[%s8886_s1 + $0xab8] sm:$0xff] }
  0x9a   :  { %4991 = vmatprep.subr.bf16.mxu0 %v4990_v60  ;;  %v421_v60 = vld [vmem:[%s8886_s1 + $0xbb8] sm:$0xff]  ;;  %v5042_v63 = vpack.c.bf16 %v389_v58, %v388_v41  ;;  %v446_v41 = vld [vmem:[%s8886_s1 + $0xc80] sm:$0xff]  ;;  %v447_v58 = vld [vmem:[%s8886_s1 + $0xc88] sm:$0xff] }
  0x9b   :  { %5021 = vmatpush3.bf16.msra.mxu1 %v5020_v59  ;;  %v420_v59 = vld [vmem:[%s8886_s1 + $0xbb0] sm:$0xff] }
  0x9c   :  { %5023 = vmatprep.subr.bf16.mxu1 %v5022_v0  ;;  %v372_v0 = vld [vmem:[%s8886_s1 + $0xa30] sm:$0xff]  ;;  %v5074_v3 = vpack.c.bf16 %v421_v60, %v420_v59  ;;  %v478_v59 = vld [vmem:[%s8886_s1 + $0xd80] sm:$0xff]  ;;  %v479_v60 = vld [vmem:[%s8886_s1 + $0xd88] sm:$0xff] }
  0x9d   :  { %4993 = vmatpush3.bf16.msra.mxu0 %v4992_v6  ;;  %v391_v6 = vld [vmem:[%s8886_s1 + $0xac8] sm:$0xff]  ;;  %v5126_v4 = vpack.c.bf16 %v479_v60, %v478_v59  ;;  %v456_v59 = vld [vmem:[%s8886_s1 + $0xcd0] sm:$0xff]  ;;  %v457_v60 = vld [vmem:[%s8886_s1 + $0xcd8] sm:$0xff] }
  0x9e   :  { %4995 = vmatprep.subr.bf16.mxu0 %v4994_v9  ;;  %v5044_v9 = vpack.c.bf16 %v373_v1, %v372_v0  ;;  %v5046_v11 = vpack.c.bf16 %v391_v6, %v390_v5  ;;  %v5094_v0 = vpack.c.bf16 %v447_v58, %v446_v41  ;;  %v430_v1 = vld [vmem:[%s8886_s1 + $0xc00] sm:$0xff]  ;;  %v463_v5 = vld [vmem:[%s8886_s1 + $0xd08] sm:$0xff]  ;;  %v448_v6 = vld [vmem:[%s8886_s1 + $0xc90] sm:$0xff] }
  0x9f   :  { %5025 = vmatpush3.bf16.msra.mxu1 %v5024_v8  ;;  %v423_v8 = vld [vmem:[%s8886_s1 + $0xbc8] sm:$0xff] }
  0xa0   :  { %5027 = vmatprep.subr.bf16.mxu1 %v5026_v14  ;;  %v375_v14 = vld [vmem:[%s8886_s1 + $0xa48] sm:$0xff]  ;;  %v5078_v16 = vpack.c.bf16 %v423_v8, %v422_v7  ;;  %v449_v7 = vld [vmem:[%s8886_s1 + $0xc98] sm:$0xff] }
  0xa1   :  { %4997 = vmatpush3.bf16.msra.mxu0 %v4996_v21  ;;  %v425_v21 = vld [vmem:[%s8886_s1 + $0xbd8] sm:$0xff]  ;;  %v471_v58 = vld [vmem:[%s8886_s1 + $0xd48] sm:$0xff] }
  0xa2   :  { %5031 = vmatprep.subr.bf16.mxu0 %v5030_v23  ;;  %v5080_v23 = vpack.c.bf16 %v407_v17, %v406_v15  ;;  %v5082_v28 = vpack.c.bf16 %v425_v21, %v424_v20  ;;  %v5098_v15 = vpack.c.bf16 %v449_v7, %v448_v6  ;;  %v433_v17 = vld [vmem:[%s8886_s1 + $0xc18] sm:$0xff]  ;;  %v450_v21 = vld [vmem:[%s8886_s1 + $0xca0] sm:$0xff] }
  0xa3   :  { %5029 = vmatpush3.bf16.msra.mxu1 %v5028_v22  ;;  %v5048_v22 = vpack.c.bf16 %v375_v14, %v374_v13  ;;  %v5096_v13 = vpack.c.bf16 %v431_v2, %v430_v1  ;;  %v465_v20 = vld [vmem:[%s8886_s1 + $0xd18] sm:$0xff]  ;;  %v5114_v1 = vpack.c.bf16 %v457_v60, %v456_v59  ;;  %v440_v2 = vld [vmem:[%s8886_s1 + $0xc50] sm:$0xff]  ;;  %v458_v7 = vld [vmem:[%s8886_s1 + $0xce0] sm:$0xff] }
  0xa4   :  { %5063 = vmatprep.subr.bf16.mxu1 %v5062_v27  ;;  %1944 = vmatmul.mubr.f32.vlgmr.msra.gmra.mrb[8].mxu0 %v6616_v54  ;;  %v370_v54 = vld [vmem:[%s8886_s1 + $0xa20] sm:$0xff]  ;;  %v408_v27 = vld [vmem:[%s8886_s1 + $0xb50] sm:$0xff]  ;;  %v473_v6 = vld [vmem:[%s8886_s1 + $0xd58] sm:$0xff] }
  0xa5   :  { %5033 = vmatpush3.bf16.msra.mxu0 %v5032_v35  ;;  %2083 = vmatprep.mubr.f32.mxu0 %v1104_v46  ;;  %v5040_v61 = vpack.c.bf16 %v371_v32, %v370_v54  ;;  %v427_v35 = vld [vmem:[%s8886_s1 + $0xbe8] sm:$0xff]  ;;  %v397_v46 = vld [vmem:[%s8886_s1 + $0xaf8] sm:$0xff]  ;;  %v380_v54 = vld [vmem:[%s8886_s1 + $0xa70] sm:$0xff] }
  0xa6   :  { %2014 = vmatmul.mubr.f32.vlgmr.msra.gmra.mrb[8].mxu1 %v6625_v57  ;;  %5035 = vmatprep.subr.bf16.mxu0 %v5034_v52  ;;  %v403_v57 = vld [vmem:[%s8886_s1 + $0xb28] sm:$0xff]  ;;  %v5084_v52 = vpack.c.bf16 %v409_v29, %v408_v27  ;;  %v5086_v42 = vpack.c.bf16 %v427_v35, %v426_v43  ;;  %v381_v32 = vld [vmem:[%s8886_s1 + $0xa78] sm:$0xff]  ;;  %v452_v35 = vld [vmem:[%s8886_s1 + $0xcb0] sm:$0xff] }
  0xa7   :  { %5065 = vmatpush3.bf16.msra.mxu1 %v5064_v36  ;;  %2153 = vmatprep.mubr.f32.mxu1 %v1105_v49  ;;  %v5072_v62 = vpack.c.bf16 %v403_v57, %v402_v55  ;;  %v5052_v36 = vpack.c.bf16 %v377_v26, %v376_v25  ;;  %v5056_v49 = vpack.c.bf16 %v379_v39, %v378_v38  ;;  %v412_v55 = vld [vmem:[%s8886_s1 + $0xb70] sm:$0xff]  ;;  %v413_v57 = vld [vmem:[%s8886_s1 + $0xb78] sm:$0xff]  ;;  %v483_v25 = vld [vmem:[%s8886_s1 + $0xda8] sm:$0xff] }
  0xa8   :  { %5067 = vmatprep.subr.bf16.mxu1 %v5066_v40  ;;  %v410_v40 = vld [vmem:[%s8886_s1 + $0xb60] sm:$0xff]  ;;  %v528_v59 = vld [vmem:[%s8886_s1 + $0xf10] sm:$0xff] }
  0xa9   :  { %5037 = vmatpush3.bf16.msra.mxu0 %v5036_v50  ;;  %v37_v50 = vld [vmem:[%s8885_s0 + $0x30] sm:$0xff] }
  0xaa   :  { %5039 = vmatprep.subr.bf16.mxu0 %v5038_v53  ;;  %v5058_v53 = vpack.c.bf16 %v397_v46, %v396_v45  ;;  %v7030_v8 = vrot.slane %v37_v50, %v5908_v10  ;;  %v468_v45 = vld [vmem:[%s8886_s1 + $0xd30] sm:$0xff] }
  0xab   :  { %5069 = vmatpush3.bf16.msra.mxu1 %v5068_v51  ;;  %v5088_v51 = vpack.c.bf16 %v411_v44, %v410_v40  ;;  %v437_v44 = vld [vmem:[%s8886_s1 + $0xc38] sm:$0xff] }
  0xac   :  { %5071 = vmatprep.subr.bf16.mxu1 %v5070_v56  ;;  %v5090_v56 = vpack.c.bf16 %v429_v48, %v428_v47  ;;  %v469_v47 = vld [vmem:[%s8886_s1 + $0xd38] sm:$0xff]  ;;  %v454_v48 = vld [vmem:[%s8886_s1 + $0xcc0] sm:$0xff] }
  0xad   :  { %5041 = vmatpush3.bf16.msra.mxu0 %v5040_v61  ;;  %v1106_v61 = vcombine.high %v37_v50, %v37_v50  ;;  %v486_v50 = vld [vmem:[%s8886_s1 + $0xdc0] sm:$0xff] }
  0xae   :  { %5043 = vmatprep.subr.bf16.mxu0 %v5042_v63  ;;  %v5092_v63 = vpack.c.bf16 %v413_v57, %v412_v55  ;;  %v438_v55 = vld [vmem:[%s8886_s1 + $0xc40] sm:$0xff] }
  0xaf   :  { %5073 = vmatpush3.bf16.msra.mxu1 %v5072_v62  ;;  %v5060_v62 = vpack.c.bf16 %v381_v32, %v380_v54  ;;  %v5140_v54 = vpack.c.bf16 %v469_v47, %v468_v45  ;;  %v470_v57 = vld [vmem:[%s8886_s1 + $0xd40] sm:$0xff]  ;;  %v495_v45 = vld [vmem:[%s8886_s1 + $0xe08] sm:$0xff] }
  0xb0   :  { %5075 = vmatprep.subr.bf16.mxu1 %v5074_v3  ;;  %v462_v3 = vld [vmem:[%s8886_s1 + $0xd00] sm:$0xff] }
  0xb1   :  { %5045 = vmatpush3.bf16.msra.mxu0 %v5044_v9  ;;  %v480_v9 = vld [vmem:[%s8886_s1 + $0xd90] sm:$0xff]  ;;  %v5128_v14 = vpack.c.bf16 %v463_v5, %v462_v3  ;;  %v441_v3 = vld [vmem:[%s8886_s1 + $0xc58] sm:$0xff] }
  0xb2   :  { %5047 = vmatprep.subr.bf16.mxu0 %v5046_v11  ;;  %v7039_v11 = vrot.slane %v1106_v61, %v5908_v10  ;;  %v488_v61 = vld [vmem:[%s8886_s1 + $0xdd0] sm:$0xff] }
  0xb3   :  { %5077 = vmatpush3.bf16.msra.mxu1 %v5076_v12  ;;  %v481_v12 = vld [vmem:[%s8886_s1 + $0xd98] sm:$0xff] }
  0xb4   :  { %5079 = vmatprep.subr.bf16.mxu1 %v5078_v16  ;;  %v432_v16 = vld [vmem:[%s8886_s1 + $0xc10] sm:$0xff]  ;;  %v5130_v19 = vpack.c.bf16 %v481_v12, %v480_v9  ;;  %v1122_v26 = vcombine.high %v7039_v11, %v7039_v11  ;;  %v459_v9 = vld [vmem:[%s8886_s1 + $0xce8] sm:$0xff]  ;;  %v490_v12 = vld [vmem:[%s8886_s1 + $0xde0] sm:$0xff] }
  0xb5   :  { %5049 = vmatpush3.bf16.msra.mxu0 %v5048_v22  ;;  %v451_v22 = vld [vmem:[%s8886_s1 + $0xca8] sm:$0xff]  ;;  %v5100_v27 = vpack.c.bf16 %v433_v17, %v432_v16  ;;  %v5118_v16 = vpack.c.bf16 %v459_v9, %v458_v7  ;;  %v442_v17 = vld [vmem:[%s8886_s1 + $0xc60] sm:$0xff] }
  0xb6   :  { %5051 = vmatprep.subr.bf16.mxu0 %v5050_v24  ;;  %v482_v24 = vld [vmem:[%s8886_s1 + $0xda0] sm:$0xff]  ;;  %v5102_v29 = vpack.c.bf16 %v451_v22, %v450_v21  ;;  %v475_v21 = vld [vmem:[%s8886_s1 + $0xd68] sm:$0xff]  ;;  %v460_v22 = vld [vmem:[%s8886_s1 + $0xcf0] sm:$0xff] }
  0xb7   :  { %5081 = vmatpush3.bf16.msra.mxu1 %v5080_v23  ;;  %v1121_v23 = vcombine.high %v7030_v8, %v7030_v8  ;;  %v5134_v43 = vpack.c.bf16 %v483_v25, %v482_v24  ;;  %v492_v24 = vld [vmem:[%s8886_s1 + $0xdf0] sm:$0xff]  ;;  %v493_v25 = vld [vmem:[%s8886_s1 + $0xdf8] sm:$0xff]  ;;  %v499_v7 = vld [vmem:[%s8886_s1 + $0xe28] sm:$0xff] }
  0xb8   :  { %5083 = vmatprep.subr.bf16.mxu1 %v5082_v28  ;;  %v5132_v28 = vpack.c.bf16 %v465_v20, %v464_v18  ;;  %v443_v18 = vld [vmem:[%s8886_s1 + $0xc68] sm:$0xff]  ;;  %v530_v9 = vld [vmem:[%s8886_s1 + $0xf20] sm:$0xff] }
  0xb9   :  { %5053 = vmatpush3.bf16.msra.mxu0 %v5052_v36  ;;  %v453_v36 = vld [vmem:[%s8886_s1 + $0xcb8] sm:$0xff] }
  0xba   :  { %5055 = vmatprep.subr.bf16.mxu0 %v5054_v37  ;;  %v485_v37 = vld [vmem:[%s8886_s1 + $0xdb8] sm:$0xff]  ;;  %v5106_v40 = vpack.c.bf16 %v453_v36, %v452_v35  ;;  %v510_v35 = vld [vmem:[%s8886_s1 + $0xe80] sm:$0xff]  ;;  %v511_v36 = vld [vmem:[%s8886_s1 + $0xe88] sm:$0xff] }
  0xbb   :  { %5085 = vmatpush3.bf16.msra.mxu1 %v5084_v52  ;;  %v484_v52 = vld [vmem:[%s8886_s1 + $0xdb0] sm:$0xff] }
  0xbc   :  { %5087 = vmatprep.subr.bf16.mxu1 %v5086_v42  ;;  %v436_v42 = vld [vmem:[%s8886_s1 + $0xc30] sm:$0xff]  ;;  %v5138_v46 = vpack.c.bf16 %v485_v37, %v484_v52  ;;  %v542_v52 = vld [vmem:[%s8886_s1 + $0xf80] sm:$0xff]  ;;  %v543_v37 = vld [vmem:[%s8886_s1 + $0xf88] sm:$0xff] }
  0xbd   :  { %5057 = vmatpush3.bf16.msra.mxu0 %v5056_v49  ;;  %v455_v49 = vld [vmem:[%s8886_s1 + $0xcc8] sm:$0xff]  ;;  %v5190_v47 = vpack.c.bf16 %v543_v37, %v542_v52  ;;  %v520_v52 = vld [vmem:[%s8886_s1 + $0xed0] sm:$0xff]  ;;  %v521_v37 = vld [vmem:[%s8886_s1 + $0xed8] sm:$0xff] }
  0xbe   :  { %5059 = vmatprep.subr.bf16.mxu0 %v5058_v53  ;;  %v5108_v53 = vpack.c.bf16 %v437_v44, %v436_v42  ;;  %v5110_v32 = vpack.c.bf16 %v455_v49, %v454_v48  ;;  %v5158_v42 = vpack.c.bf16 %v511_v36, %v510_v35  ;;  %v494_v44 = vld [vmem:[%s8886_s1 + $0xe00] sm:$0xff]  ;;  %v527_v48 = vld [vmem:[%s8886_s1 + $0xf08] sm:$0xff]  ;;  %v512_v49 = vld [vmem:[%s8886_s1 + $0xe90] sm:$0xff] }
  0xbf   :  { %5089 = vmatpush3.bf16.msra.mxu1 %v5088_v51  ;;  %v487_v51 = vld [vmem:[%s8886_s1 + $0xdc8] sm:$0xff] }
  0xc0   :  { %5091 = vmatprep.subr.bf16.mxu1 %v5090_v56  ;;  %v439_v56 = vld [vmem:[%s8886_s1 + $0xc48] sm:$0xff]  ;;  %v5142_v41 = vpack.c.bf16 %v487_v51, %v486_v50  ;;  %v513_v50 = vld [vmem:[%s8886_s1 + $0xe98] sm:$0xff] }
  0xc1   :  { %5061 = vmatpush3.bf16.msra.mxu0 %v5060_v62  ;;  %v489_v62 = vld [vmem:[%s8886_s1 + $0xdd8] sm:$0xff]  ;;  %v535_v36 = vld [vmem:[%s8886_s1 + $0xf48] sm:$0xff] }
  0xc2   :  { %5095 = vmatprep.subr.bf16.mxu0 %v5094_v0  ;;  %v5144_v0 = vpack.c.bf16 %v471_v58, %v470_v57  ;;  %v5146_v5 = vpack.c.bf16 %v489_v62, %v488_v61  ;;  %v5162_v57 = vpack.c.bf16 %v513_v50, %v512_v49  ;;  %v497_v58 = vld [vmem:[%s8886_s1 + $0xe18] sm:$0xff]  ;;  %v514_v62 = vld [vmem:[%s8886_s1 + $0xea0] sm:$0xff] }
  0xc3   :  { %5093 = vmatpush3.bf16.msra.mxu1 %v5092_v63  ;;  %v5112_v63 = vpack.c.bf16 %v439_v56, %v438_v55  ;;  %v5160_v55 = vpack.c.bf16 %v495_v45, %v494_v44  ;;  %v529_v61 = vld [vmem:[%s8886_s1 + $0xf18] sm:$0xff]  ;;  %v5178_v44 = vpack.c.bf16 %v521_v37, %v520_v52  ;;  %v504_v45 = vld [vmem:[%s8886_s1 + $0xe50] sm:$0xff]  ;;  %v522_v50 = vld [vmem:[%s8886_s1 + $0xee0] sm:$0xff] }
  0xc4   :  { %5127 = vmatprep.subr.bf16.mxu1 %v5126_v4  ;;  %2084 = vmatmul.mubr.f32.vlgmr.msra.gmra.mrb[10].mxu0 %v6823_v31  ;;  %v434_v31 = vld [vmem:[%s8886_s1 + $0xc20] sm:$0xff]  ;;  %v472_v4 = vld [vmem:[%s8886_s1 + $0xd50] sm:$0xff]  ;;  %v537_v49 = vld [vmem:[%s8886_s1 + $0xf58] sm:$0xff] }
  0xc5   :  { %5097 = vmatpush3.bf16.msra.mxu0 %v5096_v13  ;;  %2223 = vmatprep.mubr.f32.mxu0 %v1121_v23  ;;  %v5104_v38 = vpack.c.bf16 %v435_v30, %v434_v31  ;;  %v491_v13 = vld [vmem:[%s8886_s1 + $0xde8] sm:$0xff]  ;;  %v461_v23 = vld [vmem:[%s8886_s1 + $0xcf8] sm:$0xff]  ;;  %v444_v31 = vld [vmem:[%s8886_s1 + $0xc70] sm:$0xff] }
  0xc6   :  { %2154 = vmatmul.mubr.f32.vlgmr.msra.gmra.mrb[10].mxu1 %v6832_v34  ;;  %5099 = vmatprep.subr.bf16.mxu0 %v5098_v15  ;;  %v467_v34 = vld [vmem:[%s8886_s1 + $0xd28] sm:$0xff]  ;;  %v5148_v15 = vpack.c.bf16 %v473_v6, %v472_v4  ;;  %v5150_v20 = vpack.c.bf16 %v491_v13, %v490_v12  ;;  %v445_v30 = vld [vmem:[%s8886_s1 + $0xc78] sm:$0xff]  ;;  %v516_v13 = vld [vmem:[%s8886_s1 + $0xeb0] sm:$0xff] }
  0xc7   :  { %5129 = vmatpush3.bf16.msra.mxu1 %v5128_v14  ;;  %2293 = vmatprep.mubr.f32.mxu1 %v1122_v26  ;;  %v5136_v39 = vpack.c.bf16 %v467_v34, %v466_v33  ;;  %v5116_v14 = vpack.c.bf16 %v441_v3, %v440_v2  ;;  %v5120_v26 = vpack.c.bf16 %v443_v18, %v442_v17  ;;  %v476_v33 = vld [vmem:[%s8886_s1 + $0xd70] sm:$0xff]  ;;  %v477_v34 = vld [vmem:[%s8886_s1 + $0xd78] sm:$0xff]  ;;  %v547_v2 = vld [vmem:[%s8886_s1 + $0xfa8] sm:$0xff] }
  0xc8   :  { %5131 = vmatprep.subr.bf16.mxu1 %v5130_v19  ;;  %v474_v19 = vld [vmem:[%s8886_s1 + $0xd60] sm:$0xff]  ;;  %v608_v37 = vld [vmem:[%s8886_s1 + $0x1190] sm:$0xff] }
  0xc9   :  { %5101 = vmatpush3.bf16.msra.mxu0 %v5100_v27  ;;  %v38_v27 = vld [vmem:[%s8885_s0 + $0x38] sm:$0xff] }
  0xca   :  { %5103 = vmatprep.subr.bf16.mxu0 %v5102_v29  ;;  %v5122_v29 = vpack.c.bf16 %v461_v23, %v460_v22  ;;  %v7237_v51 = vrot.slane %v38_v27, %v5908_v10  ;;  %v532_v22 = vld [vmem:[%s8886_s1 + $0xf30] sm:$0xff] }
  0xcb   :  { %5133 = vmatpush3.bf16.msra.mxu1 %v5132_v28  ;;  %v5152_v28 = vpack.c.bf16 %v475_v21, %v474_v19  ;;  %v501_v21 = vld [vmem:[%s8886_s1 + $0xe38] sm:$0xff] }
  0xcc   :  { %5135 = vmatprep.subr.bf16.mxu1 %v5134_v43  ;;  %v5154_v43 = vpack.c.bf16 %v493_v25, %v492_v24  ;;  %v533_v24 = vld [vmem:[%s8886_s1 + $0xf38] sm:$0xff]  ;;  %v518_v25 = vld [vmem:[%s8886_s1 + $0xec0] sm:$0xff] }
  0xcd   :  { %5105 = vmatpush3.bf16.msra.mxu0 %v5104_v38  ;;  %v1123_v38 = vcombine.high %v38_v27, %v38_v27  ;;  %v550_v27 = vld [vmem:[%s8886_s1 + $0xfc0] sm:$0xff] }
  0xce   :  { %5107 = vmatprep.subr.bf16.mxu0 %v5106_v40  ;;  %v5156_v40 = vpack.c.bf16 %v477_v34, %v476_v33  ;;  %v502_v33 = vld [vmem:[%s8886_s1 + $0xe40] sm:$0xff] }
  0xcf   :  { %5137 = vmatpush3.bf16.msra.mxu1 %v5136_v39  ;;  %v5124_v39 = vpack.c.bf16 %v445_v30, %v444_v31  ;;  %v5204_v31 = vpack.c.bf16 %v533_v24, %v532_v22  ;;  %v534_v34 = vld [vmem:[%s8886_s1 + $0xf40] sm:$0xff]  ;;  %v575_v22 = vld [vmem:[%s8886_s1 + $0x1088] sm:$0xff] }
  0xd0   :  { %5139 = vmatprep.subr.bf16.mxu1 %v5138_v46  ;;  %v526_v46 = vld [vmem:[%s8886_s1 + $0xf00] sm:$0xff]  ;;  %v607_v24 = vld [vmem:[%s8886_s1 + $0x1188] sm:$0xff] }
  0xd1   :  { %5109 = vmatpush3.bf16.msra.mxu0 %v5108_v53  ;;  %v544_v53 = vld [vmem:[%s8886_s1 + $0xf90] sm:$0xff]  ;;  %v5192_v56 = vpack.c.bf16 %v527_v48, %v526_v46  ;;  %v505_v46 = vld [vmem:[%s8886_s1 + $0xe58] sm:$0xff] }
  0xd2   :  { %5111 = vmatprep.subr.bf16.mxu0 %v5110_v32  ;;  %v7246_v32 = vrot.slane %v1123_v38, %v5908_v10  ;;  %v552_v38 = vld [vmem:[%s8886_s1 + $0xfd0] sm:$0xff] }
  0xd3   :  { %5141 = vmatpush3.bf16.msra.mxu1 %v5140_v54  ;;  %v545_v54 = vld [vmem:[%s8886_s1 + $0xf98] sm:$0xff] }
  0xd4   :  { %5143 = vmatprep.subr.bf16.mxu1 %v5142_v41  ;;  %v496_v41 = vld [vmem:[%s8886_s1 + $0xe10] sm:$0xff]  ;;  %v5194_v60 = vpack.c.bf16 %v545_v54, %v544_v53  ;;  %v1139_v3 = vcombine.high %v7246_v32, %v7246_v32  ;;  %v523_v53 = vld [vmem:[%s8886_s1 + $0xee8] sm:$0xff]  ;;  %v554_v54 = vld [vmem:[%s8886_s1 + $0xfe0] sm:$0xff] }
  0xd5   :  { %5113 = vmatpush3.bf16.msra.mxu0 %v5112_v63  ;;  %v515_v63 = vld [vmem:[%s8886_s1 + $0xea8] sm:$0xff]  ;;  %v5164_v4 = vpack.c.bf16 %v497_v58, %v496_v41  ;;  %v5182_v41 = vpack.c.bf16 %v523_v53, %v522_v50  ;;  %v506_v58 = vld [vmem:[%s8886_s1 + $0xe60] sm:$0xff] }
  0xd6   :  { %5115 = vmatprep.subr.bf16.mxu0 %v5114_v1  ;;  %v546_v1 = vld [vmem:[%s8886_s1 + $0xfa0] sm:$0xff]  ;;  %v5166_v6 = vpack.c.bf16 %v515_v63, %v514_v62  ;;  %v539_v63 = vld [vmem:[%s8886_s1 + $0xf68] sm:$0xff] }
  0xd7   :  { %5145 = vmatpush3.bf16.msra.mxu1 %v5144_v0  ;;  %v1138_v0 = vcombine.high %v7237_v51, %v7237_v51  ;;  %v5198_v12 = vpack.c.bf16 %v547_v2, %v546_v1  ;;  %v525_v1 = vld [vmem:[%s8886_s1 + $0xef8] sm:$0xff]  ;;  %v3627_v2 = vld [vmem:[%s8887_s2] ss:$0 sm:$0xff]  ;;  %v579_v53 = vld [vmem:[%s8886_s1 + $0x10a8] sm:$0xff] }
  0xd8   :  { %5147 = vmatprep.subr.bf16.mxu1 %v5146_v5  ;;  %v5196_v5 = vpack.c.bf16 %v529_v61, %v528_v59  ;;  %v507_v59 = vld [vmem:[%s8886_s1 + $0xe68] sm:$0xff]  ;;  %v578_v50 = vld [vmem:[%s8886_s1 + $0x10a0] sm:$0xff] }
  0xd9   :  { %5117 = vmatpush3.bf16.msra.mxu0 %v5116_v14  ;;  %v517_v14 = vld [vmem:[%s8886_s1 + $0xeb8] sm:$0xff] }
  0xda   :  { %5119 = vmatprep.subr.bf16.mxu0 %v5118_v16  ;;  %v549_v16 = vld [vmem:[%s8886_s1 + $0xfb8] sm:$0xff]  ;;  %v5170_v19 = vpack.c.bf16 %v517_v14, %v516_v13 }
  0xdb   :  { %5149 = vmatpush3.bf16.msra.mxu1 %v5148_v15  ;;  %v548_v15 = vld [vmem:[%s8886_s1 + $0xfb0] sm:$0xff] }
  0xdc   :  { %5151 = vmatprep.subr.bf16.mxu1 %v5150_v20  ;;  %v500_v20 = vld [vmem:[%s8886_s1 + $0xe30] sm:$0xff]  ;;  %v5202_v23 = vpack.c.bf16 %v549_v16, %v548_v15  ;;  %v509_v16 = vld [vmem:[%s8886_s1 + $0xe78] sm:$0xff] }
  0xdd   :  { %5121 = vmatpush3.bf16.msra.mxu0 %v5120_v26  ;;  %v519_v26 = vld [vmem:[%s8886_s1 + $0xec8] sm:$0xff]  ;;  %v508_v15 = vld [vmem:[%s8886_s1 + $0xe70] sm:$0xff] }
  0xde   :  { %5123 = vmatprep.subr.bf16.mxu0 %v5122_v29  ;;  %v5172_v29 = vpack.c.bf16 %v501_v21, %v500_v20  ;;  %v5174_v30 = vpack.c.bf16 %v519_v26, %v518_v25  ;;  %v541_v20 = vld [vmem:[%s8886_s1 + $0xf78] sm:$0xff]  ;;  %v574_v21 = vld [vmem:[%s8886_s1 + $0x1080] sm:$0xff] }
  0xdf   :  { %5153 = vmatpush3.bf16.msra.mxu1 %v5152_v28  ;;  %v551_v28 = vld [vmem:[%s8886_s1 + $0xfc8] sm:$0xff] }
  0xe0   :  { %5155 = vmatprep.subr.bf16.mxu1 %v5154_v43  ;;  %v503_v43 = vld [vmem:[%s8886_s1 + $0xe48] sm:$0xff]  ;;  %v5206_v35 = vpack.c.bf16 %v551_v28, %v550_v27  ;;  %v5188_v27 = vpack.c.bf16 %v509_v16, %v508_v15 }
  0xe1   :  { %5125 = vmatpush3.bf16.msra.mxu0 %v5124_v39  ;;  %v553_v39 = vld [vmem:[%s8886_s1 + $0xfd8] sm:$0xff]  ;;  %v615_v15 = vld [vmem:[%s8886_s1 + $0x11c8] sm:$0xff] }
  0xe2   :  { %5159 = vmatprep.subr.bf16.mxu0 %v5158_v42  ;;  %v5208_v42 = vpack.c.bf16 %v535_v36, %v534_v34  ;;  %v5210_v48 = vpack.c.bf16 %v553_v39, %v552_v38  ;;  %v591_v34 = vld [vmem:[%s8886_s1 + $0x1108] sm:$0xff]  ;;  %v577_v36 = vld [vmem:[%s8886_s1 + $0x1098] sm:$0xff] }
  0xe3   :  { %5157 = vmatpush3.bf16.msra.mxu1 %v5156_v40  ;;  %v5176_v40 = vpack.c.bf16 %v503_v43, %v502_v33  ;;  %v590_v33 = vld [vmem:[%s8886_s1 + $0x1100] sm:$0xff]  ;;  %v609_v38 = vld [vmem:[%s8886_s1 + $0x1198] sm:$0xff] }
  0xe4   :  { %5191 = vmatprep.subr.bf16.mxu1 %v5190_v47  ;;  %2224 = vmatmul.mubr.f32.vlgmr.msra.gmra.mrb[12].mxu0 %v7030_v8  ;;  %v498_v8 = vld [vmem:[%s8886_s1 + $0xe20] sm:$0xff]  ;;  %v536_v47 = vld [vmem:[%s8886_s1 + $0xf50] sm:$0xff] }
  0xe5   :  { %5161 = vmatpush3.bf16.msra.mxu0 %v5160_v55  ;;  %2363 = vmatprep.mubr.f32.mxu0 %v1138_v0  ;;  %v5168_v17 = vpack.c.bf16 %v499_v7, %v498_v8  ;;  %v555_v55 = vld [vmem:[%s8886_s1 + $0xfe8] sm:$0xff]  ;;  %v524_v0 = vld [vmem:[%s8886_s1 + $0xef0] sm:$0xff] }
  0xe6   :  { %2294 = vmatmul.mubr.f32.vlgmr.msra.gmra.mrb[12].mxu1 %v7039_v11  ;;  %5163 = vmatprep.subr.bf16.mxu0 %v5162_v57  ;;  %v531_v11 = vld [vmem:[%s8886_s1 + $0xf28] sm:$0xff]  ;;  %v5212_v57 = vpack.c.bf16 %v537_v49, %v536_v47  ;;  %v5214_v62 = vpack.c.bf16 %v555_v55, %v554_v54  ;;  %v5186_v14 = vpack.c.bf16 %v525_v1, %v524_v0  ;;  %v592_v47 = vld [vmem:[%s8886_s1 + $0x1110] sm:$0xff]  ;;  %v593_v49 = vld [vmem:[%s8886_s1 + $0x1118] sm:$0xff] }
  0xe7   :  { %5193 = vmatpush3.bf16.msra.mxu1 %v5192_v56  ;;  %2433 = vmatprep.mubr.f32.mxu1 %v1139_v3  ;;  %v5200_v18 = vpack.c.bf16 %v531_v11, %v530_v9  ;;  %v5180_v56 = vpack.c.bf16 %v505_v46, %v504_v45  ;;  %v5184_v9 = vpack.c.bf16 %v507_v59, %v506_v58  ;;  %v560_v45 = vld [vmem:[%s8886_s1 + $0x1010] sm:$0xff]  ;;  %v561_v46 = vld [vmem:[%s8886_s1 + $0x1018] sm:$0xff]  ;;  %v610_v55 = vld [vmem:[%s8886_s1 + $0x11a0] sm:$0xff] }
  0xe8   :  { %5195 = vmatprep.subr.bf16.mxu1 %v5194_v60  ;;  %v538_v60 = vld [vmem:[%s8886_s1 + $0xf60] sm:$0xff]  ;;  %v5260_v58 = vpack.c.bf16 %v593_v49, %v592_v47  ;;  %v5230_v59 = vpack.c.bf16 %v579_v53, %v578_v50  ;;  %v581_v0 = vld [vmem:[%s8886_s1 + $0x10b8] sm:$0xff]  ;;  %v612_v1 = vld [vmem:[%s8886_s1 + $0x11b0] sm:$0xff] }
  0xe9   :  { %5165 = vmatpush3.bf16.msra.mxu0 %v5164_v4  ;;  %v5216_v13 = vpack.c.bf16 %v539_v63, %v538_v60  ;;  %v563_v60 = vld [vmem:[%s8886_s1 + $0x1028] sm:$0xff]  ;;  %v580_v63 = vld [vmem:[%s8886_s1 + $0x10b0] sm:$0xff] }
  0xea   :  { %5167 = vmatprep.subr.bf16.mxu0 %v5166_v6  ;;  %v557_v6 = vld [vmem:[%s8886_s1 + $0xff8] sm:$0xff] }
  0xeb   :  { %5197 = vmatpush3.bf16.msra.mxu1 %v5196_v5  ;;  %v556_v5 = vld [vmem:[%s8886_s1 + $0xff0] sm:$0xff] }
  0xec   :  { %5199 = vmatprep.subr.bf16.mxu1 %v5198_v12  ;;  %v39_v12 = vld [vmem:[%s8885_s0 + $0x40] sm:$0xff] }
  0xed   :  { %5169 = vmatpush3.bf16.msra.mxu0 %v5168_v17  ;;  %v540_v17 = vld [vmem:[%s8886_s1 + $0xf70] sm:$0xff]  ;;  %v1140_v25 = vcombine.high %v39_v12, %v39_v12  ;;  %v7449_v52 = vrot.slane %v39_v12, %v5908_v10  ;;  %v597_v12 = vld [vmem:[%s8886_s1 + $0x1138] sm:$0xff] }
  0xee   :  { %5171 = vmatprep.subr.bf16.mxu0 %v5170_v19  ;;  %v5218_v19 = vpack.c.bf16 %v557_v6, %v556_v5  ;;  %v5220_v28 = vpack.c.bf16 %v541_v20, %v540_v17  ;;  %v5234_v5 = vpack.c.bf16 %v581_v0, %v580_v63  ;;  %v564_v6 = vld [vmem:[%s8886_s1 + $0x1030] sm:$0xff]  ;;  %v566_v17 = vld [vmem:[%s8886_s1 + $0x1040] sm:$0xff]  ;;  %v567_v20 = vld [vmem:[%s8886_s1 + $0x1048] sm:$0xff] }
  0xef   :  { %5201 = vmatpush3.bf16.msra.mxu1 %v5200_v18  ;;  %v7458_v39 = vrot.slane %v1140_v25, %v5908_v10  ;;  %v1155_v54 = vcombine.high %v7449_v52, %v7449_v52 }
  0xf0   :  { %5203 = vmatprep.subr.bf16.mxu1 %v5202_v23  ;;  %v606_v23 = vld [vmem:[%s8886_s1 + $0x1180] sm:$0xff] }
  0xf1   :  { %5173 = vmatpush3.bf16.msra.mxu0 %v5172_v29  ;;  %v5222_v29 = vpack.c.bf16 %v575_v22, %v574_v21  ;;  %v5254_v43 = vpack.c.bf16 %v607_v24, %v606_v23  ;;  %v598_v21 = vld [vmem:[%s8886_s1 + $0x1140] sm:$0xff] }
  0xf2   :  { %5175 = vmatprep.subr.bf16.mxu0 %v5174_v30  ;;  %v559_v30 = vld [vmem:[%s8886_s1 + $0x1008] sm:$0xff] }
  0xf3   :  { %5205 = vmatpush3.bf16.msra.mxu1 %v5204_v31  ;;  %v558_v31 = vld [vmem:[%s8886_s1 + $0x1000] sm:$0xff] }
  0xf4   :  { %5207 = vmatprep.subr.bf16.mxu1 %v5206_v35  ;;  %v576_v35 = vld [vmem:[%s8886_s1 + $0x1090] sm:$0xff] }
  0xf5   :  { %5177 = vmatpush3.bf16.msra.mxu0 %v5176_v40  ;;  %v5224_v40 = vpack.c.bf16 %v559_v30, %v558_v31 }
  0xf6   :  { %5179 = vmatprep.subr.bf16.mxu0 %v5178_v44  ;;  %v5226_v44 = vpack.c.bf16 %v577_v36, %v576_v35 }
  0xf7   :  { %5209 = vmatpush3.bf16.msra.mxu1 %v5208_v42  ;;  %v3667_v61 = vpop.f32.mrb[0].mxu0  ;;  %v5256_v42 = vpack.c.bf16 %v591_v34, %v590_v33 }
  0xf8   :  { %5211 = vmatprep.subr.bf16.mxu1 %v5210_v48  ;;  %v3668_v3 = vpop.f32.mrb[1].mxu0  ;;  %v5258_v48 = vpack.c.bf16 %v609_v38, %v608_v37 }
  0xf9   :  { %v3702_v4 = vpop.f32.mrb[0].mxu1  ;;  %v3669_v8 = vadd.f32 %v3668_v3, %v3667_v61  ;;  %5181 = vmatpush3.bf16.msra.mxu0 %v5180_v56  ;;  %v611_v56 = vld [vmem:[%s8886_s1 + $0x11a8] sm:$0xff]  ;;  %v594_v61 = vld [vmem:[%s8886_s1 + $0x1120] sm:$0xff] }
  0xfa   :  { %v3703_v7 = vpop.f32.mrb[1].mxu1  ;;  %5183 = vmatprep.subr.bf16.mxu0 %v5182_v41  ;;  %v5228_v41 = vpack.c.bf16 %v561_v46, %v560_v45 }
  0xfb   :  { %v3704_v11 = vadd.f32 %v3703_v7, %v3702_v4  ;;  %5213 = vmatpush3.bf16.msra.mxu1 %v5212_v57  ;;  %v1386_v18 = vadd.f32 %v3669_v8, %v3627_v2  ;;  %v1156_v57 = vcombine.high %v7458_v39, %v7458_v39  ;;  %v613_v2 = vld [vmem:[%s8886_s1 + $0x11b8] sm:$0xff]  ;;  %v596_v7 = vld [vmem:[%s8886_s1 + $0x1130] sm:$0xff] }
  0xfc   :  { %5215 = vmatprep.subr.bf16.mxu1 %v5214_v62  ;;  %v5262_v62 = vpack.c.bf16 %v611_v56, %v610_v55  ;;  %v565_v8 = vld [vmem:[%s8886_s1 + $0x1038] sm:$0xff] }
  0xfd   :  { %v7428_v26 = vadd.f32 %v3704_v11, %v1386_v18  ;;  %5185 = vmatpush3.bf16.msra.mxu0 %v5184_v9  ;;  %v5266_v9 = vpack.c.bf16 %v613_v2, %v612_v1  ;;  %v582_v11 = vld [vmem:[%s8886_s1 + $0x10c0] sm:$0xff]  ;;  %v5236_v16 = vpack.c.bf16 %v565_v8, %v564_v6  ;;  %v5268_v18 = vpack.c.bf16 %v597_v12, %v596_v7 }
  0xfe   :  { %5187 = vmatprep.subr.bf16.mxu0 %v5186_v14  ;;  %v614_v14 = vld [vmem:[%s8886_s1 + $0x11c0] sm:$0xff] }
  0xff   :  { %5217 = vmatpush3.bf16.msra.mxu1 %v5216_v13  ;;  %v583_v13 = vld [vmem:[%s8886_s1 + $0x10c8] sm:$0xff] }
 0x100   :  { %5219 = vmatprep.subr.bf16.mxu1 %v5218_v19  ;;  %v5238_v19 = vpack.c.bf16 %v583_v13, %v582_v11 }
 0x101   :  { %5189 = vmatpush3.bf16.msra.mxu0 %v5188_v27 }
 0x102   :  { %5223 = vmatprep.subr.bf16.mxu0 %v5222_v29 }
 0x103   :  { %5221 = vmatpush3.bf16.msra.mxu1 %v5220_v28 }
 0x104   :  { %5255 = vmatprep.subr.bf16.mxu1 %v5254_v43  ;;  %2364 = vmatmul.mubr.f32.vlgmr.msra.gmra.mrb[14].mxu0 %v7237_v51  ;;  %v562_v51 = vld [vmem:[%s8886_s1 + $0x1020] sm:$0xff] }
 0x105   :  { %5225 = vmatpush3.bf16.msra.mxu0 %v5224_v40  ;;  %2503 = vmatprep.mubr.f32.mxu0 %v1155_v54  ;;  %v5232_v3 = vpack.c.bf16 %v563_v60, %v562_v51 }
 0x106   :  { %2434 = vmatmul.mubr.f32.vlgmr.msra.gmra.mrb[14].mxu1 %v7246_v32  ;;  %5227 = vmatprep.subr.bf16.mxu0 %v5226_v44  ;;  %v595_v32 = vld [vmem:[%s8886_s1 + $0x1128] sm:$0xff] }
 0x107   :  { %5257 = vmatpush3.bf16.msra.mxu1 %v5256_v42  ;;  %2573 = vmatprep.mubr.f32.mxu1 %v1156_v57  ;;  %v5264_v4 = vpack.c.bf16 %v595_v32, %v594_v61 }
 0x108   :  { %5259 = vmatprep.subr.bf16.mxu1 %v5258_v48 }
 0x109   :  { %5229 = vmatpush3.bf16.msra.mxu0 %v5228_v41 }
 0x10a   :  { %5231 = vmatprep.subr.bf16.mxu0 %v5230_v59 }
 0x10b   :  { %5261 = vmatpush3.bf16.msra.mxu1 %v5260_v58 }
 0x10c   :  { %5263 = vmatprep.subr.bf16.mxu1 %v5262_v62 }
 0x10d   :  { %5233 = vmatpush3.bf16.msra.mxu0 %v5232_v3 }
 0x10e   :  { %5235 = vmatprep.subr.bf16.mxu0 %v5234_v5 }
 0x10f   :  { %5265 = vmatpush3.bf16.msra.mxu1 %v5264_v4 }
 0x110   :  { %14 = vsyncpa [#allocation4], 0  ;;  %5267 = vmatprep.subr.bf16.mxu1 %v5266_v9  ;;  %v5270_v22 = vpack.c.bf16 %v615_v15, %v614_v14  ;;  %v599_v23 = vld [vmem:[%s8886_s1 + $0x1148] sm:$0xff]  ;;  %v584_v24 = vld [vmem:[%s8886_s1 + $0x10d0] sm:$0xff]  ;;  %v5240_v29 = vpack.c.bf16 %v567_v20, %v566_v17  ;;  %vm5715_vm0 = vmmov 0   ;;  %vm1316_vm1 = vcmask 523264  }
 0x111   :  { %v585_v25 = vld [vmem:[%s8886_s1 + $0x10d8] sm:$0xff]  ;;  %v616_v27 = vld [vmem:[%s8886_s1 + $0x11d0] sm:$0xff]  ;;  %5237 = vmatpush3.bf16.msra.mxu0 %v5236_v16  ;;  %v5272_v31 = vpack.c.bf16 %v599_v23, %v598_v21  ;;  %v586_v37 = vld [vmem:[%s8886_s1 + $0x10e0] sm:$0xff]  ;;  %vm3434_vm2 = vcmask 1042432   ;;  %vm5717_vm3 = vmmov 1   ;;  %vm3430_vm5 = vcmask 220160  }
 0x112   :  { %v617_v28 = vld [vmem:[%s8886_s1 + $0x11d8] sm:$0xff]  ;;  %5239 = vmatprep.subr.bf16.mxu0 %v5238_v19  ;;  %v5242_v30 = vpack.c.bf16 %v585_v25, %v584_v24  ;;  %v568_v33 = vld [vmem:[%s8886_s1 + $0x1050] sm:$0xff]  ;;  %v587_v38 = vld [vmem:[%s8886_s1 + $0x10e8] sm:$0xff]  ;;  %vm3600_vm7 = vcmask 74752  }
 0x113   :  { %5269 = vmatpush3.bf16.msra.mxu1 %v5268_v18  ;;  %v569_v43 = vld [vmem:[%s8886_s1 + $0x1058] sm:$0xff]  ;;  %v600_v34 = vld [vmem:[%s8886_s1 + $0x1150] sm:$0xff]  ;;  %v5274_v35 = vpack.c.bf16 %v617_v28, %v616_v27  ;;  %v618_v40 = vld [vmem:[%s8886_s1 + $0x11e0] sm:$0xff]  ;;  %v5246_v46 = vpack.c.bf16 %v587_v38, %v586_v37 }
 0x114   :  { %5271 = vmatprep.subr.bf16.mxu1 %v5270_v22  ;;  %v601_v36 = vld [vmem:[%s8886_s1 + $0x1158] sm:$0xff]  ;;  %v619_v42 = vld [vmem:[%s8886_s1 + $0x11e8] sm:$0xff]  ;;  %v5244_v44 = vpack.c.bf16 %v569_v43, %v568_v33  ;;  %v570_v47 = vld [vmem:[%s8886_s1 + $0x1060] sm:$0xff] }
 0x115   :  { %5241 = vmatpush3.bf16.msra.mxu0 %v5240_v29  ;;  %v5276_v45 = vpack.c.bf16 %v601_v36, %v600_v34  ;;  %v571_v48 = vld [vmem:[%s8886_s1 + $0x1068] sm:$0xff]  ;;  %v602_v49 = vld [vmem:[%s8886_s1 + $0x1160] sm:$0xff]  ;;  %v5278_v53 = vpack.c.bf16 %v619_v42, %v618_v40  ;;  %v588_v55 = vld [vmem:[%s8886_s1 + $0x10f0] sm:$0xff] }
 0x116   :  { %5243 = vmatprep.subr.bf16.mxu0 %v5242_v30  ;;  %v603_v54 = vld [vmem:[%s8886_s1 + $0x1168] sm:$0xff]  ;;  %v589_v56 = vld [vmem:[%s8886_s1 + $0x10f8] sm:$0xff]  ;;  %v620_v58 = vld [vmem:[%s8886_s1 + $0x11f0] sm:$0xff]  ;;  %v5248_v61 = vpack.c.bf16 %v571_v48, %v570_v47 }
 0x117   :  { %5273 = vmatpush3.bf16.msra.mxu1 %v5272_v31  ;;  %v3737_v50 = vpop.f32.mrb[2].mxu0  ;;  %v621_v59 = vld [vmem:[%s8886_s1 + $0x11f8] sm:$0xff]  ;;  %v40_v62 = vld [vmem:[%s8885_s0 + $0x48] sm:$0xff]  ;;  %v5280_v63 = vpack.c.bf16 %v603_v54, %v602_v49  ;;  %v5250_v0 = vpack.c.bf16 %v589_v56, %v588_v55  ;;  %v572_v1 = vld [vmem:[%s8886_s1 + $0x1070] sm:$0xff] }
 0x118   :  { %5275 = vmatprep.subr.bf16.mxu1 %v5274_v35  ;;  %v3738_v57 = vpop.f32.mrb[3].mxu0  ;;  %v573_v2 = vld [vmem:[%s8886_s1 + $0x1078] sm:$0xff]  ;;  %v604_v3 = vld [vmem:[%s8886_s1 + $0x1170] sm:$0xff]  ;;  %v5282_v5 = vpack.c.bf16 %v621_v59, %v620_v58  ;;  %v638_v8 = vld [vmem:[%s8886_s1 + $0x1280] sm:$0xff]  ;;  %v1157_v12 = vcombine.high %v40_v62, %v40_v62  ;;  %v7659_v23 = vrot.slane %v40_v62, %v5908_v10 }
 0x119   :  { %v3772_v41 = vpop.f32.mrb[2].mxu1  ;;  %v3739_v51 = vadd.f32 %v3738_v57, %v3737_v50  ;;  %5245 = vmatpush3.bf16.msra.mxu0 %v5244_v44  ;;  %v605_v6 = vld [vmem:[%s8886_s1 + $0x1178] sm:$0xff]  ;;  %v639_v7 = vld [vmem:[%s8886_s1 + $0x1288] sm:$0xff]  ;;  %v670_v9 = vld [vmem:[%s8886_s1 + $0x1380] sm:$0xff]  ;;  %v5252_v13 = vpack.c.bf16 %v573_v2, %v572_v1 }
 0x11a   :  { %v3773_v60 = vpop.f32.mrb[3].mxu1  ;;  %5247 = vmatprep.subr.bf16.mxu0 %v5246_v46  ;;  %v5284_v14 = vpack.c.bf16 %v605_v6, %v604_v3  ;;  %v5286_v15 = vpack.c.bf16 %v639_v7, %v638_v8  ;;  %v622_v16 = vld [vmem:[%s8886_s1 + $0x1200] sm:$0xff]  ;;  %v623_v17 = vld [vmem:[%s8886_s1 + $0x1208] sm:$0xff]  ;;  %v640_v21 = vld [vmem:[%s8886_s1 + $0x1290] sm:$0xff]  ;;  %v7668_v27 = vrot.slane %v1157_v12, %v5908_v10  ;;  %v1172_v38 = vcombine.high %v7659_v23, %v7659_v23 }
 0x11b   :  { %v3774_v32 = vadd.f32 %v3773_v60, %v3772_v41  ;;  %5277 = vmatpush3.bf16.msra.mxu1 %v5276_v45  ;;  %v1526_v4 = vadd.f32 %v3739_v51, %v7428_v26  ;;  %v671_v26 = vld [vmem:[%s8886_s1 + $0x1388] sm:$0xff]  ;;  %v654_v18 = vld [vmem:[%s8886_s1 + $0x1300] sm:$0xff]  ;;  %v641_v22 = vld [vmem:[%s8886_s1 + $0x1298] sm:$0xff]  ;;  %v5288_v28 = vpack.c.bf16 %v623_v17, %v622_v16 }
 0x11c   :  { %5279 = vmatprep.subr.bf16.mxu1 %v5278_v53  ;;  %v5318_v19 = vpack.c.bf16 %v671_v26, %v670_v9  ;;  %v655_v20 = vld [vmem:[%s8886_s1 + $0x1308] sm:$0xff]  ;;  %v672_v24 = vld [vmem:[%s8886_s1 + $0x1390] sm:$0xff]  ;;  %v673_v25 = vld [vmem:[%s8886_s1 + $0x1398] sm:$0xff]  ;;  %v5290_v31 = vpack.c.bf16 %v641_v22, %v640_v21  ;;  %v1173_v44 = vcombine.high %v7668_v27, %v7668_v27 }
 0x11d   :  { %v7638_v11 = vadd.f32 %v3774_v32, %v1526_v4  ;;  %5249 = vmatpush3.bf16.msra.mxu0 %v5248_v61  ;;  %v5320_v29 = vpack.c.bf16 %v655_v20, %v654_v18  ;;  %v624_v30 = vld [vmem:[%s8886_s1 + $0x1210] sm:$0xff]  ;;  %v625_v33 = vld [vmem:[%s8886_s1 + $0x1218] sm:$0xff]  ;;  %v5322_v34 = vpack.c.bf16 %v673_v25, %v672_v24  ;;  %v642_v36 = vld [vmem:[%s8886_s1 + $0x12a0] sm:$0xff] }
 0x11e   :  { %5251 = vmatprep.subr.bf16.mxu0 %v5250_v0  ;;  %v656_v43 = vld [vmem:[%s8886_s1 + $0x1310] sm:$0xff]  ;;  %v657_v35 = vld [vmem:[%s8886_s1 + $0x1318] sm:$0xff]  ;;  %v643_v37 = vld [vmem:[%s8886_s1 + $0x12a8] sm:$0xff]  ;;  %v5292_v45 = vpack.c.bf16 %v625_v33, %v624_v30 }
 0x11f   :  { %5281 = vmatpush3.bf16.msra.mxu1 %v5280_v63  ;;  %v674_v40 = vld [vmem:[%s8886_s1 + $0x13a0] sm:$0xff]  ;;  %v675_v42 = vld [vmem:[%s8886_s1 + $0x13a8] sm:$0xff]  ;;  %v5324_v46 = vpack.c.bf16 %v657_v35, %v656_v43  ;;  %v5294_v47 = vpack.c.bf16 %v643_v37, %v642_v36  ;;  %v644_v53 = vld [vmem:[%s8886_s1 + $0x12b0] sm:$0xff] }
 0x120   :  { %5283 = vmatprep.subr.bf16.mxu1 %v5282_v5  ;;  %v627_v48 = vld [vmem:[%s8886_s1 + $0x1228] sm:$0xff]  ;;  %v658_v49 = vld [vmem:[%s8886_s1 + $0x1320] sm:$0xff]  ;;  %v5326_v50 = vpack.c.bf16 %v675_v42, %v674_v40  ;;  %v645_v54 = vld [vmem:[%s8886_s1 + $0x12b8] sm:$0xff] }
 0x121   :  { %5253 = vmatpush3.bf16.msra.mxu0 %v5252_v13  ;;  %v676_v55 = vld [vmem:[%s8886_s1 + $0x13b0] sm:$0xff]  ;;  %v677_v56 = vld [vmem:[%s8886_s1 + $0x13b8] sm:$0xff]  ;;  %v5298_v58 = vpack.c.bf16 %v645_v54, %v644_v53  ;;  %v646_v32 = vld [vmem:[%s8886_s1 + $0x12c0] sm:$0xff] }
 0x122   :  { %5287 = vmatprep.subr.bf16.mxu0 %v5286_v15  ;;  %v628_v59 = vld [vmem:[%s8886_s1 + $0x1230] sm:$0xff]  ;;  %v629_v51 = vld [vmem:[%s8886_s1 + $0x1238] sm:$0xff]  ;;  %v5330_v61 = vpack.c.bf16 %v677_v56, %v676_v55  ;;  %v647_v63 = vld [vmem:[%s8886_s1 + $0x12c8] sm:$0xff] }
 0x123   :  { %5285 = vmatpush3.bf16.msra.mxu1 %v5284_v14  ;;  %v660_v60 = vld [vmem:[%s8886_s1 + $0x1330] sm:$0xff]  ;;  %v661_v62 = vld [vmem:[%s8886_s1 + $0x1338] sm:$0xff]  ;;  %v678_v0 = vld [vmem:[%s8886_s1 + $0x13c0] sm:$0xff]  ;;  %v5300_v2 = vpack.c.bf16 %v629_v51, %v628_v59  ;;  %v5302_v4 = vpack.c.bf16 %v647_v63, %v646_v32 }
 0x124   :  { %5319 = vmatprep.subr.bf16.mxu1 %v5318_v19  ;;  %2504 = vmatmul.mubr.f32.vlgmr.msra.gmra.mrb[16].mxu0 %v7449_v52  ;;  %v626_v52 = vld [vmem:[%s8886_s1 + $0x1220] sm:$0xff]  ;;  %v679_v1 = vld [vmem:[%s8886_s1 + $0x13c8] sm:$0xff]  ;;  %v5332_v3 = vpack.c.bf16 %v661_v62, %v660_v60  ;;  %v648_v26 = vld [vmem:[%s8886_s1 + $0x12d0] sm:$0xff] }
 0x125   :  { %5289 = vmatpush3.bf16.msra.mxu0 %v5288_v28  ;;  %2643 = vmatprep.mubr.f32.mxu0 %v1172_v38  ;;  %v5296_v57 = vpack.c.bf16 %v627_v48, %v626_v52  ;;  %v630_v5 = vld [vmem:[%s8886_s1 + $0x1240] sm:$0xff]  ;;  %v631_v6 = vld [vmem:[%s8886_s1 + $0x1248] sm:$0xff]  ;;  %v5334_v7 = vpack.c.bf16 %v679_v1, %v678_v0  ;;  %v649_v12 = vld [vmem:[%s8886_s1 + $0x12d8] sm:$0xff] }
 0x126   :  { %2574 = vmatmul.mubr.f32.vlgmr.msra.gmra.mrb[16].mxu1 %v7458_v39  ;;  %5291 = vmatprep.subr.bf16.mxu0 %v5290_v31  ;;  %v659_v39 = vld [vmem:[%s8886_s1 + $0x1328] sm:$0xff]  ;;  %v662_v8 = vld [vmem:[%s8886_s1 + $0x1340] sm:$0xff]  ;;  %v680_v13 = vld [vmem:[%s8886_s1 + $0x13d0] sm:$0xff]  ;;  %v5304_v15 = vpack.c.bf16 %v631_v6, %v630_v5  ;;  %v5306_v17 = vpack.c.bf16 %v649_v12, %v648_v26 }
 0x127   :  { %5321 = vmatpush3.bf16.msra.mxu1 %v5320_v29  ;;  %2713 = vmatprep.mubr.f32.mxu1 %v1173_v44  ;;  %v5328_v41 = vpack.c.bf16 %v659_v39, %v658_v49  ;;  %v663_v9 = vld [vmem:[%s8886_s1 + $0x1348] sm:$0xff]  ;;  %v681_v14 = vld [vmem:[%s8886_s1 + $0x13d8] sm:$0xff]  ;;  %v632_v18 = vld [vmem:[%s8886_s1 + $0x1250] sm:$0xff] }
 0x128   :  { %5323 = vmatprep.subr.bf16.mxu1 %v5322_v34  ;;  %v5336_v16 = vpack.c.bf16 %v663_v9, %v662_v8  ;;  %v633_v19 = vld [vmem:[%s8886_s1 + $0x1258] sm:$0xff]  ;;  %v664_v20 = vld [vmem:[%s8886_s1 + $0x1350] sm:$0xff]  ;;  %v5338_v21 = vpack.c.bf16 %v681_v14, %v680_v13  ;;  %v650_v24 = vld [vmem:[%s8886_s1 + $0x12e0] sm:$0xff] }
 0x129   :  { %5293 = vmatpush3.bf16.msra.mxu0 %v5292_v45  ;;  %v665_v22 = vld [vmem:[%s8886_s1 + $0x1358] sm:$0xff]  ;;  %v651_v25 = vld [vmem:[%s8886_s1 + $0x12e8] sm:$0xff]  ;;  %v682_v28 = vld [vmem:[%s8886_s1 + $0x13e0] sm:$0xff]  ;;  %v5308_v31 = vpack.c.bf16 %v633_v19, %v632_v18 }
 0x12a   :  { %5295 = vmatprep.subr.bf16.mxu0 %v5294_v47  ;;  %v683_v29 = vld [vmem:[%s8886_s1 + $0x13e8] sm:$0xff]  ;;  %v5340_v30 = vpack.c.bf16 %v665_v22, %v664_v20  ;;  %v5310_v33 = vpack.c.bf16 %v651_v25, %v650_v24  ;;  %v634_v43 = vld [vmem:[%s8886_s1 + $0x1260] sm:$0xff]  ;;  %v652_v40 = vld [vmem:[%s8886_s1 + $0x12f0] sm:$0xff] }
 0x12b   :  { %5325 = vmatpush3.bf16.msra.mxu1 %v5324_v46  ;;  %v635_v34 = vld [vmem:[%s8886_s1 + $0x1268] sm:$0xff]  ;;  %v666_v35 = vld [vmem:[%s8886_s1 + $0x1360] sm:$0xff]  ;;  %v5342_v37 = vpack.c.bf16 %v683_v29, %v682_v28  ;;  %v653_v42 = vld [vmem:[%s8886_s1 + $0x12f8] sm:$0xff] }
 0x12c   :  { %5327 = vmatprep.subr.bf16.mxu1 %v5326_v50  ;;  %v667_v38 = vld [vmem:[%s8886_s1 + $0x1368] sm:$0xff]  ;;  %v684_v46 = vld [vmem:[%s8886_s1 + $0x13f0] sm:$0xff]  ;;  %v685_v47 = vld [vmem:[%s8886_s1 + $0x13f8] sm:$0xff]  ;;  %v5312_v49 = vpack.c.bf16 %v635_v34, %v634_v43  ;;  %v5314_v54 = vpack.c.bf16 %v653_v42, %v652_v40 }
 0x12d   :  { %5297 = vmatpush3.bf16.msra.mxu0 %v5296_v57  ;;  %v41_v50 = vld [vmem:[%s8885_s0 + $0x50] sm:$0xff]  ;;  %v5344_v53 = vpack.c.bf16 %v667_v38, %v666_v35  ;;  %v637_v56 = vld [vmem:[%s8886_s1 + $0x1278] sm:$0xff]  ;;  %v702_v51 = vld [vmem:[%s8886_s1 + $0x1480] sm:$0xff] }
 0x12e   :  { %5299 = vmatprep.subr.bf16.mxu0 %v5298_v58  ;;  %v636_v55 = vld [vmem:[%s8886_s1 + $0x1270] sm:$0xff]  ;;  %v5346_v58 = vpack.c.bf16 %v685_v47, %v684_v46  ;;  %v669_v59 = vld [vmem:[%s8886_s1 + $0x1378] sm:$0xff]  ;;  %v703_v60 = vld [vmem:[%s8886_s1 + $0x1488] sm:$0xff]  ;;  %v1174_v62 = vcombine.high %v41_v50, %v41_v50  ;;  %v7869_v9 = vrot.slane %v41_v50, %v5908_v10 }
 0x12f   :  { %5329 = vmatpush3.bf16.msra.mxu1 %v5328_v41  ;;  %v668_v57 = vld [vmem:[%s8886_s1 + $0x1370] sm:$0xff]  ;;  %v5316_v63 = vpack.c.bf16 %v637_v56, %v636_v55  ;;  %v5350_v1 = vpack.c.bf16 %v703_v60, %v702_v51  ;;  %v719_v6 = vld [vmem:[%s8886_s1 + $0x1508] sm:$0xff]  ;;  %v737_v12 = vld [vmem:[%s8886_s1 + $0x1598] sm:$0xff] }
 0x130   :  { %5331 = vmatprep.subr.bf16.mxu1 %v5330_v61  ;;  %v734_v61 = vld [vmem:[%s8886_s1 + $0x1580] sm:$0xff]  ;;  %v5348_v0 = vpack.c.bf16 %v669_v59, %v668_v57  ;;  %v704_v8 = vld [vmem:[%s8886_s1 + $0x1490] sm:$0xff]  ;;  %v7878_v13 = vrot.slane %v1174_v62, %v5908_v10  ;;  %v689_v18 = vld [vmem:[%s8886_s1 + $0x1418] sm:$0xff]  ;;  %v1189_v25 = vcombine.high %v7869_v9, %v7869_v9 }
 0x131   :  { %5301 = vmatpush3.bf16.msra.mxu0 %v5300_v2  ;;  %v686_v2 = vld [vmem:[%s8886_s1 + $0x1400] sm:$0xff]  ;;  %v736_v26 = vld [vmem:[%s8886_s1 + $0x1590] sm:$0xff]  ;;  %v707_v24 = vld [vmem:[%s8886_s1 + $0x14a8] sm:$0xff] }
 0x132   :  { %5303 = vmatprep.subr.bf16.mxu0 %v5302_v4  ;;  %v718_v4 = vld [vmem:[%s8886_s1 + $0x1500] sm:$0xff]  ;;  %v720_v19 = vld [vmem:[%s8886_s1 + $0x1510] sm:$0xff]  ;;  %v5386_v20 = vpack.c.bf16 %v737_v12, %v736_v26  ;;  %v739_v29 = vld [vmem:[%s8886_s1 + $0x15a8] sm:$0xff] }
 0x133   :  { %5333 = vmatpush3.bf16.msra.mxu1 %v5332_v3  ;;  %v687_v3 = vld [vmem:[%s8886_s1 + $0x1408] sm:$0xff]  ;;  %v706_v22 = vld [vmem:[%s8886_s1 + $0x14a0] sm:$0xff]  ;;  %v709_v38 = vld [vmem:[%s8886_s1 + $0x14b8] sm:$0xff] }
 0x134   :  { %5335 = vmatprep.subr.bf16.mxu1 %v5334_v7  ;;  %v705_v7 = vld [vmem:[%s8886_s1 + $0x1498] sm:$0xff]  ;;  %v5352_v14 = vpack.c.bf16 %v687_v3, %v686_v2  ;;  %v738_v28 = vld [vmem:[%s8886_s1 + $0x15a0] sm:$0xff]  ;;  %v5358_v43 = vpack.c.bf16 %v707_v24, %v706_v22  ;;  %v691_v34 = vld [vmem:[%s8886_s1 + $0x1428] sm:$0xff] }
 0x135   :  { %5305 = vmatpush3.bf16.msra.mxu0 %v5304_v15  ;;  %v5384_v15 = vpack.c.bf16 %v719_v6, %v718_v4  ;;  %v722_v35 = vld [vmem:[%s8886_s1 + $0x1520] sm:$0xff]  ;;  %v740_v40 = vld [vmem:[%s8886_s1 + $0x15b0] sm:$0xff]  ;;  %v741_v42 = vld [vmem:[%s8886_s1 + $0x15b8] sm:$0xff] }
 0x136   :  { %5307 = vmatprep.subr.bf16.mxu0 %v5306_v17  ;;  %v688_v17 = vld [vmem:[%s8886_s1 + $0x1410] sm:$0xff]  ;;  %v725_v50 = vld [vmem:[%s8886_s1 + $0x1538] sm:$0xff]  ;;  %v743_v55 = vld [vmem:[%s8886_s1 + $0x15c8] sm:$0xff] }
 0x137   :  { %5337 = vmatpush3.bf16.msra.mxu1 %v5336_v16  ;;  %v3807_v36 = vpop.f32.mrb[4].mxu0  ;;  %v5354_v16 = vpack.c.bf16 %v705_v7, %v704_v8  ;;  %v692_v47 = vld [vmem:[%s8886_s1 + $0x1430] sm:$0xff]  ;;  %v695_v59 = vld [vmem:[%s8886_s1 + $0x1448] sm:$0xff]  ;;  %v726_v51 = vld [vmem:[%s8886_s1 + $0x1540] sm:$0xff] }
 0x138   :  { %5339 = vmatprep.subr.bf16.mxu1 %v5338_v21  ;;  %v3808_v44 = vpop.f32.mrb[5].mxu0  ;;  %v721_v21 = vld [vmem:[%s8886_s1 + $0x1518] sm:$0xff]  ;;  %v696_v4 = vld [vmem:[%s8886_s1 + $0x1450] sm:$0xff]  ;;  %v714_v26 = vld [vmem:[%s8886_s1 + $0x14e0] sm:$0xff] }
 0x139   :  { %v3842_v45 = vpop.f32.mrb[4].mxu1  ;;  %v3809_v52 = vadd.f32 %v3808_v44, %v3807_v36  ;;  %5309 = vmatpush3.bf16.msra.mxu0 %v5308_v31  ;;  %v1190_v31 = vcombine.high %v7878_v13, %v7878_v13  ;;  %v5390_v36 = vpack.c.bf16 %v739_v29, %v738_v28  ;;  %v713_v62 = vld [vmem:[%s8886_s1 + $0x14d8] sm:$0xff]  ;;  %v728_v6 = vld [vmem:[%s8886_s1 + $0x1550] sm:$0xff]  ;;  %v715_v12 = vld [vmem:[%s8886_s1 + $0x14e8] sm:$0xff] }
 0x13a   :  { %v3843_v48 = vpop.f32.mrb[5].mxu1  ;;  %5311 = vmatprep.subr.bf16.mxu0 %v5310_v33  ;;  %v5388_v33 = vpack.c.bf16 %v721_v21, %v720_v19  ;;  %v729_v7 = vld [vmem:[%s8886_s1 + $0x1558] sm:$0xff]  ;;  %v698_v19 = vld [vmem:[%s8886_s1 + $0x1460] sm:$0xff]  ;;  %v716_v28 = vld [vmem:[%s8886_s1 + $0x14f0] sm:$0xff] }
 0x13b   :  { %v3844_v39 = vadd.f32 %v3843_v48, %v3842_v45  ;;  %5341 = vmatpush3.bf16.msra.mxu1 %v5340_v30  ;;  %v1666_v41 = vadd.f32 %v3809_v52, %v7638_v11  ;;  %v735_v11 = vld [vmem:[%s8886_s1 + $0x1588] sm:$0xff]  ;;  %v5356_v30 = vpack.c.bf16 %v689_v18, %v688_v17  ;;  %v693_v52 = vld [vmem:[%s8886_s1 + $0x1438] sm:$0xff]  ;;  %v724_v48 = vld [vmem:[%s8886_s1 + $0x1530] sm:$0xff]  ;;  %v5404_v17 = vpack.c.bf16 %v729_v7, %v728_v6 }
 0x13c   :  { %5343 = vmatprep.subr.bf16.mxu1 %v5342_v37  ;;  %v5382_v5 = vpack.c.bf16 %v735_v11, %v734_v61  ;;  %v708_v37 = vld [vmem:[%s8886_s1 + $0x14b0] sm:$0xff]  ;;  %v5364_v56 = vpack.c.bf16 %v693_v52, %v692_v47  ;;  %v5396_v57 = vpack.c.bf16 %v725_v50, %v724_v48  ;;  %v727_v61 = vld [vmem:[%s8886_s1 + $0x1548] sm:$0xff]  ;;  %v5374_v18 = vpack.c.bf16 %v715_v12, %v714_v26  ;;  %v730_v21 = vld [vmem:[%s8886_s1 + $0x1560] sm:$0xff] }
 0x13d   :  { %v7848_v32 = vadd.f32 %v3844_v39, %v1666_v41  ;;  %5313 = vmatpush3.bf16.msra.mxu0 %v5312_v49  ;;  %v5362_v46 = vpack.c.bf16 %v709_v38, %v708_v37  ;;  %v5394_v49 = vpack.c.bf16 %v741_v42, %v740_v40  ;;  %v710_v39 = vld [vmem:[%s8886_s1 + $0x14c0] sm:$0xff]  ;;  %v712_v11 = vld [vmem:[%s8886_s1 + $0x14d0] sm:$0xff]  ;;  %v5400_v2 = vpack.c.bf16 %v727_v61, %v726_v51  ;;  %v717_v29 = vld [vmem:[%s8886_s1 + $0x14f8] sm:$0xff] }
 0x13e   :  { %5315 = vmatprep.subr.bf16.mxu0 %v5314_v54  ;;  %v742_v54 = vld [vmem:[%s8886_s1 + $0x15c0] sm:$0xff]  ;;  %v5370_v3 = vpack.c.bf16 %v713_v62, %v712_v11  ;;  %v5378_v38 = vpack.c.bf16 %v717_v29, %v716_v28  ;;  %v700_v40 = vld [vmem:[%s8886_s1 + $0x1470] sm:$0xff]  ;;  %v701_v42 = vld [vmem:[%s8886_s1 + $0x1478] sm:$0xff] }
 0x13f   :  { %5345 = vmatpush3.bf16.msra.mxu1 %v5344_v53  ;;  %v711_v53 = vld [vmem:[%s8886_s1 + $0x14c8] sm:$0xff]  ;;  %v5398_v60 = vpack.c.bf16 %v743_v55, %v742_v54  ;;  %v733_v47 = vld [vmem:[%s8886_s1 + $0x1578] sm:$0xff]  ;;  %v766_v52 = vld [vmem:[%s8886_s1 + $0x1680] sm:$0xff] }
 0x140   :  { %5347 = vmatprep.subr.bf16.mxu1 %v5346_v58  ;;  %v5366_v41 = vpack.c.bf16 %v711_v53, %v710_v39  ;;  %v694_v58 = vld [vmem:[%s8886_s1 + $0x1440] sm:$0xff]  ;;  %v767_v48 = vld [vmem:[%s8886_s1 + $0x1688] sm:$0xff]  ;;  %v5380_v53 = vpack.c.bf16 %v701_v42, %v700_v40  ;;  %v768_v51 = vld [vmem:[%s8886_s1 + $0x1690] sm:$0xff] }
 0x141   :  { %5317 = vmatpush3.bf16.msra.mxu0 %v5316_v63  ;;  %v744_v63 = vld [vmem:[%s8886_s1 + $0x15d0] sm:$0xff]  ;;  %v5414_v55 = vpack.c.bf16 %v767_v48, %v766_v52  ;;  %v801_v62 = vld [vmem:[%s8886_s1 + $0x1798] sm:$0xff]  ;;  %v770_v7 = vld [vmem:[%s8886_s1 + $0x16a0] sm:$0xff] }
 0x142   :  { %5351 = vmatprep.subr.bf16.mxu0 %v5350_v1  ;;  %v5368_v1 = vpack.c.bf16 %v695_v59, %v694_v58  ;;  %v783_v59 = vld [vmem:[%s8886_s1 + $0x1708] sm:$0xff]  ;;  %v800_v11 = vld [vmem:[%s8886_s1 + $0x1790] sm:$0xff]  ;;  %v805_v29 = vld [vmem:[%s8886_s1 + $0x17b8] sm:$0xff] }
 0x143   :  { %5349 = vmatpush3.bf16.msra.mxu1 %v5348_v0  ;;  %v745_v0 = vld [vmem:[%s8886_s1 + $0x15d8] sm:$0xff]  ;;  %v5450_v6 = vpack.c.bf16 %v801_v62, %v800_v11  ;;  %v771_v26 = vld [vmem:[%s8886_s1 + $0x16a8] sm:$0xff]  ;;  %v804_v28 = vld [vmem:[%s8886_s1 + $0x17b0] sm:$0xff] }
 0x144   :  { %5383 = vmatprep.subr.bf16.mxu1 %v5382_v5  ;;  %2644 = vmatmul.mubr.f32.vlgmr.msra.gmra.mrb[18].mxu0 %v7659_v23  ;;  %v690_v23 = vld [vmem:[%s8886_s1 + $0x1420] sm:$0xff]  ;;  %v697_v5 = vld [vmem:[%s8886_s1 + $0x1458] sm:$0xff]  ;;  %v5402_v8 = vpack.c.bf16 %v745_v0, %v744_v63  ;;  %v807_v40 = vld [vmem:[%s8886_s1 + $0x17c8] sm:$0xff] }
 0x145   :  { %5353 = vmatpush3.bf16.msra.mxu0 %v5352_v14  ;;  %2783 = vmatprep.mubr.f32.mxu0 %v1189_v25  ;;  %v5360_v44 = vpack.c.bf16 %v691_v34, %v690_v23  ;;  %v746_v14 = vld [vmem:[%s8886_s1 + $0x15e0] sm:$0xff]  ;;  %v731_v25 = vld [vmem:[%s8886_s1 + $0x1568] sm:$0xff]  ;;  %vm8835_vm4 = vmpackc.low %vm3434_vm2, %vm5717_vm3 }
 0x146   :  { %2714 = vmatmul.mubr.f32.vlgmr.msra.gmra.mrb[18].mxu1 %v7668_v27  ;;  %5355 = vmatprep.subr.bf16.mxu0 %v5354_v16  ;;  %v723_v27 = vld [vmem:[%s8886_s1 + $0x1528] sm:$0xff]  ;;  %v5372_v16 = vpack.c.bf16 %v697_v5, %v696_v4  ;;  %v5408_v37 = vpack.c.bf16 %v731_v25, %v730_v21  ;;  %v753_v4 = vld [vmem:[%s8886_s1 + $0x1618] sm:$0xff]  ;;  %v784_v5 = vld [vmem:[%s8886_s1 + $0x1710] sm:$0xff] }
 0x147   :  { %5385 = vmatpush3.bf16.msra.mxu1 %v5384_v15  ;;  %2853 = vmatprep.mubr.f32.mxu1 %v1190_v31  ;;  %v5392_v45 = vpack.c.bf16 %v723_v27, %v722_v35  ;;  %v747_v15 = vld [vmem:[%s8886_s1 + $0x15e8] sm:$0xff]  ;;  %v786_v21 = vld [vmem:[%s8886_s1 + $0x1720] sm:$0xff]  ;;  %v773_v25 = vld [vmem:[%s8886_s1 + $0x16b8] sm:$0xff] }
 0x148   :  { %5387 = vmatprep.subr.bf16.mxu1 %v5386_v20  ;;  %v699_v20 = vld [vmem:[%s8886_s1 + $0x1468] sm:$0xff]  ;;  %v5406_v24 = vpack.c.bf16 %v747_v15, %v746_v14  ;;  %v802_v14 = vld [vmem:[%s8886_s1 + $0x17a0] sm:$0xff] }
 0x149   :  { %5357 = vmatpush3.bf16.msra.mxu0 %v5356_v30  ;;  %v5376_v35 = vpack.c.bf16 %v699_v20, %v698_v19  ;;  %v803_v15 = vld [vmem:[%s8886_s1 + $0x17a8] sm:$0xff]  ;;  %v5422_v19 = vpack.c.bf16 %v771_v26, %v770_v7  ;;  %v790_v52 = vld [vmem:[%s8886_s1 + $0x1740] sm:$0xff] }
 0x14a   :  { %5359 = vmatprep.subr.bf16.mxu0 %v5358_v43  ;;  %v749_v43 = vld [vmem:[%s8886_s1 + $0x15f8] sm:$0xff]  ;;  %v755_v20 = vld [vmem:[%s8886_s1 + $0x1628] sm:$0xff]  ;;  %v778_v11 = vld [vmem:[%s8886_s1 + $0x16e0] sm:$0xff] }
 0x14b   :  { %5389 = vmatpush3.bf16.msra.mxu1 %v5388_v33  ;;  %v748_v33 = vld [vmem:[%s8886_s1 + $0x15f0] sm:$0xff]  ;;  %v779_v62 = vld [vmem:[%s8886_s1 + $0x16e8] sm:$0xff] }
 0x14c   :  { %5391 = vmatprep.subr.bf16.mxu1 %v5390_v36  ;;  %v42_v36 = vld [vmem:[%s8885_s0 + $0x58] sm:$0xff] }
 0x14d   :  { %5361 = vmatpush3.bf16.msra.mxu0 %v5360_v44  ;;  %v732_v44 = vld [vmem:[%s8886_s1 + $0x1570] sm:$0xff]  ;;  %v1191_v50 = vcombine.high %v42_v36, %v42_v36  ;;  %v8079_v61 = vrot.slane %v42_v36, %v5908_v10  ;;  %v789_v36 = vld [vmem:[%s8886_s1 + $0x1738] sm:$0xff] }
 0x14e   :  { %5363 = vmatprep.subr.bf16.mxu0 %v5362_v46  ;;  %v5410_v46 = vpack.c.bf16 %v749_v43, %v748_v33  ;;  %v5412_v54 = vpack.c.bf16 %v733_v47, %v732_v44  ;;  %v756_v43 = vld [vmem:[%s8886_s1 + $0x1630] sm:$0xff]  ;;  %v759_v47 = vld [vmem:[%s8886_s1 + $0x1648] sm:$0xff] }
 0x14f   :  { %5393 = vmatpush3.bf16.msra.mxu1 %v5392_v45  ;;  %v8088_v63 = vrot.slane %v1191_v50, %v5908_v10  ;;  %v1206_v12 = vcombine.high %v8079_v61, %v8079_v61  ;;  %v777_v50 = vld [vmem:[%s8886_s1 + $0x16d8] sm:$0xff] }
 0x150   :  { %5395 = vmatprep.subr.bf16.mxu1 %v5394_v49  ;;  %v798_v49 = vld [vmem:[%s8886_s1 + $0x1780] sm:$0xff] }
 0x151   :  { %5365 = vmatpush3.bf16.msra.mxu0 %v5364_v56  ;;  %v750_v56 = vld [vmem:[%s8886_s1 + $0x1600] sm:$0xff] }
 0x152   :  { %5367 = vmatprep.subr.bf16.mxu0 %v5366_v41  ;;  %v782_v41 = vld [vmem:[%s8886_s1 + $0x1700] sm:$0xff] }
 0x153   :  { %5397 = vmatpush3.bf16.msra.mxu1 %v5396_v57  ;;  %v751_v57 = vld [vmem:[%s8886_s1 + $0x1608] sm:$0xff] }
 0x154   :  { %5399 = vmatprep.subr.bf16.mxu1 %v5398_v60  ;;  %v769_v60 = vld [vmem:[%s8886_s1 + $0x1698] sm:$0xff]  ;;  %v5416_v0 = vpack.c.bf16 %v751_v57, %v750_v56 }
 0x155   :  { %5369 = vmatpush3.bf16.msra.mxu0 %v5368_v1  ;;  %v5448_v1 = vpack.c.bf16 %v783_v59, %v782_v41  ;;  %v760_v41 = vld [vmem:[%s8886_s1 + $0x1650] sm:$0xff] }
 0x156   :  { %5371 = vmatprep.subr.bf16.mxu0 %v5370_v3  ;;  %v752_v3 = vld [vmem:[%s8886_s1 + $0x1610] sm:$0xff] }
 0x157   :  { %5401 = vmatpush3.bf16.msra.mxu1 %v5400_v2  ;;  %v3877_v22 = vpop.f32.mrb[6].mxu0  ;;  %v5418_v2 = vpack.c.bf16 %v769_v60, %v768_v51  ;;  %v792_v59 = vld [vmem:[%s8886_s1 + $0x1750] sm:$0xff]  ;;  %v793_v60 = vld [vmem:[%s8886_s1 + $0x1758] sm:$0xff] }
 0x158   :  { %5403 = vmatprep.subr.bf16.mxu1 %v5402_v8  ;;  %v3878_v31 = vpop.f32.mrb[7].mxu0  ;;  %v785_v8 = vld [vmem:[%s8886_s1 + $0x1718] sm:$0xff] }
 0x159   :  { %v3912_v30 = vpop.f32.mrb[6].mxu1  ;;  %v3879_v23 = vadd.f32 %v3878_v31, %v3877_v22  ;;  %5373 = vmatpush3.bf16.msra.mxu0 %v5372_v16  ;;  %v1207_v16 = vcombine.high %v8088_v63, %v8088_v63  ;;  %v5454_v22 = vpack.c.bf16 %v803_v15, %v802_v14  ;;  %v780_v14 = vld [vmem:[%s8886_s1 + $0x16f0] sm:$0xff]  ;;  %v781_v15 = vld [vmem:[%s8886_s1 + $0x16f8] sm:$0xff] }
 0x15a   :  { %v3913_v34 = vpop.f32.mrb[7].mxu1  ;;  %5375 = vmatprep.subr.bf16.mxu0 %v5374_v18  ;;  %v5452_v18 = vpack.c.bf16 %v785_v8, %v784_v5  ;;  %v762_v5 = vld [vmem:[%s8886_s1 + $0x1660] sm:$0xff] }
 0x15b   :  { %v3914_v27 = vadd.f32 %v3913_v34, %v3912_v30  ;;  %5405 = vmatpush3.bf16.msra.mxu1 %v5404_v17  ;;  %v1806_v45 = vadd.f32 %v3879_v23, %v7848_v32  ;;  %v799_v32 = vld [vmem:[%s8886_s1 + $0x1788] sm:$0xff]  ;;  %v5420_v17 = vpack.c.bf16 %v753_v4, %v752_v3  ;;  %v757_v23 = vld [vmem:[%s8886_s1 + $0x1638] sm:$0xff]  ;;  %v788_v34 = vld [vmem:[%s8886_s1 + $0x1730] sm:$0xff]  ;;  %v5468_v3 = vpack.c.bf16 %v793_v60, %v792_v59 }
 0x15c   :  { %5407 = vmatprep.subr.bf16.mxu1 %v5406_v24  ;;  %v5446_v58 = vpack.c.bf16 %v799_v32, %v798_v49  ;;  %v772_v24 = vld [vmem:[%s8886_s1 + $0x16b0] sm:$0xff]  ;;  %v5428_v42 = vpack.c.bf16 %v757_v23, %v756_v43  ;;  %v5460_v44 = vpack.c.bf16 %v789_v36, %v788_v34  ;;  %v791_v49 = vld [vmem:[%s8886_s1 + $0x1748] sm:$0xff]  ;;  %v5438_v4 = vpack.c.bf16 %v779_v62, %v778_v11  ;;  %v794_v8 = vld [vmem:[%s8886_s1 + $0x1760] sm:$0xff] }
 0x15d   :  { %v8058_v39 = vadd.f32 %v3914_v27, %v1806_v45  ;;  %5377 = vmatpush3.bf16.msra.mxu0 %v5376_v35  ;;  %v5426_v33 = vpack.c.bf16 %v773_v25, %v772_v24  ;;  %v5458_v35 = vpack.c.bf16 %v805_v29, %v804_v28  ;;  %v774_v27 = vld [vmem:[%s8886_s1 + $0x16c0] sm:$0xff]  ;;  %v776_v32 = vld [vmem:[%s8886_s1 + $0x16d0] sm:$0xff]  ;;  %v5464_v56 = vpack.c.bf16 %v791_v49, %v790_v52  ;;  %v765_v29 = vld [vmem:[%s8886_s1 + $0x1678] sm:$0xff] }
 0x15e   :  { %5379 = vmatprep.subr.bf16.mxu0 %v5378_v38  ;;  %v806_v38 = vld [vmem:[%s8886_s1 + $0x17c0] sm:$0xff]  ;;  %v5434_v57 = vpack.c.bf16 %v777_v50, %v776_v32  ;;  %v5442_v25 = vpack.c.bf16 %v781_v15, %v780_v14  ;;  %v764_v28 = vld [vmem:[%s8886_s1 + $0x1670] sm:$0xff]  ;;  %v797_v43 = vld [vmem:[%s8886_s1 + $0x1778] sm:$0xff] }
 0x15f   :  { %5409 = vmatpush3.bf16.msra.mxu1 %v5408_v37  ;;  %v775_v37 = vld [vmem:[%s8886_s1 + $0x16c8] sm:$0xff]  ;;  %v5462_v48 = vpack.c.bf16 %v807_v40, %v806_v38  ;;  %v830_v23 = vld [vmem:[%s8886_s1 + $0x1880] sm:$0xff]  ;;  %v832_v52 = vld [vmem:[%s8886_s1 + $0x1890] sm:$0xff] }
 0x160   :  { %5411 = vmatprep.subr.bf16.mxu1 %v5410_v46  ;;  %v5430_v45 = vpack.c.bf16 %v775_v37, %v774_v27  ;;  %v758_v46 = vld [vmem:[%s8886_s1 + $0x1640] sm:$0xff]  ;;  %v831_v34 = vld [vmem:[%s8886_s1 + $0x1888] sm:$0xff]  ;;  %v5444_v37 = vpack.c.bf16 %v765_v29, %v764_v28  ;;  %v864_v32 = vld [vmem:[%s8886_s1 + $0x1990] sm:$0xff] }
 0x161   :  { %5381 = vmatpush3.bf16.msra.mxu0 %v5380_v53  ;;  %v808_v53 = vld [vmem:[%s8886_s1 + $0x17d0] sm:$0xff]  ;;  %v5478_v40 = vpack.c.bf16 %v831_v34, %v830_v23  ;;  %v865_v50 = vld [vmem:[%s8886_s1 + $0x1998] sm:$0xff]  ;;  %v834_v60 = vld [vmem:[%s8886_s1 + $0x18a0] sm:$0xff] }
 0x162   :  { %5415 = vmatprep.subr.bf16.mxu0 %v5414_v55  ;;  %v5432_v55 = vpack.c.bf16 %v759_v47, %v758_v46  ;;  %v847_v47 = vld [vmem:[%s8886_s1 + $0x1908] sm:$0xff]  ;;  %v5514_v59 = vpack.c.bf16 %v865_v50, %v864_v32  ;;  %v868_v14 = vld [vmem:[%s8886_s1 + $0x19b0] sm:$0xff]  ;;  %v869_v15 = vld [vmem:[%s8886_s1 + $0x19b8] sm:$0xff] }
 0x163   :  { %5413 = vmatpush3.bf16.msra.mxu1 %v5412_v54  ;;  %v809_v54 = vld [vmem:[%s8886_s1 + $0x17d8] sm:$0xff]  ;;  %v835_v11 = vld [vmem:[%s8886_s1 + $0x18a8] sm:$0xff]  ;;  %v854_v23 = vld [vmem:[%s8886_s1 + $0x1940] sm:$0xff] }
 0x164   :  { %5447 = vmatprep.subr.bf16.mxu1 %v5446_v58  ;;  %2784 = vmatmul.mubr.f32.vlgmr.msra.gmra.mrb[20].mxu0 %v7869_v9  ;;  %v754_v9 = vld [vmem:[%s8886_s1 + $0x1620] sm:$0xff]  ;;  %v761_v58 = vld [vmem:[%s8886_s1 + $0x1658] sm:$0xff]  ;;  %v5466_v51 = vpack.c.bf16 %v809_v54, %v808_v53  ;;  %v871_v28 = vld [vmem:[%s8886_s1 + $0x19c8] sm:$0xff] }
 0x165   :  { %5417 = vmatpush3.bf16.msra.mxu0 %v5416_v0  ;;  %2923 = vmatprep.mubr.f32.mxu0 %v1206_v12  ;;  %v5424_v31 = vpack.c.bf16 %v755_v20, %v754_v9  ;;  %v810_v0 = vld [vmem:[%s8886_s1 + $0x17e0] sm:$0xff]  ;;  %v795_v12 = vld [vmem:[%s8886_s1 + $0x1768] sm:$0xff] }
 0x166   :  { %2854 = vmatmul.mubr.f32.vlgmr.msra.gmra.mrb[20].mxu1 %v7878_v13  ;;  %5419 = vmatprep.subr.bf16.mxu0 %v5418_v2  ;;  %v787_v13 = vld [vmem:[%s8886_s1 + $0x1728] sm:$0xff]  ;;  %v5436_v2 = vpack.c.bf16 %v761_v58, %v760_v41  ;;  %v5472_v24 = vpack.c.bf16 %v795_v12, %v794_v8  ;;  %v817_v41 = vld [vmem:[%s8886_s1 + $0x1818] sm:$0xff]  ;;  %v848_v58 = vld [vmem:[%s8886_s1 + $0x1910] sm:$0xff] }
 0x167   :  { %5449 = vmatpush3.bf16.msra.mxu1 %v5448_v1  ;;  %2993 = vmatprep.mubr.f32.mxu1 %v1207_v16  ;;  %v5456_v30 = vpack.c.bf16 %v787_v13, %v786_v21  ;;  %v811_v1 = vld [vmem:[%s8886_s1 + $0x17e8] sm:$0xff]  ;;  %v850_v8 = vld [vmem:[%s8886_s1 + $0x1920] sm:$0xff]  ;;  %v837_v12 = vld [vmem:[%s8886_s1 + $0x18b8] sm:$0xff] }
 0x168   :  { %5451 = vmatprep.subr.bf16.mxu1 %v5450_v6  ;;  %v763_v6 = vld [vmem:[%s8886_s1 + $0x1668] sm:$0xff]  ;;  %v5470_v26 = vpack.c.bf16 %v811_v1, %v810_v0  ;;  %v866_v0 = vld [vmem:[%s8886_s1 + $0x19a0] sm:$0xff] }
 0x169   :  { %5421 = vmatpush3.bf16.msra.mxu0 %v5420_v17  ;;  %v5440_v21 = vpack.c.bf16 %v763_v6, %v762_v5  ;;  %v867_v1 = vld [vmem:[%s8886_s1 + $0x19a8] sm:$0xff]  ;;  %v5486_v5 = vpack.c.bf16 %v835_v11, %v834_v60  ;;  %v842_v32 = vld [vmem:[%s8886_s1 + $0x18e0] sm:$0xff] }
 0x16a   :  { %5423 = vmatprep.subr.bf16.mxu0 %v5422_v19  ;;  %v813_v19 = vld [vmem:[%s8886_s1 + $0x17f8] sm:$0xff]  ;;  %v819_v6 = vld [vmem:[%s8886_s1 + $0x1828] sm:$0xff] }
 0x16b   :  { %5453 = vmatpush3.bf16.msra.mxu1 %v5452_v18  ;;  %v812_v18 = vld [vmem:[%s8886_s1 + $0x17f0] sm:$0xff]  ;;  %v843_v50 = vld [vmem:[%s8886_s1 + $0x18e8] sm:$0xff] }
 0x16c   :  { %5455 = vmatprep.subr.bf16.mxu1 %v5454_v22  ;;  %v43_v22 = vld [vmem:[%s8885_s0 + $0x60] sm:$0xff] }
 0x16d   :  { %5425 = vmatpush3.bf16.msra.mxu0 %v5424_v31  ;;  %v796_v31 = vld [vmem:[%s8886_s1 + $0x1770] sm:$0xff]  ;;  %v1208_v36 = vcombine.high %v43_v22, %v43_v22  ;;  %v8289_v49 = vrot.slane %v43_v22, %v5908_v10  ;;  %v853_v22 = vld [vmem:[%s8886_s1 + $0x1938] sm:$0xff] }
 0x16e   :  { %5427 = vmatprep.subr.bf16.mxu0 %v5426_v33  ;;  %v5474_v33 = vpack.c.bf16 %v813_v19, %v812_v18  ;;  %v5476_v38 = vpack.c.bf16 %v797_v43, %v796_v31  ;;  %v820_v19 = vld [vmem:[%s8886_s1 + $0x1830] sm:$0xff]  ;;  %v823_v43 = vld [vmem:[%s8886_s1 + $0x1848] sm:$0xff] }
 0x16f   :  { %5457 = vmatpush3.bf16.msra.mxu1 %v5456_v30  ;;  %v8298_v53 = vrot.slane %v1208_v36, %v5908_v10  ;;  %v1223_v62 = vcombine.high %v8289_v49, %v8289_v49  ;;  %v841_v36 = vld [vmem:[%s8886_s1 + $0x18d8] sm:$0xff] }
 0x170   :  { %5459 = vmatprep.subr.bf16.mxu1 %v5458_v35  ;;  %v862_v35 = vld [vmem:[%s8886_s1 + $0x1980] sm:$0xff] }
 0x171   :  { %5429 = vmatpush3.bf16.msra.mxu0 %v5428_v42  ;;  %v814_v42 = vld [vmem:[%s8886_s1 + $0x1800] sm:$0xff] }
 0x172   :  { %5431 = vmatprep.subr.bf16.mxu0 %v5430_v45  ;;  %v846_v45 = vld [vmem:[%s8886_s1 + $0x1900] sm:$0xff] }
 0x173   :  { %5461 = vmatpush3.bf16.msra.mxu1 %v5460_v44  ;;  %v815_v44 = vld [vmem:[%s8886_s1 + $0x1808] sm:$0xff] }
 0x174   :  { %5463 = vmatprep.subr.bf16.mxu1 %v5462_v48  ;;  %v833_v48 = vld [vmem:[%s8886_s1 + $0x1898] sm:$0xff]  ;;  %v5480_v54 = vpack.c.bf16 %v815_v44, %v814_v42 }
 0x175   :  { %5433 = vmatpush3.bf16.msra.mxu0 %v5432_v55  ;;  %v5512_v55 = vpack.c.bf16 %v847_v47, %v846_v45  ;;  %v824_v45 = vld [vmem:[%s8886_s1 + $0x1850] sm:$0xff] }
 0x176   :  { %5435 = vmatprep.subr.bf16.mxu0 %v5434_v57  ;;  %v816_v57 = vld [vmem:[%s8886_s1 + $0x1810] sm:$0xff] }
 0x177   :  { %5465 = vmatpush3.bf16.msra.mxu1 %v5464_v56  ;;  %v3947_v7 = vpop.f32.mrb[8].mxu0  ;;  %v5482_v56 = vpack.c.bf16 %v833_v48, %v832_v52  ;;  %v856_v47 = vld [vmem:[%s8886_s1 + $0x1950] sm:$0xff]  ;;  %v857_v48 = vld [vmem:[%s8886_s1 + $0x1958] sm:$0xff] }
 0x178   :  { %5467 = vmatprep.subr.bf16.mxu1 %v5466_v51  ;;  %v3948_v16 = vpop.f32.mrb[9].mxu0  ;;  %v849_v51 = vld [vmem:[%s8886_s1 + $0x1918] sm:$0xff] }
 0x179   :  { %v3982_v17 = vpop.f32.mrb[8].mxu1  ;;  %v3949_v9 = vadd.f32 %v3948_v16, %v3947_v7  ;;  %5437 = vmatpush3.bf16.msra.mxu0 %v5436_v2  ;;  %v1224_v2 = vcombine.high %v8298_v53, %v8298_v53  ;;  %v5518_v7 = vpack.c.bf16 %v867_v1, %v866_v0  ;;  %v844_v0 = vld [vmem:[%s8886_s1 + $0x18f0] sm:$0xff]  ;;  %v845_v1 = vld [vmem:[%s8886_s1 + $0x18f8] sm:$0xff] }
 0x17a   :  { %v3983_v20 = vpop.f32.mrb[9].mxu1  ;;  %5439 = vmatprep.subr.bf16.mxu0 %v5438_v4  ;;  %v5516_v4 = vpack.c.bf16 %v849_v51, %v848_v58  ;;  %v826_v58 = vld [vmem:[%s8886_s1 + $0x1860] sm:$0xff] }
 0x17b   :  { %v3984_v13 = vadd.f32 %v3983_v20, %v3982_v17  ;;  %5469 = vmatpush3.bf16.msra.mxu1 %v5468_v3  ;;  %v1946_v30 = vadd.f32 %v3949_v9, %v8058_v39  ;;  %v863_v39 = vld [vmem:[%s8886_s1 + $0x1988] sm:$0xff]  ;;  %v5484_v3 = vpack.c.bf16 %v817_v41, %v816_v57  ;;  %v821_v9 = vld [vmem:[%s8886_s1 + $0x1838] sm:$0xff]  ;;  %v852_v20 = vld [vmem:[%s8886_s1 + $0x1930] sm:$0xff]  ;;  %v5532_v57 = vpack.c.bf16 %v857_v48, %v856_v47 }
 0x17c   :  { %5471 = vmatprep.subr.bf16.mxu1 %v5470_v26  ;;  %v5510_v46 = vpack.c.bf16 %v863_v39, %v862_v35  ;;  %v836_v26 = vld [vmem:[%s8886_s1 + $0x18b0] sm:$0xff]  ;;  %v5492_v29 = vpack.c.bf16 %v821_v9, %v820_v19  ;;  %v5524_v31 = vpack.c.bf16 %v853_v22, %v852_v20  ;;  %v855_v35 = vld [vmem:[%s8886_s1 + $0x1948] sm:$0xff]  ;;  %v5502_v41 = vpack.c.bf16 %v843_v50, %v842_v32  ;;  %v858_v51 = vld [vmem:[%s8886_s1 + $0x1960] sm:$0xff] }
 0x17d   :  { %v8268_v27 = vadd.f32 %v3984_v13, %v1946_v30  ;;  %5441 = vmatpush3.bf16.msra.mxu0 %v5440_v21  ;;  %v5490_v18 = vpack.c.bf16 %v837_v12, %v836_v26  ;;  %v5522_v21 = vpack.c.bf16 %v869_v15, %v868_v14  ;;  %v838_v13 = vld [vmem:[%s8886_s1 + $0x18c0] sm:$0xff]  ;;  %v840_v39 = vld [vmem:[%s8886_s1 + $0x18d0] sm:$0xff]  ;;  %v5528_v42 = vpack.c.bf16 %v855_v35, %v854_v23  ;;  %v829_v15 = vld [vmem:[%s8886_s1 + $0x1878] sm:$0xff] }
 0x17e   :  { %5443 = vmatprep.subr.bf16.mxu0 %v5442_v25  ;;  %v870_v25 = vld [vmem:[%s8886_s1 + $0x19c0] sm:$0xff]  ;;  %v5498_v44 = vpack.c.bf16 %v841_v36, %v840_v39  ;;  %v5506_v12 = vpack.c.bf16 %v845_v1, %v844_v0  ;;  %v828_v14 = vld [vmem:[%s8886_s1 + $0x1870] sm:$0xff]  ;;  %v861_v19 = vld [vmem:[%s8886_s1 + $0x1978] sm:$0xff] }
 0x17f   :  { %5473 = vmatpush3.bf16.msra.mxu1 %v5472_v24  ;;  %v839_v24 = vld [vmem:[%s8886_s1 + $0x18c8] sm:$0xff]  ;;  %v5526_v34 = vpack.c.bf16 %v871_v28, %v870_v25  ;;  %v894_v9 = vld [vmem:[%s8886_s1 + $0x1a80] sm:$0xff]  ;;  %v896_v23 = vld [vmem:[%s8886_s1 + $0x1a90] sm:$0xff] }
 0x180   :  { %5475 = vmatprep.subr.bf16.mxu1 %v5474_v33  ;;  %v5494_v30 = vpack.c.bf16 %v839_v24, %v838_v13  ;;  %v822_v33 = vld [vmem:[%s8886_s1 + $0x1840] sm:$0xff]  ;;  %v895_v20 = vld [vmem:[%s8886_s1 + $0x1a88] sm:$0xff]  ;;  %v5508_v24 = vpack.c.bf16 %v829_v15, %v828_v14  ;;  %v928_v39 = vld [vmem:[%s8886_s1 + $0x1b90] sm:$0xff] }
 0x181   :  { %5445 = vmatpush3.bf16.msra.mxu0 %v5444_v37  ;;  %v872_v37 = vld [vmem:[%s8886_s1 + $0x19d0] sm:$0xff]  ;;  %v5542_v28 = vpack.c.bf16 %v895_v20, %v894_v9  ;;  %v929_v36 = vld [vmem:[%s8886_s1 + $0x1b98] sm:$0xff]  ;;  %v898_v48 = vld [vmem:[%s8886_s1 + $0x1aa0] sm:$0xff] }
 0x182   :  { %5479 = vmatprep.subr.bf16.mxu0 %v5478_v40  ;;  %v5496_v40 = vpack.c.bf16 %v823_v43, %v822_v33  ;;  %v911_v43 = vld [vmem:[%s8886_s1 + $0x1b08] sm:$0xff]  ;;  %v5578_v47 = vpack.c.bf16 %v929_v36, %v928_v39  ;;  %v932_v0 = vld [vmem:[%s8886_s1 + $0x1bb0] sm:$0xff]  ;;  %v933_v1 = vld [vmem:[%s8886_s1 + $0x1bb8] sm:$0xff] }
 0x183   :  { %5477 = vmatpush3.bf16.msra.mxu1 %v5476_v38  ;;  %v873_v38 = vld [vmem:[%s8886_s1 + $0x19d8] sm:$0xff]  ;;  %v899_v32 = vld [vmem:[%s8886_s1 + $0x1aa8] sm:$0xff]  ;;  %v918_v9 = vld [vmem:[%s8886_s1 + $0x1b40] sm:$0xff] }
 0x184   :  { %5511 = vmatprep.subr.bf16.mxu1 %v5510_v46  ;;  %2924 = vmatmul.mubr.f32.vlgmr.msra.gmra.mrb[22].mxu0 %v8079_v61  ;;  %v818_v61 = vld [vmem:[%s8886_s1 + $0x1820] sm:$0xff]  ;;  %v825_v46 = vld [vmem:[%s8886_s1 + $0x1858] sm:$0xff]  ;;  %v5530_v52 = vpack.c.bf16 %v873_v38, %v872_v37  ;;  %v935_v14 = vld [vmem:[%s8886_s1 + $0x1bc8] sm:$0xff] }
 0x185   :  { %5481 = vmatpush3.bf16.msra.mxu0 %v5480_v54  ;;  %3063 = vmatprep.mubr.f32.mxu0 %v1223_v62  ;;  %v5488_v16 = vpack.c.bf16 %v819_v6, %v818_v61  ;;  %v874_v54 = vld [vmem:[%s8886_s1 + $0x19e0] sm:$0xff]  ;;  %v859_v62 = vld [vmem:[%s8886_s1 + $0x1968] sm:$0xff] }
 0x186   :  { %2994 = vmatmul.mubr.f32.vlgmr.msra.gmra.mrb[22].mxu1 %v8088_v63  ;;  %5483 = vmatprep.subr.bf16.mxu0 %v5482_v56  ;;  %v851_v63 = vld [vmem:[%s8886_s1 + $0x1928] sm:$0xff]  ;;  %v5500_v56 = vpack.c.bf16 %v825_v46, %v824_v45  ;;  %v5536_v26 = vpack.c.bf16 %v859_v62, %v858_v51  ;;  %v881_v45 = vld [vmem:[%s8886_s1 + $0x1a18] sm:$0xff]  ;;  %v912_v46 = vld [vmem:[%s8886_s1 + $0x1b10] sm:$0xff] }
 0x187   :  { %5513 = vmatpush3.bf16.msra.mxu1 %v5512_v55  ;;  %3133 = vmatprep.mubr.f32.mxu1 %v1224_v2  ;;  %v5520_v17 = vpack.c.bf16 %v851_v63, %v850_v8  ;;  %v875_v55 = vld [vmem:[%s8886_s1 + $0x19e8] sm:$0xff]  ;;  %v914_v51 = vld [vmem:[%s8886_s1 + $0x1b20] sm:$0xff]  ;;  %v901_v62 = vld [vmem:[%s8886_s1 + $0x1ab8] sm:$0xff] }
 0x188   :  { %5515 = vmatprep.subr.bf16.mxu1 %v5514_v59  ;;  %v827_v59 = vld [vmem:[%s8886_s1 + $0x1868] sm:$0xff]  ;;  %v5534_v11 = vpack.c.bf16 %v875_v55, %v874_v54  ;;  %v930_v54 = vld [vmem:[%s8886_s1 + $0x1ba0] sm:$0xff] }
 0x189   :  { %5485 = vmatpush3.bf16.msra.mxu0 %v5484_v3  ;;  %v5504_v8 = vpack.c.bf16 %v827_v59, %v826_v58  ;;  %v931_v55 = vld [vmem:[%s8886_s1 + $0x1ba8] sm:$0xff]  ;;  %v5550_v58 = vpack.c.bf16 %v899_v32, %v898_v48  ;;  %v906_v39 = vld [vmem:[%s8886_s1 + $0x1ae0] sm:$0xff] }
 0x18a   :  { %5487 = vmatprep.subr.bf16.mxu0 %v5486_v5  ;;  %v877_v5 = vld [vmem:[%s8886_s1 + $0x19f8] sm:$0xff]  ;;  %v883_v59 = vld [vmem:[%s8886_s1 + $0x1a28] sm:$0xff] }
 0x18b   :  { %5517 = vmatpush3.bf16.msra.mxu1 %v5516_v4  ;;  %v876_v4 = vld [vmem:[%s8886_s1 + $0x19f0] sm:$0xff]  ;;  %v907_v36 = vld [vmem:[%s8886_s1 + $0x1ae8] sm:$0xff] }
 0x18c   :  { %5519 = vmatprep.subr.bf16.mxu1 %v5518_v7  ;;  %v44_v7 = vld [vmem:[%s8885_s0 + $0x68] sm:$0xff] }
 0x18d   :  { %5489 = vmatpush3.bf16.msra.mxu0 %v5488_v16  ;;  %v860_v16 = vld [vmem:[%s8886_s1 + $0x1970] sm:$0xff]  ;;  %v1225_v22 = vcombine.high %v44_v7, %v44_v7  ;;  %v8499_v35 = vrot.slane %v44_v7, %v5908_v10  ;;  %v917_v7 = vld [vmem:[%s8886_s1 + $0x1b38] sm:$0xff] }
 0x18e   :  { %5491 = vmatprep.subr.bf16.mxu0 %v5490_v18  ;;  %v5538_v18 = vpack.c.bf16 %v877_v5, %v876_v4  ;;  %v5540_v25 = vpack.c.bf16 %v861_v19, %v860_v16  ;;  %v884_v5 = vld [vmem:[%s8886_s1 + $0x1a30] sm:$0xff]  ;;  %v887_v19 = vld [vmem:[%s8886_s1 + $0x1a48] sm:$0xff] }
 0x18f   :  { %5521 = vmatpush3.bf16.msra.mxu1 %v5520_v17  ;;  %v8508_v37 = vrot.slane %v1225_v22, %v5908_v10  ;;  %v1240_v50 = vcombine.high %v8499_v35, %v8499_v35  ;;  %v905_v22 = vld [vmem:[%s8886_s1 + $0x1ad8] sm:$0xff] }
 0x190   :  { %5523 = vmatprep.subr.bf16.mxu1 %v5522_v21  ;;  %v926_v21 = vld [vmem:[%s8886_s1 + $0x1b80] sm:$0xff] }
 0x191   :  { %5493 = vmatpush3.bf16.msra.mxu0 %v5492_v29  ;;  %v878_v29 = vld [vmem:[%s8886_s1 + $0x1a00] sm:$0xff] }
 0x192   :  { %5495 = vmatprep.subr.bf16.mxu0 %v5494_v30  ;;  %v910_v30 = vld [vmem:[%s8886_s1 + $0x1b00] sm:$0xff] }
 0x193   :  { %5525 = vmatpush3.bf16.msra.mxu1 %v5524_v31  ;;  %v879_v31 = vld [vmem:[%s8886_s1 + $0x1a08] sm:$0xff] }
 0x194   :  { %5527 = vmatprep.subr.bf16.mxu1 %v5526_v34  ;;  %v897_v34 = vld [vmem:[%s8886_s1 + $0x1a98] sm:$0xff]  ;;  %v5544_v38 = vpack.c.bf16 %v879_v31, %v878_v29 }
 0x195   :  { %5497 = vmatpush3.bf16.msra.mxu0 %v5496_v40  ;;  %v5576_v40 = vpack.c.bf16 %v911_v43, %v910_v30  ;;  %v888_v30 = vld [vmem:[%s8886_s1 + $0x1a50] sm:$0xff] }
 0x196   :  { %5499 = vmatprep.subr.bf16.mxu0 %v5498_v44  ;;  %v880_v44 = vld [vmem:[%s8886_s1 + $0x1a10] sm:$0xff] }
 0x197   :  { %5529 = vmatpush3.bf16.msra.mxu1 %v5528_v42  ;;  %v4017_v60 = vpop.f32.mrb[10].mxu0  ;;  %v5546_v42 = vpack.c.bf16 %v897_v34, %v896_v23  ;;  %v920_v43 = vld [vmem:[%s8886_s1 + $0x1b50] sm:$0xff]  ;;  %v921_v34 = vld [vmem:[%s8886_s1 + $0x1b58] sm:$0xff] }
 0x198   :  { %5531 = vmatprep.subr.bf16.mxu1 %v5530_v52  ;;  %v4018_v2 = vpop.f32.mrb[11].mxu0  ;;  %v913_v52 = vld [vmem:[%s8886_s1 + $0x1b18] sm:$0xff] }
 0x199   :  { %v4052_v3 = vpop.f32.mrb[10].mxu1  ;;  %v4019_v61 = vadd.f32 %v4018_v2, %v4017_v60  ;;  %5501 = vmatpush3.bf16.msra.mxu0 %v5500_v56  ;;  %v1241_v56 = vcombine.high %v8508_v37, %v8508_v37  ;;  %v5582_v60 = vpack.c.bf16 %v931_v55, %v930_v54  ;;  %v908_v54 = vld [vmem:[%s8886_s1 + $0x1af0] sm:$0xff]  ;;  %v909_v55 = vld [vmem:[%s8886_s1 + $0x1af8] sm:$0xff] }
 0x19a   :  { %v4053_v6 = vpop.f32.mrb[11].mxu1  ;;  %5503 = vmatprep.subr.bf16.mxu0 %v5502_v41  ;;  %v5580_v41 = vpack.c.bf16 %v913_v52, %v912_v46  ;;  %v890_v46 = vld [vmem:[%s8886_s1 + $0x1a60] sm:$0xff] }
 0x19b   :  { %v4054_v63 = vadd.f32 %v4053_v6, %v4052_v3  ;;  %5533 = vmatpush3.bf16.msra.mxu1 %v5532_v57  ;;  %v2086_v17 = vadd.f32 %v4019_v61, %v8268_v27  ;;  %v927_v27 = vld [vmem:[%s8886_s1 + $0x1b88] sm:$0xff]  ;;  %v5548_v57 = vpack.c.bf16 %v881_v45, %v880_v44  ;;  %v885_v61 = vld [vmem:[%s8886_s1 + $0x1a38] sm:$0xff]  ;;  %v916_v6 = vld [vmem:[%s8886_s1 + $0x1b30] sm:$0xff]  ;;  %v5596_v44 = vpack.c.bf16 %v921_v34, %v920_v43 }
 0x19c   :  { %5535 = vmatprep.subr.bf16.mxu1 %v5534_v11  ;;  %v5574_v33 = vpack.c.bf16 %v927_v27, %v926_v21  ;;  %v900_v11 = vld [vmem:[%s8886_s1 + $0x1ab0] sm:$0xff]  ;;  %v5556_v15 = vpack.c.bf16 %v885_v61, %v884_v5  ;;  %v5588_v16 = vpack.c.bf16 %v917_v7, %v916_v6  ;;  %v919_v21 = vld [vmem:[%s8886_s1 + $0x1b48] sm:$0xff]  ;;  %v5566_v45 = vpack.c.bf16 %v907_v36, %v906_v39  ;;  %v922_v52 = vld [vmem:[%s8886_s1 + $0x1b60] sm:$0xff] }
 0x19d   :  { %v8478_v13 = vadd.f32 %v4054_v63, %v2086_v17  ;;  %5505 = vmatpush3.bf16.msra.mxu0 %v5504_v8  ;;  %v5554_v4 = vpack.c.bf16 %v901_v62, %v900_v11  ;;  %v5586_v8 = vpack.c.bf16 %v933_v1, %v932_v0  ;;  %v902_v63 = vld [vmem:[%s8886_s1 + $0x1ac0] sm:$0xff]  ;;  %v904_v27 = vld [vmem:[%s8886_s1 + $0x1ad0] sm:$0xff]  ;;  %v5592_v29 = vpack.c.bf16 %v919_v21, %v918_v9  ;;  %v893_v0 = vld [vmem:[%s8886_s1 + $0x1a78] sm:$0xff] }
 0x19e   :  { %5507 = vmatprep.subr.bf16.mxu0 %v5506_v12  ;;  %v934_v12 = vld [vmem:[%s8886_s1 + $0x1bc0] sm:$0xff]  ;;  %v5562_v31 = vpack.c.bf16 %v905_v22, %v904_v27  ;;  %v5570_v11 = vpack.c.bf16 %v909_v55, %v908_v54  ;;  %v892_v62 = vld [vmem:[%s8886_s1 + $0x1a70] sm:$0xff]  ;;  %v959_v61 = vld [vmem:[%s8886_s1 + $0x1c88] sm:$0xff] }
 0x19f   :  { %5537 = vmatpush3.bf16.msra.mxu1 %v5536_v26  ;;  %v903_v26 = vld [vmem:[%s8886_s1 + $0x1ac8] sm:$0xff]  ;;  %v5590_v20 = vpack.c.bf16 %v935_v14, %v934_v12  ;;  %v924_v1 = vld [vmem:[%s8886_s1 + $0x1b70] sm:$0xff]  ;;  %v958_v5 = vld [vmem:[%s8886_s1 + $0x1c80] sm:$0xff] }
 0x1a0   :  { %5539 = vmatprep.subr.bf16.mxu1 %v5538_v18  ;;  %v5558_v17 = vpack.c.bf16 %v903_v26, %v902_v63  ;;  %v886_v18 = vld [vmem:[%s8886_s1 + $0x1a40] sm:$0xff]  ;;  %v8682_v6 = vld [vmem:[%s8885_s0 + $0x70] sm:$0x3f]  ;;  %v5606_v63 = vpack.c.bf16 %v959_v61, %v958_v5  ;;  %v943_v12 = vld [vmem:[%s8886_s1 + $0x1c08] sm:$0xff] }
 0x1a1   :  { %5509 = vmatpush3.bf16.msra.mxu0 %v5508_v24  ;;  %v936_v24 = vld [vmem:[%s8886_s1 + $0x1bd0] sm:$0xff]  ;;  %v942_v26 = vld [vmem:[%s8886_s1 + $0x1c00] sm:$0xff]  ;;  %v945_v21 = vld [vmem:[%s8886_s1 + $0x1c18] sm:$0xff]  ;;  %v1242_v54 = vcombine.high %v8682_v6, %v8682_v6 }
 0x1a2   :  { %5543 = vmatprep.subr.bf16.mxu0 %v5542_v28  ;;  %v5560_v28 = vpack.c.bf16 %v887_v19, %v886_v18  ;;  %v960_v14 = vld [vmem:[%s8886_s1 + $0x1c90] sm:$0xff]  ;;  %v8706_v18 = vrot.slane %v8682_v6, %v5908_v10  ;;  %v5608_v19 = vpack.c.bf16 %v943_v12, %v942_v26  ;;  %v962_v27 = vld [vmem:[%s8886_s1 + $0x1ca0] sm:$0xff]  ;;  %v979_v36 = vld [vmem:[%s8886_s1 + $0x1d28] sm:$0xff] }
 0x1a3   :  { %5541 = vmatpush3.bf16.msra.mxu1 %v5540_v25  ;;  %v937_v25 = vld [vmem:[%s8886_s1 + $0x1bd8] sm:$0xff]  ;;  %v946_v43 = vld [vmem:[%s8886_s1 + $0x1c20] sm:$0xff]  ;;  %v964_v34 = vld [vmem:[%s8886_s1 + $0x1cb0] sm:$0xff] }
 0x1a4   :  { %5575 = vmatprep.subr.bf16.mxu1 %v5574_v33  ;;  %3064 = vmatmul.mubr.f32.vlgmr.msra.gmra.mrb[24].mxu0 %v8289_v49  ;;  %v882_v49 = vld [vmem:[%s8886_s1 + $0x1a20] sm:$0xff]  ;;  %v889_v33 = vld [vmem:[%s8886_s1 + $0x1a58] sm:$0xff]  ;;  %v5594_v23 = vpack.c.bf16 %v937_v25, %v936_v24  ;;  %v963_v24 = vld [vmem:[%s8886_s1 + $0x1ca8] sm:$0xff]  ;;  %v5714_v25 = vmov 0.0|0.0  }
 0x1a5   :  { %5545 = vmatpush3.bf16.msra.mxu0 %v5544_v38  ;;  %3203 = vmatprep.mubr.f32.mxu0 %v1240_v50  ;;  %v5552_v2 = vpack.c.bf16 %v883_v59, %v882_v49  ;;  %v938_v38 = vld [vmem:[%s8886_s1 + $0x1be0] sm:$0xff]  ;;  %v923_v50 = vld [vmem:[%s8886_s1 + $0x1b68] sm:$0xff]  ;;  %v972_v5 = vld [vmem:[%s8886_s1 + $0x1cf0] sm:$0xff] }
 0x1a6   :  { %3134 = vmatmul.mubr.f32.vlgmr.msra.gmra.mrb[24].mxu1 %v8298_v53  ;;  %5547 = vmatprep.subr.bf16.mxu0 %v5546_v42  ;;  %v915_v53 = vld [vmem:[%s8886_s1 + $0x1b28] sm:$0xff]  ;;  %v5564_v42 = vpack.c.bf16 %v889_v33, %v888_v30  ;;  %v5614_v33 = vpack.c.bf16 %v963_v24, %v962_v27  ;;  %v978_v39 = vld [vmem:[%s8886_s1 + $0x1d20] sm:$0xff]  ;;  %v973_v61 = vld [vmem:[%s8886_s1 + $0x1cf8] sm:$0xff] }
 0x1a7   :  { %5577 = vmatpush3.bf16.msra.mxu1 %v5576_v40  ;;  %3273 = vmatprep.mubr.f32.mxu1 %v1241_v56  ;;  %v5584_v3 = vpack.c.bf16 %v915_v53, %v914_v51  ;;  %v939_v40 = vld [vmem:[%s8886_s1 + $0x1be8] sm:$0xff]  ;;  %v5600_v53 = vpack.c.bf16 %v923_v50, %v922_v52 }
 0x1a8   :  { %5579 = vmatprep.subr.bf16.mxu1 %v5578_v47  ;;  %v891_v47 = vld [vmem:[%s8886_s1 + $0x1a68] sm:$0xff]  ;;  %v5598_v32 = vpack.c.bf16 %v939_v40, %v938_v38  ;;  %v5716_v38 = vmov 0.0  }
 0x1a9   :  { %5549 = vmatpush3.bf16.msra.mxu0 %v5548_v57  ;;  %v5568_v51 = vpack.c.bf16 %v891_v47, %v890_v46  ;;  %v966_v46 = vld [vmem:[%s8886_s1 + $0x1cc0] sm:$0xff]  ;;  %v5645_v47 = vpack.c.bf16 %v979_v36, %v978_v39  ;;  %v967_v52 = vld [vmem:[%s8886_s1 + $0x1cc8] sm:$0xff] }
 0x1aa   :  { %5551 = vmatprep.subr.bf16.mxu0 %v5550_v58  ;;  %v941_v58 = vld [vmem:[%s8886_s1 + $0x1bf8] sm:$0xff]  ;;  %v5622_v55 = vpack.c.bf16 %v967_v52, %v966_v46  ;;  %v3420_v39 = vld [vmem:[%s8888_s3 + $0x8] sm:$0xff] }
 0x1ab   :  { %5581 = vmatpush3.bf16.msra.mxu1 %v5580_v41  ;;  %v940_v41 = vld [vmem:[%s8886_s1 + $0x1bf0] sm:$0xff]  ;;  %v3422_v52 = vld [vmem:[%s8888_s3 + $0x18] sm:$0x7] }
 0x1ac   :  { %5583 = vmatprep.subr.bf16.mxu1 %v5582_v60 }
 0x1ad   :  { %5553 = vmatpush3.bf16.msra.mxu0 %v5552_v2 }
 0x1ae   :  { %5555 = vmatprep.subr.bf16.mxu0 %v5554_v4  ;;  %v925_v4 = vld [vmem:[%s8886_s1 + $0x1b78] sm:$0xff] }
 0x1af   :  { %5585 = vmatpush3.bf16.msra.mxu1 %v5584_v3  ;;  %v5602_v3 = vpack.c.bf16 %v941_v58, %v940_v41  ;;  %v5604_v7 = vpack.c.bf16 %v925_v4, %v924_v1  ;;  %v968_v58 = vld [vmem:[%s8886_s1 + $0x1cd0] sm:$0xff] }
 0x1b0   :  { %5587 = vmatprep.subr.bf16.mxu1 %v5586_v8  ;;  %v5572_v8 = vpack.c.bf16 %v893_v0, %v892_v62  ;;  %v970_v62 = vld [vmem:[%s8886_s1 + $0x1ce0] sm:$0xff] }
 0x1b1   :  { %5557 = vmatpush3.bf16.msra.mxu0 %v5556_v15  ;;  %v961_v15 = vld [vmem:[%s8886_s1 + $0x1c98] sm:$0xff] }
 0x1b2   :  { %5559 = vmatprep.subr.bf16.mxu0 %v5558_v17  ;;  %v975_v17 = vld [vmem:[%s8886_s1 + $0x1d08] sm:$0xff]  ;;  %v5610_v9 = vpack.c.bf16 %v961_v15, %v960_v14  ;;  %v5634_v14 = vpack.c.bf16 %v973_v61, %v972_v5  ;;  %v956_v15 = vld [vmem:[%s8886_s1 + $0x1c70] sm:$0xff] }
 0x1b3   :  { %5589 = vmatpush3.bf16.msra.mxu1 %v5588_v16  ;;  %v974_v16 = vld [vmem:[%s8886_s1 + $0x1d00] sm:$0xff] }
 0x1b4   :  { %5591 = vmatprep.subr.bf16.mxu1 %v5590_v20  ;;  %v944_v20 = vld [vmem:[%s8886_s1 + $0x1c10] sm:$0xff]  ;;  %v5639_v22 = vpack.c.bf16 %v975_v17, %v974_v16  ;;  %v957_v16 = vld [vmem:[%s8886_s1 + $0x1c78] sm:$0xff] }
 0x1b5   :  { %5561 = vmatpush3.bf16.msra.mxu0 %v5560_v28  ;;  %v976_v28 = vld [vmem:[%s8886_s1 + $0x1d10] sm:$0xff]  ;;  %v5612_v30 = vpack.c.bf16 %v945_v21, %v944_v20 }
 0x1b6   :  { %5563 = vmatprep.subr.bf16.mxu0 %v5562_v31  ;;  %v1257_v31 = vcombine.high %v8706_v18, %v8706_v18 }
 0x1b7   :  { %5593 = vmatpush3.bf16.msra.mxu1 %v5592_v29  ;;  %v4087_v48 = vpop.f32.mrb[12].mxu0  ;;  %v977_v29 = vld [vmem:[%s8886_s1 + $0x1d18] sm:$0xff] }
 0x1b8   :  { %5595 = vmatprep.subr.bf16.mxu1 %v5594_v23  ;;  %v4088_v56 = vpop.f32.mrb[13].mxu0  ;;  %v947_v23 = vld [vmem:[%s8886_s1 + $0x1c28] sm:$0xff] }
 0x1b9   :  { %v4122_v57 = vpop.f32.mrb[12].mxu1  ;;  %v4089_v49 = vadd.f32 %v4088_v56, %v4087_v48  ;;  %5565 = vmatpush3.bf16.msra.mxu0 %v5564_v42  ;;  %v5616_v40 = vpack.c.bf16 %v947_v23, %v946_v43  ;;  %v980_v48 = vld [vmem:[%s8886_s1 + $0x1d30] sm:$0xff]  ;;  %v950_v56 = vld [vmem:[%s8886_s1 + $0x1c40] sm:$0xff] }
 0x1ba   :  { %v4123_v59 = vpop.f32.mrb[13].mxu1  ;;  %5567 = vmatprep.subr.bf16.mxu0 %v5566_v45  ;;  %v949_v45 = vld [vmem:[%s8886_s1 + $0x1c38] sm:$0xff] }
 0x1bb   :  { %v4124_v60 = vadd.f32 %v4123_v59, %v4122_v57  ;;  %5597 = vmatpush3.bf16.msra.mxu1 %v5596_v44  ;;  %v2226_v2 = vadd.f32 %v4089_v49, %v8478_v13  ;;  %v948_v44 = vld [vmem:[%s8886_s1 + $0x1c30] sm:$0xff]  ;;  %v951_v57 = vld [vmem:[%s8886_s1 + $0x1c48] sm:$0xff]  ;;  %v969_v49 = vld [vmem:[%s8886_s1 + $0x1cd8] sm:$0xff] }
 0x1bc   :  { %5599 = vmatprep.subr.bf16.mxu1 %v5598_v32  ;;  %v981_v32 = vld [vmem:[%s8886_s1 + $0x1d38] sm:$0xff]  ;;  %v5620_v50 = vpack.c.bf16 %v949_v45, %v948_v44  ;;  %v5624_v59 = vpack.c.bf16 %v951_v57, %v950_v56 }
 0x1bd   :  { %v8684_v13 = vadd.f32 %v4124_v60, %v2226_v2  ;;  %5569 = vmatpush3.bf16.msra.mxu0 %v5568_v51  ;;  %v5648_v41 = vpack.c.bf16 %v981_v32, %v980_v48  ;;  %v1256_v51 = vrot.slane %v1242_v54, %v5908_v10  ;;  %v5626_v60 = vpack.c.bf16 %v969_v49, %v968_v58  ;;  %v971_v10 = vld [vmem:[%s8886_s1 + $0x1ce8] sm:$0xff]  ;;  %v954_v2 = vld [vmem:[%s8886_s1 + $0x1c60] sm:$0xff] }
 0x1be   :  { %5571 = vmatprep.subr.bf16.mxu0 %v5570_v11  ;;  %v953_v11 = vld [vmem:[%s8886_s1 + $0x1c58] sm:$0xff]  ;;  %v5630_v1 = vpack.c.bf16 %v971_v10, %v970_v62 }
 0x1bf   :  { %5601 = vmatpush3.bf16.msra.mxu1 %v5600_v53  ;;  %v952_v53 = vld [vmem:[%s8886_s1 + $0x1c50] sm:$0xff] }
 0x1c0   :  { %5603 = vmatprep.subr.bf16.mxu1 %v5602_v3  ;;  %v5628_v0 = vpack.c.bf16 %v953_v11, %v952_v53  ;;  %v955_v3 = vld [vmem:[%s8886_s1 + $0x1c68] sm:$0xff] }
 0x1c1   :  { %5573 = vmatpush3.bf16.msra.mxu0 %v5572_v8  ;;  %v5632_v26 = vpack.c.bf16 %v955_v3, %v954_v2 }
 0x1c2   :  { %5607 = vmatprep.subr.bf16.mxu0 %v5606_v63 }
 0x1c3   :  { %5605 = vmatpush3.bf16.msra.mxu1 %v5604_v7 }
 0x1c4   :  { %5638 = vmatprep.subr.bf16.mxu1 %v5714_v25  ;;  %3204 = vmatmul.mubr.f32.vlgmr.msra.gmra.mrb[26].mxu0 %v8499_v35  ;;  %v5642_v35 = vpack.c.bf16 %v977_v29, %v976_v28 }
 0x1c5   :  { %5609 = vmatpush3.bf16.msra.mxu0 %v5608_v19  ;;  %3343 = vmatprep.mubr.f32.mxu0 %v1257_v31 }
 0x1c6   :  { %3274 = vmatmul.mubr.f32.vlgmr.msra.gmra.mrb[26].mxu1 %v8508_v37  ;;  %5611 = vmatprep.subr.bf16.mxu0 %v5610_v9  ;;  %v965_v37 = vld [vmem:[%s8886_s1 + $0x1cb8] sm:$0xff]  ;;  %v5636_v9 = vpack.c.bf16 %v957_v16, %v956_v15 }
 0x1c7   :  { %5640 = vmatpush3.bf16.msra.mxu1 %v5639_v22  ;;  %4685 = vmatprep.mubr.msk.f32.mxu1 %vm5715_vm0, %v5716_v38  ;;  %v5618_v42 = vpack.c.bf16 %v965_v37, %v964_v34 }
 0x1c8   :  { %5641 = vmatprep.subr.bf16.mxu1 %v5714_v25 }
 0x1c9   :  { %5613 = vmatpush3.bf16.msra.mxu0 %v5612_v30 }
 0x1ca   :  { %5615 = vmatprep.subr.bf16.mxu0 %v5614_v33 }
 0x1cb   :  { %5643 = vmatpush3.bf16.msra.mxu1 %v5642_v35 }
 0x1cc   :  { %5644 = vmatprep.subr.bf16.mxu1 %v5714_v25 }
 0x1cd   :  { %5617 = vmatpush3.bf16.msra.mxu0 %v5616_v40 }
 0x1ce   :  { %5619 = vmatprep.subr.bf16.mxu0 %v5618_v42 }
 0x1cf   :  { %5646 = vmatpush3.bf16.msra.mxu1 %v5645_v47  ;;  %v3421_v47 = vld [vmem:[%s8888_s3 + $0x10] sm:$0xff] }
 0x1d0   :  { %5647 = vmatprep.subr.bf16.mxu1 %v5714_v25  ;;  %v5654_v32 = vpack.c.bf16 %v3422_v52, %v3421_v47 }
 0x1d1   :  { %5621 = vmatpush3.bf16.msra.mxu0 %v5620_v50 }
 0x1d2   :  { %5623 = vmatprep.subr.bf16.mxu0 %v5622_v55 }
 0x1d3   :  { %5649 = vmatpush3.bf16.msra.mxu1 %v5648_v41 }
 0x1d4   :  { %5650 = vmatprep.subr.bf16.mxu1 %v5714_v25 }
 0x1d5   :  { %5625 = vmatpush3.bf16.msra.mxu0 %v5624_v59 }
 0x1d6   :  { %4686 = vmatmul.mubr.msk.f32.vlgmr.msra.gmra.mrb[28].mxu1 %vm1316_vm1, %v1256_v51  ;;  %5627 = vmatprep.subr.bf16.mxu0 %v5626_v60 }
 0x1d7   :  { %4696 = vmatprep.mubr.msk.f32.mxu1 %vm5715_vm0, %v5716_v38  ;;  %v4157_v4 = vpop.f32.mrb[14].mxu0 }
 0x1d8   :  { %v4158_v6 = vpop.f32.mrb[15].mxu0 }
 0x1d9   :  { %v4192_v8 = vpop.f32.mrb[14].mxu1  ;;  %v4159_v7 = vadd.f32 %v4158_v6, %v4157_v4  ;;  %5629 = vmatpush3.bf16.msra.mxu0 %v5628_v0 }
 0x1da   :  { %v4193_v63 = vpop.f32.mrb[15].mxu1  ;;  %5631 = vmatprep.subr.bf16.mxu0 %v5630_v1 }
 0x1db   :  { %v4194_v12 = vadd.f32 %v4193_v63, %v4192_v8  ;;  %v2366_v17 = vadd.f32 %v4159_v7, %v8684_v13 }
 0x1dd   :  { %v2436_v19 = vadd.f32 %v4194_v12, %v2366_v17  ;;  %5633 = vmatpush3.bf16.msra.mxu0 %v5632_v26 }
 0x1de   :  { %5635 = vmatprep.subr.bf16.mxu0 %v5634_v14 }
 0x1e1   :  { %5637 = vmatpush3.bf16.msra.mxu0 %v5636_v9  ;;  %v3514_v9 = vld [vmem:[%s8891_s6 + $0x8] sm:$0xff] }
 0x1e4   :  { %3344 = vmatmul.mubr.f32.vlgmr.msra.gmra.mrb[28].mxu0 %v8706_v18  ;;  %v3419_v18 = vld [vmem:[%s8888_s3] sm:$0xff] }
 0x1e5   :  { %v5651_v36 = vpack.c.bf16 %v3420_v39, %v3419_v18 }
 0x1e7   :  { %5652 = vmatpush3.bf16.msra.mxu1 %v5651_v36 }
 0x1e8   :  { %5653 = vmatprep.subr.bf16.mxu1 %v5714_v25 }
 0x1eb   :  { %5656 = vmatpush3.bf16.msk.msra.mxu1 %vm8835_vm4, %v5654_v32 }
 0x1ec   :  { %5657 = vmatprep.subr.bf16.mxu1 %v5714_v25 }
 0x1f7   :  { %v4227_v20 = vpop.f32.mrb[16].mxu0 }
 0x1f8   :  { %v4228_v21 = vpop.f32.mrb[17].mxu0 }
 0x1f9   :  { %v4262_v27 = vpop.f32.mrb[16].mxu1  ;;  %v4229_v22 = vadd.f32 %v4228_v21, %v4227_v20 }
 0x1fa   :  { %v4263_v24 = vpop.f32.mrb[17].mxu1 }
 0x1fb   :  { %v4264_v28 = vadd.f32 %v4263_v24, %v4262_v27  ;;  %v2506_v29 = vadd.f32 %v4229_v22, %v2436_v19  ;;  %v3513_v19 = vld [vmem:[%s8891_s6] sm:$0xff]  ;;  %v3515_v22 = vld [vmem:[%s8891_s6 + $0x10] sm:$0xff]  ;;  %v3516_v24 = vld [vmem:[%s8891_s6 + $0x18] sm:$0x7] }
 0x1fc   :  { %v5658_v21 = vpack.c.bf16 %v3514_v9, %v3513_v19 }
 0x1fd   :  { %v2576_v31 = vadd.f32 %v4264_v28, %v2506_v29  ;;  %v5661_v28 = vpack.c.bf16 %v3516_v24, %v3515_v22  ;;  %v3629_v29 = vld [vmem:[%s8889_s4] ss:$0 sm:$0xff]  ;;  %s5718_s4 = smov [#allocation3]  }
 0x217   :  { %v4297_v30 = vpop.f32.mrb[18].mxu0 }
 0x218   :  { %v4298_v33 = vpop.f32.mrb[19].mxu0 }
 0x219   :  { %v4332_v43 = vpop.f32.mrb[18].mxu1  ;;  %v4299_v23 = vadd.f32 %v4298_v33, %v4297_v30 }
 0x21a   :  { %v4333_v13 = vpop.f32.mrb[19].mxu1 }
 0x21b   :  { %v4334_v34 = vadd.f32 %v4333_v13, %v4332_v43  ;;  %v2646_v35 = vadd.f32 %v4299_v23, %v2576_v31  ;;  %v3632_v23 = vld [vmem:[%s8892_s7] ss:$0 sm:$0xff] }
 0x21d   :  { %v2716_v37 = vadd.f32 %v4334_v34, %v2646_v35 }
 0x237   :  { %v4367_v40 = vpop.f32.mrb[20].mxu0 }
 0x238   :  { %v4368_v42 = vpop.f32.mrb[21].mxu0 }
 0x239   :  { %v4402_v44 = vpop.f32.mrb[20].mxu1  ;;  %v4369_v45 = vadd.f32 %v4368_v42, %v4367_v40 }
 0x23a   :  { %v4403_v46 = vpop.f32.mrb[21].mxu1 }
 0x23b   :  { %v4404_v48 = vadd.f32 %v4403_v46, %v4402_v44  ;;  %v2786_v50 = vadd.f32 %v4369_v45, %v2716_v37 }
 0x23d   :  { %v2856_v55 = vadd.f32 %v4404_v48, %v2786_v50 }
 0x257   :  { %v4437_v56 = vpop.f32.mrb[22].mxu0 }
 0x258   :  { %v4438_v57 = vpop.f32.mrb[23].mxu0 }
 0x259   :  { %v4472_v41 = vpop.f32.mrb[22].mxu1  ;;  %v4439_v58 = vadd.f32 %v4438_v57, %v4437_v56 }
 0x25a   :  { %v4473_v49 = vpop.f32.mrb[23].mxu1 }
 0x25b   :  { %v4474_v59 = vadd.f32 %v4473_v49, %v4472_v41  ;;  %v2926_v51 = vadd.f32 %v4439_v58, %v2856_v55 }
 0x25d   :  { %v2996_v60 = vadd.f32 %v4474_v59, %v2926_v51 }
 0x277   :  { %v4507_v53 = vpop.f32.mrb[24].mxu0 }
 0x278   :  { %v4508_v11 = vpop.f32.mrb[25].mxu0 }
 0x279   :  { %v4542_v62 = vpop.f32.mrb[24].mxu1  ;;  %v4509_v10 = vadd.f32 %v4508_v11, %v4507_v53 }
 0x27a   :  { %v4543_v0 = vpop.f32.mrb[25].mxu1 }
 0x27b   :  { %v4544_v1 = vadd.f32 %v4543_v0, %v4542_v62  ;;  %v3066_v2 = vadd.f32 %v4509_v10, %v2996_v60 }
 0x27d   :  { %v3136_v3 = vadd.f32 %v4544_v1, %v3066_v2 }
 0x297   :  { %v4577_v4 = vpop.f32.mrb[26].mxu0 }
 0x298   :  { %v4578_v5 = vpop.f32.mrb[27].mxu0 }
 0x299   :  { %v4612_v61 = vpop.f32.mrb[26].mxu1  ;;  %v4579_v6 = vadd.f32 %v4578_v5, %v4577_v4 }
 0x29a   :  { %v4613_v8 = vpop.f32.mrb[27].mxu1 }
 0x29b   :  { %v4614_v7 = vadd.f32 %v4613_v8, %v4612_v61  ;;  %v3206_v63 = vadd.f32 %v4579_v6, %v3136_v3 }
 0x29d   :  { %v3276_v26 = vadd.f32 %v4614_v7, %v3206_v63 }
 0x2a9   :  { %v3415_v12 = vpop.f32.mrb[28].mxu1 }
 0x2aa   :  { %v4687_v14 = vpop.f32.mrb[29].mxu1 }
 0x2b7   :  { %v4647_v15 = vpop.f32.mrb[28].mxu0 }
 0x2b8   :  { %v4648_v16 = vpop.f32.mrb[29].mxu0 }
 0x2b9   :  { %v4649_v17 = vadd.f32 %v4648_v16, %v4647_v15 }
 0x2bb   :  { %v3346_v20 = vadd.f32 %v4649_v17, %v3276_v26 }
 0x2bd   :  { %v3416_v27 = vadd.f32 %v3415_v12, %v3346_v20 }
 0x2bf   :  { %4697 = vmatmul.mubr.msk.f32.vlgmr.msra.gmra.mrb[30].mxu1 %vm3430_vm5, %v3416_v27 }
 0x2c0   :  { %5659 = vmatpush3.bf16.msra.mxu1 %v5658_v21  ;;  %4707 = vmatprep.mubr.msk.f32.mxu1 %vm5715_vm0, %v5716_v38 }
 0x2c1   :  { %5660 = vmatprep.subr.bf16.mxu1 %v5714_v25  ;;  %v3510_v25 = vstv %s8890_s5  ;;  %s3619_s5 = sshll.u32 %s5718_s4, 4  ;;  %s3620_s5 = int_to_ptr.vmem [resolvable:$true] %s3619_s5 }
 0x2c2   :  { %s5689_s7 = scalar_lea.vmem %s3620_s5, 32  ;;  %p5694_p1 = scmp.lt.s32.totalorder %s3620_s5, %s3620_s5 }
 0x2c3   :  { %p5690_p0 = scmp.ne.s32.totalorder %s3620_s5, %s5689_s7  ;;  %p5695_p2 = scmp.lt.s32.totalorder %s5689_s7, %s5689_s7 }
 0x2c4   :  { %5663 = vmatpush3.bf16.msk.msra.mxu1 %vm8835_vm4, %v5661_v28 }
 0x2c5   :  { %p5696_p3 = por %p5695_p2, %p5694_p1 }
 0x2c7   :  { %p5697_p4 = pnand %p5696_p3, %p5690_p0 }
 0x392   :  { %v3504_v31 = vpop.f32.mrb[30].mxu1 }
 0x393   :  { %v3505_v38 = vadd.f32 %v3629_v29, %v3504_v31  ;;  %v4698_v30 = vpop.f32.mrb[31].mxu1 }
 0x395   :  { %vm3509_vm6 = vcmp.gt.f32.partialorder %v3505_v38, 0.0  ;;  %v3511_v33 = vmul.f32 %v3510_v25, %v3505_v38 }
 0x397   :  { %v3512_v43 = vsel %vm3509_vm6, %v3505_v38, %v3511_v33 }
 0x398   :  { %4708 = vmatmul.mubr.msk.f32.vlgmr.msra.gmra.mrb[32].mxu1 %vm3430_vm5, %v3512_v43 }
 0x46b   :  { %v3596_v13 = vpop.f32.mrb[32].mxu1 }
 0x46c   :  { %v3597_v34 = vadd.f32 %v3632_v23, %v3596_v13  ;;  %v4709_v35 = vpop.f32.mrb[33].mxu1 }
 0x46e   :  { %v3601_v37 = vsel %vm3600_vm7, %v3597_v34, -inf }
 0x46f   :  { %3602 = vmax.xlane.f32.xlu0 %v3601_v37 }
 0x4fc   :  { %v3603_v18 = vpop.xlane.xlu0 %3602 }
 0x4fd   :  { %v3604_v39 = vsub.f32 %v3597_v34, %v3603_v18 }
 0x4ff   :  { %v3605_v36 = vmul.f32 1.442695, %v3604_v39 }
 0x501   :  { %5685 = vpow2.f32 %v3605_v36 }
 0x50b   :  { %v5686_v40 = vpop.eup %5685 }
 0x50c   :  { %v3607_v42 = vsel %vm3600_vm7, %v5686_v40, 0.0 }
 0x50d   :  { %3608 = vadd.xlane.f32.xlu0 %v3607_v42 }
 0x59a   :  { %v3609_v44 = vpop.xlane.xlu0 %3608 }
 0x59b   :  { %5687 = vrcp.f32 %v3609_v44 }
 0x5a5   :  { %v5688_v45 = vpop.eup %5687 }
 0x5a6   :  { %v3611_v46 = vmul.f32 %v5688_v45, %v5686_v40 }
 0x5a8   :  { %3612 = vst.msk [vmem:[#allocation3] sm:$0x3] %vm3600_vm7, %v3611_v46 }
 0x5a9   :  { %5700 = shalt.err (!%p5697_p4)
}
 0x5aa   :  { %s5701_s17 = scalar_lea.hbm %s8893_s8, 32 }
 0x5ab   :  { %p5702_p5 = scmp.ne.s32.totalorder %s8893_s8, %s5701_s17  ;;  %p5705_p6 = scmp.lt.u32.totalorder %s5701_s17, %s8893_s8 }
 0x5ad   :  { %p5707_p7 = pnand %p5705_p6, %p5702_p5 }
 0x5af   :  { %5710 = shalt.err (!%p5707_p7)
}
 0x5b0   :  { %3622 = dma.vmem_to_hbm [thread:$0]  %s3620_s5, 32, %s8893_s8, [#allocation4]  }
 0x5b1   :  { %5711 = dma.done.wait [#allocation4], 32  }
 0x5b2   :  { %5712 = vsyncadd [#allocation4], 4294967264 }
 0x5b3   :  { %3626 = vsyncpa [#allocation4], 1 }

</bundles_post_ra>
